<compile_context>
chip_gen: v7x
topology: tpu7x:2x2x1
jax: 0.10.0
libtpu: 0.0.40
codegen_flags: <defaults>
</compile_context>

<pallas_src>
import functools

import jax
import jax.numpy as jnp
from jax.experimental import pallas as pl
from jax.experimental.pallas import tpu as pltpu


# ----------------------------------------------------------------------------
# Generic tiled matmul + bias kernel (used for the hoisted input projection
# and for the fused emission projection).
# ----------------------------------------------------------------------------
def _linear_bias_kernel(x_ref, w_ref, b_ref, o_ref):
    o_ref[...] = (jnp.dot(x_ref[...], w_ref[...],
                          preferred_element_type=jnp.float32)
                  + b_ref[...])


def _linear_bias(x, w_bf16, b_f32, *, tm=128):
    """out = x @ w + b, row-tiled at `tm`. x: (N, K) f32, w: (K, M) bf16."""
    N, K = x.shape
    M = w_bf16.shape[1]
    n_pad = pl.cdiv(N, tm) * tm
    x_p = jnp.pad(x, ((0, n_pad - N), (0, 0))) if n_pad != N else x

    out = pl.pallas_call(
        _linear_bias_kernel,
        out_shape=jax.ShapeDtypeStruct((n_pad, M), jnp.float32),
        grid_spec=pltpu.PrefetchScalarGridSpec(
            num_scalar_prefetch=0,
            grid=(n_pad // tm,),
            in_specs=[
                pl.BlockSpec((tm, K), lambda i: (i, 0)),
                pl.BlockSpec((K, M), lambda i: (0, 0)),
                pl.BlockSpec((1, M), lambda i: (0, 0)),
            ],
            out_specs=pl.BlockSpec((tm, M), lambda i: (i, 0)),
        ),
        compiler_params=pltpu.CompilerParams(
            dimension_semantics=("parallel",)),
    )(x_p.astype(jnp.bfloat16), w_bf16, b_f32)
    return out[:N] if n_pad != N else out


# ----------------------------------------------------------------------------
# Recurrent LSTM kernel: TK timesteps per grid step, pre-gates precomputed.
# ----------------------------------------------------------------------------
def _lstm_rec_kernel(lens_ref, pg_ref, whh_ref, o_ref, h_ref, c_ref,
                     *, tk, reverse):
    """Process `tk` timesteps of one LSTM direction.

    lens_ref : (B, 1) int32   valid lengths (constant across the grid)
    pg_ref   : (tk, B, 4H) f32  pre-gates  x @ W_ih + (b_ih + b_hh)
    whh_ref  : (H, 4H) bf16     recurrent weights (gate order i, f, g, o)
    o_ref    : (tk, B, H) f32   hidden-state output (zero at padded positions)
    h_ref/c_ref : (B, H) f32 VMEM scratch carrying the recurrent state
    """
    H = h_ref.shape[-1]
    tb = pl.program_id(0)
    l_pad = pl.num_programs(0) * tk

    @pl.when(tb == 0)
    def _():
        h_ref[...] = jnp.zeros_like(h_ref)
        c_ref[...] = jnp.zeros_like(c_ref)

    lens = lens_ref[...]          # (B, 1) int32
    whh = whh_ref[...]            # (H, 4H) bf16

    def step(s, carry):
        h, c = carry
        if reverse:
            local = tk - 1 - s                       # position within block
            t = l_pad - 1 - (tb * tk + s)            # global time index
        else:
            local = s
            t = tb * tk + s

        pg = pg_ref[local]                           # (B, 4H) f32
        gates = pg + jnp.dot(h.astype(jnp.bfloat16), whh,
                             preferred_element_type=jnp.float32)

        # NOTE: sub-128 gate slices are unavoidable at small H (no lane pad).
        i = jax.nn.sigmoid(gates[:, 0 * H:1 * H])
        f = jax.nn.sigmoid(gates[:, 1 * H:2 * H])
        g = jnp.tanh(gates[:, 2 * H:3 * H])
        o = jax.nn.sigmoid(gates[:, 3 * H:4 * H])

        c_new = f * c + i * g
        h_new = o * jnp.tanh(c_new)

        keep = t < lens                              # (B, 1), broadcasts over H
        h = jnp.where(keep, h_new, h)
        c = jnp.where(keep, c_new, c)
        o_ref[local] = jnp.where(keep, h_new, jnp.zeros_like(h_new))
        return h, c

    h, c = jax.lax.fori_loop(0, tk, step, (h_ref[...], c_ref[...]),
                             unroll=True)
    h_ref[...] = h
    c_ref[...] = c


def _lstm_direction(pre_gates, lens_col, whh_bf16, hidden, *, reverse, tk):
    """Run one LSTM direction over the whole (time-padded) sequence."""
    L_pad, B, fourH = pre_gates.shape
    nb = L_pad // tk
    if reverse:
        tmap = lambda tb: (nb - 1 - tb, 0, 0)
    else:
        tmap = lambda tb: (tb, 0, 0)

    kernel = functools.partial(_lstm_rec_kernel, tk=tk, reverse=reverse)
    return pl.pallas_call(
        kernel,
        out_shape=jax.ShapeDtypeStruct((L_pad, B, hidden), jnp.float32),
        grid_spec=pltpu.PrefetchScalarGridSpec(
            num_scalar_prefetch=0,
            grid=(nb,),
            in_specs=[
                pl.BlockSpec((B, 1), lambda tb: (0, 0)),            # lengths
                pl.BlockSpec((tk, B, fourH), tmap),                 # pre-gates
                pl.BlockSpec((hidden, fourH), lambda tb: (0, 0)),   # W_hh
            ],
            out_specs=pl.BlockSpec((tk, B, hidden), tmap),
            scratch_shapes=[
                pltpu.VMEM((B, hidden), jnp.float32),
                pltpu.VMEM((B, hidden), jnp.float32),
            ],
        ),
        compiler_params=pltpu.CompilerParams(
            dimension_semantics=("arbitrary",)),
    )(lens_col, pre_gates, whh_bf16)


# ----------------------------------------------------------------------------
# Parameter initialization (mirrors __init__ / reset_parameters; weights are
# pre-transposed / pre-fused / bf16-cast for the kernels).
# ----------------------------------------------------------------------------
def _xavier_uniform(key, shape):
    fan_out, fan_in = shape
    bound = (6.0 / (fan_in + fan_out)) ** 0.5
    return jax.random.uniform(key, shape, jnp.float32, -bound, bound)


def init_params(key, *, n_char, n_bichar, char_dim, bert_dim, word_hidden,
                n_layers, n_target, n_target2, n_labels,
                label1_index, label2_index):
    H = word_hidden // 2
    keys = iter(jax.random.split(key, 64))

    emb_char = jax.random.normal(next(keys), (n_char, char_dim)) / (char_dim ** 0.5)
    emb_char = emb_char.at[0].set(0.0)                      # padding_idx=0
    emb_bichar = jax.random.normal(next(keys), (n_bichar, char_dim)) / (char_dim ** 0.5)
    emb_bichar = emb_bichar.at[0].set(0.0)

    lstm_layers = []
    input_size = 2 * char_dim + bert_dim                    # n_layers > 1 branch
    for _layer in range(n_layers):
        per_dir = []
        for _direction in range(2):                         # fwd, bwd
            bound = 1.0 / (H ** 0.5)
            wih = jax.random.uniform(next(keys), (4 * H, input_size),
                                     jnp.float32, -bound, bound)
            whh = jax.random.uniform(next(keys), (4 * H, H),
                                     jnp.float32, -bound, bound)
            b_ih = jax.random.uniform(next(keys), (4 * H,), jnp.float32, -bound, bound)
            b_hh = jax.random.uniform(next(keys), (4 * H,), jnp.float32, -bound, bound)
            per_dir.append((wih.T, whh.T, b_ih + b_hh))     # (Din,4H),(H,4H),(4H,)
        wih_cat = jnp.concatenate([per_dir[0][0], per_dir[1][0]],
                                  axis=1).astype(jnp.bfloat16)      # (Din, 8H)
        b_cat = jnp.concatenate([per_dir[0][2], per_dir[1][2]]
                                ).reshape(1, 8 * H).astype(jnp.float32)
        lstm_layers.append({
            "wih_cat": wih_cat,
            "b_cat": b_cat,
            "whh_f": per_dir[0][1].astype(jnp.bfloat16),
            "whh_b": per_dir[1][1].astype(jnp.bfloat16),
        })
        input_size = word_hidden                             # next layer input

    def linear(key_w, key_b, out_dim):
        w = _xavier_uniform(key_w, (out_dim, word_hidden))
        bound = 1.0 / (word_hidden ** 0.5)
        b = jax.random.uniform(key_b, (out_dim,), jnp.float32, -bound, bound)
        return w.T, b                                        # (Wh, out_dim), (out_dim,)

    w1t, b1 = linear(next(keys), next(keys), n_target)
    w2t, b2 = linear(next(keys), next(keys), n_target2)
    wat, ba = linear(next(keys), next(keys), n_labels)

    # Exact algebraic fusion of: out + out1[..., label1_index] + out2[..., label2_index]
    g1 = jax.nn.one_hot(jnp.asarray(label1_index), n_target, dtype=jnp.float32).T
    g2 = jax.nn.one_hot(jnp.asarray(label2_index), n_target2, dtype=jnp.float32).T
    w_fused = (wat + w1t @ g1 + w2t @ g2).astype(jnp.bfloat16)       # (Wh, n_labels)
    b_fused = (ba + b1 @ g1 + b2 @ g2).reshape(1, n_labels).astype(jnp.float32)

    return {
        "emb_char": emb_char.astype(jnp.float32),
        "emb_bichar": emb_bichar.astype(jnp.float32),
        "lstm": lstm_layers,
        "w_fused": w_fused,
        "b_fused": b_fused,
    }


# ----------------------------------------------------------------------------
# Forward pass (glue in JAX, hot paths in Pallas). Jittable: all shape info is
# derived from static array shapes.
# ----------------------------------------------------------------------------
def char_lstm_crf_forward(params, char_idxs, bichar_idxs, bert_outs, *, tk=8):
    B, L = char_idxs.shape
    H = params["lstm"][0]["whh_f"].shape[0]
    word_hidden = 2 * H
    n_labels = params["w_fused"].shape[1]

    # Embedding lookups (padding row 0 is zero).  drop1: eval-mode identity.
    char_vec = jnp.take(params["emb_char"], char_idxs, axis=0)
    bichar_vec = jnp.take(params["emb_bichar"], bichar_idxs, axis=0)
    feature = jnp.concatenate(
        [char_vec, bichar_vec, bert_outs.astype(jnp.float32)], axis=-1)

    # pack_padded_sequence equivalent: valid while t < sen_len[b].
    sen_lens = (char_idxs > 0).sum(axis=1).astype(jnp.int32)
    lens_col = sen_lens.reshape(B, 1)

    # Time-major, padded to a multiple of the time-block size.
    L_pad = pl.cdiv(L, tk) * tk
    x = jnp.transpose(feature, (1, 0, 2)).astype(jnp.float32)     # (L, B, Din)
    if L_pad != L:
        x = jnp.pad(x, ((0, L_pad - L), (0, 0), (0, 0)))

    for lp in params["lstm"]:
        Din = x.shape[-1]
        # Hoisted input projection for all timesteps and BOTH directions.
        pg = _linear_bias(x.reshape(L_pad * B, Din), lp["wih_cat"], lp["b_cat"])
        pg = pg.reshape(L_pad, B, 8 * H)
        out_f = _lstm_direction(pg[..., :4 * H], lens_col, lp["whh_f"], H,
                                reverse=False, tk=tk)
        out_b = _lstm_direction(pg[..., 4 * H:], lens_col, lp["whh_b"], H,
                                reverse=True, tk=tk)
        x = jnp.concatenate([out_f, out_b], axis=-1)              # (L_pad, B, 2H)
        # inter-layer LSTM dropout (0.2) is identity in eval mode.

    out = jnp.transpose(x, (1, 0, 2))[:, :L]                      # (B, L, 2H)
    flat = out.reshape(B * L, word_hidden)
    emit = _linear_bias(flat, params["w_fused"], params["b_fused"])
    return emit.reshape(B, L, n_labels)


# ----------------------------------------------------------------------------
if __name__ == "__main__":
    # Small, forward-consistent shapes.
    B, L = 2, 8
    n_char, n_bichar = 50, 60
    char_dim = 16
    bert_dim = 768                      # hardwired in the module
    word_hidden = 32
    n_layers = 2                        # takes the (char_dim*2 + 768) LSTM branch
    n_target, n_target2 = 5, 4
    n_labels = n_target * n_target2
    label1_index = [k // n_target2 for k in range(n_labels)]
    label2_index = [k % n_target2 for k in range(n_labels)]

    key = jax.random.PRNGKey(0)
    k_par, k_c, k_bc, k_bert = jax.random.split(key, 4)

    params = init_params(
        k_par, n_char=n_char, n_bichar=n_bichar, char_dim=char_dim,
        bert_dim=bert_dim, word_hidden=word_hidden, n_layers=n_layers,
        n_target=n_target, n_target2=n_target2, n_labels=n_labels,
        label1_index=label1_index, label2_index=label2_index)

    char_idxs = jax.random.randint(k_c, (B, L), 1, n_char)
    bichar_idxs = jax.random.randint(k_bc, (B, L), 1, n_bichar)
    # Variable lengths (exercise the packing/masking path): lengths = [8, 5].
    char_idxs = char_idxs.at[1, 5:].set(0)
    bichar_idxs = bichar_idxs.at[1, 5:].set(0)
    bert_outs = jax.random.normal(k_bert, (B, L, bert_dim), jnp.float32)

    fwd = jax.jit(char_lstm_crf_forward)
    out_all = fwd(params, char_idxs, bichar_idxs, bert_outs)
    out_all = jax.block_until_ready(out_all)

    assert out_all.shape == (B, L, n_labels), out_all.shape
    assert out_all.dtype == jnp.float32
    assert bool(jnp.all(jnp.isfinite(out_all)))
    print("KERNEL_OK")
</pallas_src>

<mosaic_0001>
module attributes {stable_mosaic.version = 11 : i64} {
  func.func @_linear_bias_kernel(%arg0: i32, %arg1: memref<128x800xbf16, #tpu.memory_space<vmem>>, %arg2: memref<800x128xbf16, #tpu.memory_space<vmem>>, %arg3: memref<1x128xf32, #tpu.memory_space<vmem>>, %arg4: memref<128x128xf32, #tpu.memory_space<vmem>>) attributes {dimension_semantics = [#tpu.dimension_semantics<parallel>], iteration_bounds = array<i64: 1>, scalar_prefetch = 0 : i64, scratch_operands = 0 : i64, tpu.core_type = #tpu.core_type<tc>, window_params = [{transform_indices = @transform_0, window_bounds = array<i64: 128, 800>}, {pipeline_mode = #tpu.pipeline_mode<synchronous>, transform_indices = @transform_1, window_bounds = array<i64: 800, 128>}, {pipeline_mode = #tpu.pipeline_mode<synchronous>, transform_indices = @transform_2, window_bounds = array<i64: 1, 128>}, {transform_indices = @transform_3, window_bounds = array<i64: 128, 128>}]} {
    %c0 = arith.constant 0 : index
    %c0_0 = arith.constant 0 : index
    %0 = vector.load %arg1[%c0, %c0_0] : memref<128x800xbf16, #tpu.memory_space<vmem>>, vector<128x800xbf16>
    %c0_1 = arith.constant 0 : index
    %c0_2 = arith.constant 0 : index
    %1 = vector.load %arg2[%c0_1, %c0_2] : memref<800x128xbf16, #tpu.memory_space<vmem>>, vector<800x128xbf16>
    %cst = arith.constant dense<0.000000e+00> : vector<128x128xf32>
    %2 = tpu.matmul %0, %1, %cst {dimension_numbers = #tpu.dot_dimension_numbers<[1], [0], [0], [1], [0, 0, 1, 1], [], []>} : vector<128x800xbf16>, vector<800x128xbf16>, vector<128x128xf32> -> vector<128x128xf32>
    %c0_3 = arith.constant 0 : index
    %c0_4 = arith.constant 0 : index
    %3 = vector.load %arg3[%c0_3, %c0_4] : memref<1x128xf32, #tpu.memory_space<vmem>>, vector<1x128xf32>
    %4 = vector.broadcast %3 : vector<1x128xf32> to vector<128x128xf32>
    %5 = arith.addf %2, %4 : vector<128x128xf32>
    %c0_5 = arith.constant 0 : index
    %c0_6 = arith.constant 0 : index
    %6 = vector.load %arg4[%c0_5, %c0_6] : memref<128x128xf32, #tpu.memory_space<vmem>>, vector<128x128xf32>
    tpu.vector_store %arg4[%c0_5, %c0_6], %5 {strides = array<i32>} : memref<128x128xf32, #tpu.memory_space<vmem>>, vector<128x128xf32>,
    return
  }
  func.func @transform_0(%arg0: i32) -> (i32, i32) {
    %c0_i32 = arith.constant 0 : i32
    %c0_i32_0 = arith.constant 0 : i32
    return %arg0, %c0_i32 : i32, i32
  }
  func.func @transform_1(%arg0: i32) -> (i32, i32) {
    %c0_i32 = arith.constant 0 : i32
    %c0_i32_0 = arith.constant 0 : i32
    %c0_i32_1 = arith.constant 0 : i32
    return %c0_i32, %c0_i32_0 : i32, i32
  }
  func.func @transform_2(%arg0: i32) -> (i32, i32) {
    %c0_i32 = arith.constant 0 : i32
    %c0_i32_0 = arith.constant 0 : i32
    %c0_i32_1 = arith.constant 0 : i32
    return %c0_i32, %c0_i32_0 : i32, i32
  }
  func.func @transform_3(%arg0: i32) -> (i32, i32) {
    %c0_i32 = arith.constant 0 : i32
    %c0_i32_0 = arith.constant 0 : i32
    return %arg0, %c0_i32 : i32, i32
  }
}

module attributes {stable_mosaic.version = 11 : i64} {
  func.func @_lstm_rec_kernel(%arg0: i32, %arg1: memref<2x1xi32, #tpu.memory_space<vmem>>, %arg2: memref<8x2x64xf32, #tpu.memory_space<vmem>>, %arg3: memref<16x64xbf16, #tpu.memory_space<vmem>>, %arg4: memref<8x2x16xf32, #tpu.memory_space<vmem>>, %arg5: memref<2x16xf32, #tpu.memory_space<vmem>>, %arg6: memref<2x16xf32, #tpu.memory_space<vmem>>) attributes {dimension_semantics = [#tpu.dimension_semantics<arbitrary>], iteration_bounds = array<i64: 1>, scalar_prefetch = 0 : i64, scratch_operands = 2 : i64, tpu.core_type = #tpu.core_type<tc>, window_params = [{pipeline_mode = #tpu.pipeline_mode<synchronous>, transform_indices = @transform_0, window_bounds = array<i64: 2, 1>}, {transform_indices = @transform_1, window_bounds = array<i64: 8, 2, 64>}, {pipeline_mode = #tpu.pipeline_mode<synchronous>, transform_indices = @transform_2, window_bounds = array<i64: 16, 64>}, {transform_indices = @transform_3, window_bounds = array<i64: 8, 2, 16>}]} {
    %c0_i32 = arith.constant 0 : i32
    %0 = arith.cmpi eq, %arg0, %c0_i32 : i32
    %1 = arith.extui %0 : i1 to i32
    %c0_i32_0 = arith.constant 0 : i32
    %2 = arith.cmpi ne, %1, %c0_i32_0 : i32
    scf.if %2 {
      %cst_92 = arith.constant 0.000000e+00 : f32
      %401 = vector.broadcast %cst_92 : f32 to vector<2x16xf32>
      %c0_93 = arith.constant 0 : index
      %c0_94 = arith.constant 0 : index
      %402 = vector.load %arg5[%c0_93, %c0_94] : memref<2x16xf32, #tpu.memory_space<vmem>>, vector<2x16xf32>
      tpu.vector_store %arg5[%c0_93, %c0_94], %401 {strides = array<i32>} : memref<2x16xf32, #tpu.memory_space<vmem>>, vector<2x16xf32>,
      %cst_95 = arith.constant 0.000000e+00 : f32
      %403 = vector.broadcast %cst_95 : f32 to vector<2x16xf32>
      %c0_96 = arith.constant 0 : index
      %c0_97 = arith.constant 0 : index
      %404 = vector.load %arg6[%c0_96, %c0_97] : memref<2x16xf32, #tpu.memory_space<vmem>>, vector<2x16xf32>
      tpu.vector_store %arg6[%c0_96, %c0_97], %403 {strides = array<i32>} : memref<2x16xf32, #tpu.memory_space<vmem>>, vector<2x16xf32>,
    } else {
    }
    %c0 = arith.constant 0 : index
    %c0_1 = arith.constant 0 : index
    %3 = vector.load %arg1[%c0, %c0_1] : memref<2x1xi32, #tpu.memory_space<vmem>>, vector<2x1xi32>
    %c0_2 = arith.constant 0 : index
    %c0_3 = arith.constant 0 : index
    %4 = vector.load %arg3[%c0_2, %c0_3] : memref<16x64xbf16, #tpu.memory_space<vmem>>, vector<16x64xbf16>
    %c0_4 = arith.constant 0 : index
    %c0_5 = arith.constant 0 : index
    %5 = vector.load %arg5[%c0_4, %c0_5] : memref<2x16xf32, #tpu.memory_space<vmem>>, vector<2x16xf32>
    %c0_6 = arith.constant 0 : index
    %c0_7 = arith.constant 0 : index
    %6 = vector.load %arg6[%c0_6, %c0_7] : memref<2x16xf32, #tpu.memory_space<vmem>>, vector<2x16xf32>
    %c0_i32_8 = arith.constant 0 : i32
    %c8_i32 = arith.constant 8 : i32
    %7 = arith.muli %arg0, %c8_i32 : i32
    %8 = arith.addi %7, %c0_i32_8 : i32
    %9 = arith.index_cast %c0_i32_8 : i32 to index
    %c0_9 = arith.constant 0 : index
    %c0_10 = arith.constant 0 : index
    %10 = vector.load %arg2[%9, %c0_9, %c0_10] : memref<8x2x64xf32, #tpu.memory_space<vmem>>, vector<1x2x64xf32>
    %11 = vector.shape_cast %10 : vector<1x2x64xf32> to vector<2x64xf32>
    %12 = arith.truncf %5 : vector<2x16xf32> to vector<2x16xbf16>
    %cst = arith.constant dense<0.000000e+00> : vector<2x64xf32>
    %13 = tpu.matmul %12, %4, %cst {dimension_numbers = #tpu.dot_dimension_numbers<[1], [0], [0], [1], [0, 0, 1, 1], [], []>} : vector<2x16xbf16>, vector<16x64xbf16>, vector<2x64xf32> -> vector<2x64xf32>
    %14 = arith.addf %11, %13 : vector<2x64xf32>
    %15 = vector.extract_strided_slice %14 {offsets = [0, 0], sizes = [2, 16], strides = [1, 1]} : vector<2x64xf32> to vector<2x16xf32>
    %16 = arith.negf %15 : vector<2x16xf32>
    %17 = math.exp %16 : vector<2x16xf32>
    %cst_11 = arith.constant 1.000000e+00 : f32
    %18 = vector.broadcast %cst_11 : f32 to vector<2x16xf32>
    %19 = arith.addf %18, %17 : vector<2x16xf32>
    %20 = arith.divf %18, %19 : vector<2x16xf32>
    %21 = vector.extract_strided_slice %14 {offsets = [0, 16], sizes = [2, 16], strides = [1, 1]} : vector<2x64xf32> to vector<2x16xf32>
    %22 = arith.negf %21 : vector<2x16xf32>
    %23 = math.exp %22 : vector<2x16xf32>
    %cst_12 = arith.constant 1.000000e+00 : f32
    %24 = vector.broadcast %cst_12 : f32 to vector<2x16xf32>
    %25 = arith.addf %24, %23 : vector<2x16xf32>
    %26 = arith.divf %24, %25 : vector<2x16xf32>
    %27 = vector.extract_strided_slice %14 {offsets = [0, 32], sizes = [2, 16], strides = [1, 1]} : vector<2x64xf32> to vector<2x16xf32>
    %28 = math.tanh %27 : vector<2x16xf32>
    %29 = vector.extract_strided_slice %14 {offsets = [0, 48], sizes = [2, 16], strides = [1, 1]} : vector<2x64xf32> to vector<2x16xf32>
    %30 = arith.negf %29 : vector<2x16xf32>
    %31 = math.exp %30 : vector<2x16xf32>
    %cst_13 = arith.constant 1.000000e+00 : f32
    %32 = vector.broadcast %cst_13 : f32 to vector<2x16xf32>
    %33 = arith.addf %32, %31 : vector<2x16xf32>
    %34 = arith.divf %32, %33 : vector<2x16xf32>
    %35 = arith.mulf %26, %6 : vector<2x16xf32>
    %36 = arith.mulf %20, %28 : vector<2x16xf32>
    %37 = arith.addf %35, %36 : vector<2x16xf32>
    %38 = math.tanh %37 : vector<2x16xf32>
    %39 = arith.mulf %34, %38 : vector<2x16xf32>
    %40 = vector.broadcast %8 : i32 to vector<2x1xi32>
    %41 = arith.cmpi slt, %40, %3 : vector<2x1xi32>
    %42 = vector.shape_cast %41 : vector<2x1xi1> to vector<2x1xi1>
    %43 = vector.broadcast %42 : vector<2x1xi1> to vector<2x16xi1>
    %44 = arith.select %43, %39, %5 : vector<2x16xi1>, vector<2x16xf32>
    %45 = vector.shape_cast %41 : vector<2x1xi1> to vector<2x1xi1>
    %46 = vector.broadcast %45 : vector<2x1xi1> to vector<2x16xi1>
    %47 = arith.select %46, %37, %6 : vector<2x16xi1>, vector<2x16xf32>
    %cst_14 = arith.constant 0.000000e+00 : f32
    %48 = vector.broadcast %cst_14 : f32 to vector<2x16xf32>
    %49 = vector.shape_cast %41 : vector<2x1xi1> to vector<2x1xi1>
    %50 = vector.broadcast %49 : vector<2x1xi1> to vector<2x16xi1>
    %51 = arith.select %50, %39, %48 : vector<2x16xi1>, vector<2x16xf32>
    %52 = arith.index_cast %c0_i32_8 : i32 to index
    %c0_15 = arith.constant 0 : index
    %c0_16 = arith.constant 0 : index
    %53 = vector.load %arg4[%52, %c0_15, %c0_16] : memref<8x2x16xf32, #tpu.memory_space<vmem>>, vector<1x2x16xf32>
    %54 = vector.shape_cast %53 : vector<1x2x16xf32> to vector<2x16xf32>
    %55 = vector.shape_cast %51 : vector<2x16xf32> to vector<1x2x16xf32>
    tpu.vector_store %arg4[%52, %c0_15, %c0_16], %55 {strides = array<i32>} : memref<8x2x16xf32, #tpu.memory_space<vmem>>, vector<1x2x16xf32>,
    %c1_i32 = arith.constant 1 : i32
    %c8_i32_17 = arith.constant 8 : i32
    %56 = arith.muli %arg0, %c8_i32_17 : i32
    %57 = arith.addi %56, %c1_i32 : i32
    %58 = arith.index_cast %c1_i32 : i32 to index
    %c0_18 = arith.constant 0 : index
    %c0_19 = arith.constant 0 : index
    %59 = vector.load %arg2[%58, %c0_18, %c0_19] : memref<8x2x64xf32, #tpu.memory_space<vmem>>, vector<1x2x64xf32>
    %60 = vector.shape_cast %59 : vector<1x2x64xf32> to vector<2x64xf32>
    %61 = arith.truncf %44 : vector<2x16xf32> to vector<2x16xbf16>
    %cst_20 = arith.constant dense<0.000000e+00> : vector<2x64xf32>
    %62 = tpu.matmul %61, %4, %cst_20 {dimension_numbers = #tpu.dot_dimension_numbers<[1], [0], [0], [1], [0, 0, 1, 1], [], []>} : vector<2x16xbf16>, vector<16x64xbf16>, vector<2x64xf32> -> vector<2x64xf32>
    %63 = arith.addf %60, %62 : vector<2x64xf32>
    %64 = vector.extract_strided_slice %63 {offsets = [0, 0], sizes = [2, 16], strides = [1, 1]} : vector<2x64xf32> to vector<2x16xf32>
    %65 = arith.negf %64 : vector<2x16xf32>
    %66 = math.exp %65 : vector<2x16xf32>
    %cst_21 = arith.constant 1.000000e+00 : f32
    %67 = vector.broadcast %cst_21 : f32 to vector<2x16xf32>
    %68 = arith.addf %67, %66 : vector<2x16xf32>
    %69 = arith.divf %67, %68 : vector<2x16xf32>
    %70 = vector.extract_strided_slice %63 {offsets = [0, 16], sizes = [2, 16], strides = [1, 1]} : vector<2x64xf32> to vector<2x16xf32>
    %71 = arith.negf %70 : vector<2x16xf32>
    %72 = math.exp %71 : vector<2x16xf32>
    %cst_22 = arith.constant 1.000000e+00 : f32
    %73 = vector.broadcast %cst_22 : f32 to vector<2x16xf32>
    %74 = arith.addf %73, %72 : vector<2x16xf32>
    %75 = arith.divf %73, %74 : vector<2x16xf32>
    %76 = vector.extract_strided_slice %63 {offsets = [0, 32], sizes = [2, 16], strides = [1, 1]} : vector<2x64xf32> to vector<2x16xf32>
    %77 = math.tanh %76 : vector<2x16xf32>
    %78 = vector.extract_strided_slice %63 {offsets = [0, 48], sizes = [2, 16], strides = [1, 1]} : vector<2x64xf32> to vector<2x16xf32>
    %79 = arith.negf %78 : vector<2x16xf32>
    %80 = math.exp %79 : vector<2x16xf32>
    %cst_23 = arith.constant 1.000000e+00 : f32
    %81 = vector.broadcast %cst_23 : f32 to vector<2x16xf32>
    %82 = arith.addf %81, %80 : vector<2x16xf32>
    %83 = arith.divf %81, %82 : vector<2x16xf32>
    %84 = arith.mulf %75, %47 : vector<2x16xf32>
    %85 = arith.mulf %69, %77 : vector<2x16xf32>
    %86 = arith.addf %84, %85 : vector<2x16xf32>
    %87 = math.tanh %86 : vector<2x16xf32>
    %88 = arith.mulf %83, %87 : vector<2x16xf32>
    %89 = vector.broadcast %57 : i32 to vector<2x1xi32>
    %90 = arith.cmpi slt, %89, %3 : vector<2x1xi32>
    %91 = vector.shape_cast %90 : vector<2x1xi1> to vector<2x1xi1>
    %92 = vector.broadcast %91 : vector<2x1xi1> to vector<2x16xi1>
    %93 = arith.select %92, %88, %44 : vector<2x16xi1>, vector<2x16xf32>
    %94 = vector.shape_cast %90 : vector<2x1xi1> to vector<2x1xi1>
    %95 = vector.broadcast %94 : vector<2x1xi1> to vector<2x16xi1>
    %96 = arith.select %95, %86, %47 : vector<2x16xi1>, vector<2x16xf32>
    %cst_24 = arith.constant 0.000000e+00 : f32
    %97 = vector.broadcast %cst_24 : f32 to vector<2x16xf32>
    %98 = vector.shape_cast %90 : vector<2x1xi1> to vector<2x1xi1>
    %99 = vector.broadcast %98 : vector<2x1xi1> to vector<2x16xi1>
    %100 = arith.select %99, %88, %97 : vector<2x16xi1>, vector<2x16xf32>
    %101 = arith.index_cast %c1_i32 : i32 to index
    %c0_25 = arith.constant 0 : index
    %c0_26 = arith.constant 0 : index
    %102 = vector.load %arg4[%101, %c0_25, %c0_26] : memref<8x2x16xf32, #tpu.memory_space<vmem>>, vector<1x2x16xf32>
    %103 = vector.shape_cast %102 : vector<1x2x16xf32> to vector<2x16xf32>
    %104 = vector.shape_cast %100 : vector<2x16xf32> to vector<1x2x16xf32>
    tpu.vector_store %arg4[%101, %c0_25, %c0_26], %104 {strides = array<i32>} : memref<8x2x16xf32, #tpu.memory_space<vmem>>, vector<1x2x16xf32>,
    %c2_i32 = arith.constant 2 : i32
    %c8_i32_27 = arith.constant 8 : i32
    %105 = arith.muli %arg0, %c8_i32_27 : i32
    %106 = arith.addi %105, %c2_i32 : i32
    %107 = arith.index_cast %c2_i32 : i32 to index
    %c0_28 = arith.constant 0 : index
    %c0_29 = arith.constant 0 : index
    %108 = vector.load %arg2[%107, %c0_28, %c0_29] : memref<8x2x64xf32, #tpu.memory_space<vmem>>, vector<1x2x64xf32>
    %109 = vector.shape_cast %108 : vector<1x2x64xf32> to vector<2x64xf32>
    %110 = arith.truncf %93 : vector<2x16xf32> to vector<2x16xbf16>
    %cst_30 = arith.constant dense<0.000000e+00> : vector<2x64xf32>
    %111 = tpu.matmul %110, %4, %cst_30 {dimension_numbers = #tpu.dot_dimension_numbers<[1], [0], [0], [1], [0, 0, 1, 1], [], []>} : vector<2x16xbf16>, vector<16x64xbf16>, vector<2x64xf32> -> vector<2x64xf32>
    %112 = arith.addf %109, %111 : vector<2x64xf32>
    %113 = vector.extract_strided_slice %112 {offsets = [0, 0], sizes = [2, 16], strides = [1, 1]} : vector<2x64xf32> to vector<2x16xf32>
    %114 = arith.negf %113 : vector<2x16xf32>
    %115 = math.exp %114 : vector<2x16xf32>
    %cst_31 = arith.constant 1.000000e+00 : f32
    %116 = vector.broadcast %cst_31 : f32 to vector<2x16xf32>
    %117 = arith.addf %116, %115 : vector<2x16xf32>
    %118 = arith.divf %116, %117 : vector<2x16xf32>
    %119 = vector.extract_strided_slice %112 {offsets = [0, 16], sizes = [2, 16], strides = [1, 1]} : vector<2x64xf32> to vector<2x16xf32>
    %120 = arith.negf %119 : vector<2x16xf32>
    %121 = math.exp %120 : vector<2x16xf32>
    %cst_32 = arith.constant 1.000000e+00 : f32
    %122 = vector.broadcast %cst_32 : f32 to vector<2x16xf32>
    %123 = arith.addf %122, %121 : vector<2x16xf32>
    %124 = arith.divf %122, %123 : vector<2x16xf32>
    %125 = vector.extract_strided_slice %112 {offsets = [0, 32], sizes = [2, 16], strides = [1, 1]} : vector<2x64xf32> to vector<2x16xf32>
    %126 = math.tanh %125 : vector<2x16xf32>
    %127 = vector.extract_strided_slice %112 {offsets = [0, 48], sizes = [2, 16], strides = [1, 1]} : vector<2x64xf32> to vector<2x16xf32>
    %128 = arith.negf %127 : vector<2x16xf32>
    %129 = math.exp %128 : vector<2x16xf32>
    %cst_33 = arith.constant 1.000000e+00 : f32
    %130 = vector.broadcast %cst_33 : f32 to vector<2x16xf32>
    %131 = arith.addf %130, %129 : vector<2x16xf32>
    %132 = arith.divf %130, %131 : vector<2x16xf32>
    %133 = arith.mulf %124, %96 : vector<2x16xf32>
    %134 = arith.mulf %118, %126 : vector<2x16xf32>
    %135 = arith.addf %133, %134 : vector<2x16xf32>
    %136 = math.tanh %135 : vector<2x16xf32>
    %137 = arith.mulf %132, %136 : vector<2x16xf32>
    %138 = vector.broadcast %106 : i32 to vector<2x1xi32>
    %139 = arith.cmpi slt, %138, %3 : vector<2x1xi32>
    %140 = vector.shape_cast %139 : vector<2x1xi1> to vector<2x1xi1>
    %141 = vector.broadcast %140 : vector<2x1xi1> to vector<2x16xi1>
    %142 = arith.select %141, %137, %93 : vector<2x16xi1>, vector<2x16xf32>
    %143 = vector.shape_cast %139 : vector<2x1xi1> to vector<2x1xi1>
    %144 = vector.broadcast %143 : vector<2x1xi1> to vector<2x16xi1>
    %145 = arith.select %144, %135, %96 : vector<2x16xi1>, vector<2x16xf32>
    %cst_34 = arith.constant 0.000000e+00 : f32
    %146 = vector.broadcast %cst_34 : f32 to vector<2x16xf32>
    %147 = vector.shape_cast %139 : vector<2x1xi1> to vector<2x1xi1>
    %148 = vector.broadcast %147 : vector<2x1xi1> to vector<2x16xi1>
    %149 = arith.select %148, %137, %146 : vector<2x16xi1>, vector<2x16xf32>
    %150 = arith.index_cast %c2_i32 : i32 to index
    %c0_35 = arith.constant 0 : index
    %c0_36 = arith.constant 0 : index
    %151 = vector.load %arg4[%150, %c0_35, %c0_36] : memref<8x2x16xf32, #tpu.memory_space<vmem>>, vector<1x2x16xf32>
    %152 = vector.shape_cast %151 : vector<1x2x16xf32> to vector<2x16xf32>
    %153 = vector.shape_cast %149 : vector<2x16xf32> to vector<1x2x16xf32>
    tpu.vector_store %arg4[%150, %c0_35, %c0_36], %153 {strides = array<i32>} : memref<8x2x16xf32, #tpu.memory_space<vmem>>, vector<1x2x16xf32>,
    %c3_i32 = arith.constant 3 : i32
    %c8_i32_37 = arith.constant 8 : i32
    %154 = arith.muli %arg0, %c8_i32_37 : i32
    %155 = arith.addi %154, %c3_i32 : i32
    %156 = arith.index_cast %c3_i32 : i32 to index
    %c0_38 = arith.constant 0 : index
    %c0_39 = arith.constant 0 : index
    %157 = vector.load %arg2[%156, %c0_38, %c0_39] : memref<8x2x64xf32, #tpu.memory_space<vmem>>, vector<1x2x64xf32>
    %158 = vector.shape_cast %157 : vector<1x2x64xf32> to vector<2x64xf32>
    %159 = arith.truncf %142 : vector<2x16xf32> to vector<2x16xbf16>
    %cst_40 = arith.constant dense<0.000000e+00> : vector<2x64xf32>
    %160 = tpu.matmul %159, %4, %cst_40 {dimension_numbers = #tpu.dot_dimension_numbers<[1], [0], [0], [1], [0, 0, 1, 1], [], []>} : vector<2x16xbf16>, vector<16x64xbf16>, vector<2x64xf32> -> vector<2x64xf32>
    %161 = arith.addf %158, %160 : vector<2x64xf32>
    %162 = vector.extract_strided_slice %161 {offsets = [0, 0], sizes = [2, 16], strides = [1, 1]} : vector<2x64xf32> to vector<2x16xf32>
    %163 = arith.negf %162 : vector<2x16xf32>
    %164 = math.exp %163 : vector<2x16xf32>
    %cst_41 = arith.constant 1.000000e+00 : f32
    %165 = vector.broadcast %cst_41 : f32 to vector<2x16xf32>
    %166 = arith.addf %165, %164 : vector<2x16xf32>
    %167 = arith.divf %165, %166 : vector<2x16xf32>
    %168 = vector.extract_strided_slice %161 {offsets = [0, 16], sizes = [2, 16], strides = [1, 1]} : vector<2x64xf32> to vector<2x16xf32>
    %169 = arith.negf %168 : vector<2x16xf32>
    %170 = math.exp %169 : vector<2x16xf32>
    %cst_42 = arith.constant 1.000000e+00 : f32
    %171 = vector.broadcast %cst_42 : f32 to vector<2x16xf32>
    %172 = arith.addf %171, %170 : vector<2x16xf32>
    %173 = arith.divf %171, %172 : vector<2x16xf32>
    %174 = vector.extract_strided_slice %161 {offsets = [0, 32], sizes = [2, 16], strides = [1, 1]} : vector<2x64xf32> to vector<2x16xf32>
    %175 = math.tanh %174 : vector<2x16xf32>
    %176 = vector.extract_strided_slice %161 {offsets = [0, 48], sizes = [2, 16], strides = [1, 1]} : vector<2x64xf32> to vector<2x16xf32>
    %177 = arith.negf %176 : vector<2x16xf32>
    %178 = math.exp %177 : vector<2x16xf32>
    %cst_43 = arith.constant 1.000000e+00 : f32
    %179 = vector.broadcast %cst_43 : f32 to vector<2x16xf32>
    %180 = arith.addf %179, %178 : vector<2x16xf32>
    %181 = arith.divf %179, %180 : vector<2x16xf32>
    %182 = arith.mulf %173, %145 : vector<2x16xf32>
    %183 = arith.mulf %167, %175 : vector<2x16xf32>
    %184 = arith.addf %182, %183 : vector<2x16xf32>
    %185 = math.tanh %184 : vector<2x16xf32>
    %186 = arith.mulf %181, %185 : vector<2x16xf32>
    %187 = vector.broadcast %155 : i32 to vector<2x1xi32>
    %188 = arith.cmpi slt, %187, %3 : vector<2x1xi32>
    %189 = vector.shape_cast %188 : vector<2x1xi1> to vector<2x1xi1>
    %190 = vector.broadcast %189 : vector<2x1xi1> to vector<2x16xi1>
    %191 = arith.select %190, %186, %142 : vector<2x16xi1>, vector<2x16xf32>
    %192 = vector.shape_cast %188 : vector<2x1xi1> to vector<2x1xi1>
    %193 = vector.broadcast %192 : vector<2x1xi1> to vector<2x16xi1>
    %194 = arith.select %193, %184, %145 : vector<2x16xi1>, vector<2x16xf32>
    %cst_44 = arith.constant 0.000000e+00 : f32
    %195 = vector.broadcast %cst_44 : f32 to vector<2x16xf32>
    %196 = vector.shape_cast %188 : vector<2x1xi1> to vector<2x1xi1>
    %197 = vector.broadcast %196 : vector<2x1xi1> to vector<2x16xi1>
    %198 = arith.select %197, %186, %195 : vector<2x16xi1>, vector<2x16xf32>
    %199 = arith.index_cast %c3_i32 : i32 to index
    %c0_45 = arith.constant 0 : index
    %c0_46 = arith.constant 0 : index
    %200 = vector.load %arg4[%199, %c0_45, %c0_46] : memref<8x2x16xf32, #tpu.memory_space<vmem>>, vector<1x2x16xf32>
    %201 = vector.shape_cast %200 : vector<1x2x16xf32> to vector<2x16xf32>
    %202 = vector.shape_cast %198 : vector<2x16xf32> to vector<1x2x16xf32>
    tpu.vector_store %arg4[%199, %c0_45, %c0_46], %202 {strides = array<i32>} : memref<8x2x16xf32, #tpu.memory_space<vmem>>, vector<1x2x16xf32>,
    %c4_i32 = arith.constant 4 : i32
    %c8_i32_47 = arith.constant 8 : i32
    %203 = arith.muli %arg0, %c8_i32_47 : i32
    %204 = arith.addi %203, %c4_i32 : i32
    %205 = arith.index_cast %c4_i32 : i32 to index
    %c0_48 = arith.constant 0 : index
    %c0_49 = arith.constant 0 : index
    %206 = vector.load %arg2[%205, %c0_48, %c0_49] : memref<8x2x64xf32, #tpu.memory_space<vmem>>, vector<1x2x64xf32>
    %207 = vector.shape_cast %206 : vector<1x2x64xf32> to vector<2x64xf32>
    %208 = arith.truncf %191 : vector<2x16xf32> to vector<2x16xbf16>
    %cst_50 = arith.constant dense<0.000000e+00> : vector<2x64xf32>
    %209 = tpu.matmul %208, %4, %cst_50 {dimension_numbers = #tpu.dot_dimension_numbers<[1], [0], [0], [1], [0, 0, 1, 1], [], []>} : vector<2x16xbf16>, vector<16x64xbf16>, vector<2x64xf32> -> vector<2x64xf32>
    %210 = arith.addf %207, %209 : vector<2x64xf32>
    %211 = vector.extract_strided_slice %210 {offsets = [0, 0], sizes = [2, 16], strides = [1, 1]} : vector<2x64xf32> to vector<2x16xf32>
    %212 = arith.negf %211 : vector<2x16xf32>
    %213 = math.exp %212 : vector<2x16xf32>
    %cst_51 = arith.constant 1.000000e+00 : f32
    %214 = vector.broadcast %cst_51 : f32 to vector<2x16xf32>
    %215 = arith.addf %214, %213 : vector<2x16xf32>
    %216 = arith.divf %214, %215 : vector<2x16xf32>
    %217 = vector.extract_strided_slice %210 {offsets = [0, 16], sizes = [2, 16], strides = [1, 1]} : vector<2x64xf32> to vector<2x16xf32>
    %218 = arith.negf %217 : vector<2x16xf32>
    %219 = math.exp %218 : vector<2x16xf32>
    %cst_52 = arith.constant 1.000000e+00 : f32
    %220 = vector.broadcast %cst_52 : f32 to vector<2x16xf32>
    %221 = arith.addf %220, %219 : vector<2x16xf32>
    %222 = arith.divf %220, %221 : vector<2x16xf32>
    %223 = vector.extract_strided_slice %210 {offsets = [0, 32], sizes = [2, 16], strides = [1, 1]} : vector<2x64xf32> to vector<2x16xf32>
    %224 = math.tanh %223 : vector<2x16xf32>
    %225 = vector.extract_strided_slice %210 {offsets = [0, 48], sizes = [2, 16], strides = [1, 1]} : vector<2x64xf32> to vector<2x16xf32>
    %226 = arith.negf %225 : vector<2x16xf32>
    %227 = math.exp %226 : vector<2x16xf32>
    %cst_53 = arith.constant 1.000000e+00 : f32
    %228 = vector.broadcast %cst_53 : f32 to vector<2x16xf32>
    %229 = arith.addf %228, %227 : vector<2x16xf32>
    %230 = arith.divf %228, %229 : vector<2x16xf32>
    %231 = arith.mulf %222, %194 : vector<2x16xf32>
    %232 = arith.mulf %216, %224 : vector<2x16xf32>
    %233 = arith.addf %231, %232 : vector<2x16xf32>
    %234 = math.tanh %233 : vector<2x16xf32>
    %235 = arith.mulf %230, %234 : vector<2x16xf32>
    %236 = vector.broadcast %204 : i32 to vector<2x1xi32>
    %237 = arith.cmpi slt, %236, %3 : vector<2x1xi32>
    %238 = vector.shape_cast %237 : vector<2x1xi1> to vector<2x1xi1>
    %239 = vector.broadcast %238 : vector<2x1xi1> to vector<2x16xi1>
    %240 = arith.select %239, %235, %191 : vector<2x16xi1>, vector<2x16xf32>
    %241 = vector.shape_cast %237 : vector<2x1xi1> to vector<2x1xi1>
    %242 = vector.broadcast %241 : vector<2x1xi1> to vector<2x16xi1>
    %243 = arith.select %242, %233, %194 : vector<2x16xi1>, vector<2x16xf32>
    %cst_54 = arith.constant 0.000000e+00 : f32
    %244 = vector.broadcast %cst_54 : f32 to vector<2x16xf32>
    %245 = vector.shape_cast %237 : vector<2x1xi1> to vector<2x1xi1>
    %246 = vector.broadcast %245 : vector<2x1xi1> to vector<2x16xi1>
    %247 = arith.select %246, %235, %244 : vector<2x16xi1>, vector<2x16xf32>
    %248 = arith.index_cast %c4_i32 : i32 to index
    %c0_55 = arith.constant 0 : index
    %c0_56 = arith.constant 0 : index
    %249 = vector.load %arg4[%248, %c0_55, %c0_56] : memref<8x2x16xf32, #tpu.memory_space<vmem>>, vector<1x2x16xf32>
    %250 = vector.shape_cast %249 : vector<1x2x16xf32> to vector<2x16xf32>
    %251 = vector.shape_cast %247 : vector<2x16xf32> to vector<1x2x16xf32>
    tpu.vector_store %arg4[%248, %c0_55, %c0_56], %251 {strides = array<i32>} : memref<8x2x16xf32, #tpu.memory_space<vmem>>, vector<1x2x16xf32>,
    %c5_i32 = arith.constant 5 : i32
    %c8_i32_57 = arith.constant 8 : i32
    %252 = arith.muli %arg0, %c8_i32_57 : i32
    %253 = arith.addi %252, %c5_i32 : i32
    %254 = arith.index_cast %c5_i32 : i32 to index
    %c0_58 = arith.constant 0 : index
    %c0_59 = arith.constant 0 : index
    %255 = vector.load %arg2[%254, %c0_58, %c0_59] : memref<8x2x64xf32, #tpu.memory_space<vmem>>, vector<1x2x64xf32>
    %256 = vector.shape_cast %255 : vector<1x2x64xf32> to vector<2x64xf32>
    %257 = arith.truncf %240 : vector<2x16xf32> to vector<2x16xbf16>
    %cst_60 = arith.constant dense<0.000000e+00> : vector<2x64xf32>
    %258 = tpu.matmul %257, %4, %cst_60 {dimension_numbers = #tpu.dot_dimension_numbers<[1], [0], [0], [1], [0, 0, 1, 1], [], []>} : vector<2x16xbf16>, vector<16x64xbf16>, vector<2x64xf32> -> vector<2x64xf32>
    %259 = arith.addf %256, %258 : vector<2x64xf32>
    %260 = vector.extract_strided_slice %259 {offsets = [0, 0], sizes = [2, 16], strides = [1, 1]} : vector<2x64xf32> to vector<2x16xf32>
    %261 = arith.negf %260 : vector<2x16xf32>
    %262 = math.exp %261 : vector<2x16xf32>
    %cst_61 = arith.constant 1.000000e+00 : f32
    %263 = vector.broadcast %cst_61 : f32 to vector<2x16xf32>
    %264 = arith.addf %263, %262 : vector<2x16xf32>
    %265 = arith.divf %263, %264 : vector<2x16xf32>
    %266 = vector.extract_strided_slice %259 {offsets = [0, 16], sizes = [2, 16], strides = [1, 1]} : vector<2x64xf32> to vector<2x16xf32>
    %267 = arith.negf %266 : vector<2x16xf32>
    %268 = math.exp %267 : vector<2x16xf32>
    %cst_62 = arith.constant 1.000000e+00 : f32
    %269 = vector.broadcast %cst_62 : f32 to vector<2x16xf32>
    %270 = arith.addf %269, %268 : vector<2x16xf32>
    %271 = arith.divf %269, %270 : vector<2x16xf32>
    %272 = vector.extract_strided_slice %259 {offsets = [0, 32], sizes = [2, 16], strides = [1, 1]} : vector<2x64xf32> to vector<2x16xf32>
    %273 = math.tanh %272 : vector<2x16xf32>
    %274 = vector.extract_strided_slice %259 {offsets = [0, 48], sizes = [2, 16], strides = [1, 1]} : vector<2x64xf32> to vector<2x16xf32>
    %275 = arith.negf %274 : vector<2x16xf32>
    %276 = math.exp %275 : vector<2x16xf32>
    %cst_63 = arith.constant 1.000000e+00 : f32
    %277 = vector.broadcast %cst_63 : f32 to vector<2x16xf32>
    %278 = arith.addf %277, %276 : vector<2x16xf32>
    %279 = arith.divf %277, %278 : vector<2x16xf32>
    %280 = arith.mulf %271, %243 : vector<2x16xf32>
    %281 = arith.mulf %265, %273 : vector<2x16xf32>
    %282 = arith.addf %280, %281 : vector<2x16xf32>
    %283 = math.tanh %282 : vector<2x16xf32>
    %284 = arith.mulf %279, %283 : vector<2x16xf32>
    %285 = vector.broadcast %253 : i32 to vector<2x1xi32>
    %286 = arith.cmpi slt, %285, %3 : vector<2x1xi32>
    %287 = vector.shape_cast %286 : vector<2x1xi1> to vector<2x1xi1>
    %288 = vector.broadcast %287 : vector<2x1xi1> to vector<2x16xi1>
    %289 = arith.select %288, %284, %240 : vector<2x16xi1>, vector<2x16xf32>
    %290 = vector.shape_cast %286 : vector<2x1xi1> to vector<2x1xi1>
    %291 = vector.broadcast %290 : vector<2x1xi1> to vector<2x16xi1>
    %292 = arith.select %291, %282, %243 : vector<2x16xi1>, vector<2x16xf32>
    %cst_64 = arith.constant 0.000000e+00 : f32
    %293 = vector.broadcast %cst_64 : f32 to vector<2x16xf32>
    %294 = vector.shape_cast %286 : vector<2x1xi1> to vector<2x1xi1>
    %295 = vector.broadcast %294 : vector<2x1xi1> to vector<2x16xi1>
    %296 = arith.select %295, %284, %293 : vector<2x16xi1>, vector<2x16xf32>
    %297 = arith.index_cast %c5_i32 : i32 to index
    %c0_65 = arith.constant 0 : index
    %c0_66 = arith.constant 0 : index
    %298 = vector.load %arg4[%297, %c0_65, %c0_66] : memref<8x2x16xf32, #tpu.memory_space<vmem>>, vector<1x2x16xf32>
    %299 = vector.shape_cast %298 : vector<1x2x16xf32> to vector<2x16xf32>
    %300 = vector.shape_cast %296 : vector<2x16xf32> to vector<1x2x16xf32>
    tpu.vector_store %arg4[%297, %c0_65, %c0_66], %300 {strides = array<i32>} : memref<8x2x16xf32, #tpu.memory_space<vmem>>, vector<1x2x16xf32>,
    %c6_i32 = arith.constant 6 : i32
    %c8_i32_67 = arith.constant 8 : i32
    %301 = arith.muli %arg0, %c8_i32_67 : i32
    %302 = arith.addi %301, %c6_i32 : i32
    %303 = arith.index_cast %c6_i32 : i32 to index
    %c0_68 = arith.constant 0 : index
    %c0_69 = arith.constant 0 : index
    %304 = vector.load %arg2[%303, %c0_68, %c0_69] : memref<8x2x64xf32, #tpu.memory_space<vmem>>, vector<1x2x64xf32>
    %305 = vector.shape_cast %304 : vector<1x2x64xf32> to vector<2x64xf32>
    %306 = arith.truncf %289 : vector<2x16xf32> to vector<2x16xbf16>
    %cst_70 = arith.constant dense<0.000000e+00> : vector<2x64xf32>
    %307 = tpu.matmul %306, %4, %cst_70 {dimension_numbers = #tpu.dot_dimension_numbers<[1], [0], [0], [1], [0, 0, 1, 1], [], []>} : vector<2x16xbf16>, vector<16x64xbf16>, vector<2x64xf32> -> vector<2x64xf32>
    %308 = arith.addf %305, %307 : vector<2x64xf32>
    %309 = vector.extract_strided_slice %308 {offsets = [0, 0], sizes = [2, 16], strides = [1, 1]} : vector<2x64xf32> to vector<2x16xf32>
    %310 = arith.negf %309 : vector<2x16xf32>
    %311 = math.exp %310 : vector<2x16xf32>
    %cst_71 = arith.constant 1.000000e+00 : f32
    %312 = vector.broadcast %cst_71 : f32 to vector<2x16xf32>
    %313 = arith.addf %312, %311 : vector<2x16xf32>
    %314 = arith.divf %312, %313 : vector<2x16xf32>
    %315 = vector.extract_strided_slice %308 {offsets = [0, 16], sizes = [2, 16], strides = [1, 1]} : vector<2x64xf32> to vector<2x16xf32>
    %316 = arith.negf %315 : vector<2x16xf32>
    %317 = math.exp %316 : vector<2x16xf32>
    %cst_72 = arith.constant 1.000000e+00 : f32
    %318 = vector.broadcast %cst_72 : f32 to vector<2x16xf32>
    %319 = arith.addf %318, %317 : vector<2x16xf32>
    %320 = arith.divf %318, %319 : vector<2x16xf32>
    %321 = vector.extract_strided_slice %308 {offsets = [0, 32], sizes = [2, 16], strides = [1, 1]} : vector<2x64xf32> to vector<2x16xf32>
    %322 = math.tanh %321 : vector<2x16xf32>
    %323 = vector.extract_strided_slice %308 {offsets = [0, 48], sizes = [2, 16], strides = [1, 1]} : vector<2x64xf32> to vector<2x16xf32>
    %324 = arith.negf %323 : vector<2x16xf32>
    %325 = math.exp %324 : vector<2x16xf32>
    %cst_73 = arith.constant 1.000000e+00 : f32
    %326 = vector.broadcast %cst_73 : f32 to vector<2x16xf32>
    %327 = arith.addf %326, %325 : vector<2x16xf32>
    %328 = arith.divf %326, %327 : vector<2x16xf32>
    %329 = arith.mulf %320, %292 : vector<2x16xf32>
    %330 = arith.mulf %314, %322 : vector<2x16xf32>
    %331 = arith.addf %329, %330 : vector<2x16xf32>
    %332 = math.tanh %331 : vector<2x16xf32>
    %333 = arith.mulf %328, %332 : vector<2x16xf32>
    %334 = vector.broadcast %302 : i32 to vector<2x1xi32>
    %335 = arith.cmpi slt, %334, %3 : vector<2x1xi32>
    %336 = vector.shape_cast %335 : vector<2x1xi1> to vector<2x1xi1>
    %337 = vector.broadcast %336 : vector<2x1xi1> to vector<2x16xi1>
    %338 = arith.select %337, %333, %289 : vector<2x16xi1>, vector<2x16xf32>
    %339 = vector.shape_cast %335 : vector<2x1xi1> to vector<2x1xi1>
    %340 = vector.broadcast %339 : vector<2x1xi1> to vector<2x16xi1>
    %341 = arith.select %340, %331, %292 : vector<2x16xi1>, vector<2x16xf32>
    %cst_74 = arith.constant 0.000000e+00 : f32
    %342 = vector.broadcast %cst_74 : f32 to vector<2x16xf32>
    %343 = vector.shape_cast %335 : vector<2x1xi1> to vector<2x1xi1>
    %344 = vector.broadcast %343 : vector<2x1xi1> to vector<2x16xi1>
    %345 = arith.select %344, %333, %342 : vector<2x16xi1>, vector<2x16xf32>
    %346 = arith.index_cast %c6_i32 : i32 to index
    %c0_75 = arith.constant 0 : index
    %c0_76 = arith.constant 0 : index
    %347 = vector.load %arg4[%346, %c0_75, %c0_76] : memref<8x2x16xf32, #tpu.memory_space<vmem>>, vector<1x2x16xf32>
    %348 = vector.shape_cast %347 : vector<1x2x16xf32> to vector<2x16xf32>
    %349 = vector.shape_cast %345 : vector<2x16xf32> to vector<1x2x16xf32>
    tpu.vector_store %arg4[%346, %c0_75, %c0_76], %349 {strides = array<i32>} : memref<8x2x16xf32, #tpu.memory_space<vmem>>, vector<1x2x16xf32>,
    %c7_i32 = arith.constant 7 : i32
    %c8_i32_77 = arith.constant 8 : i32
    %350 = arith.muli %arg0, %c8_i32_77 : i32
    %351 = arith.addi %350, %c7_i32 : i32
    %352 = arith.index_cast %c7_i32 : i32 to index
    %c0_78 = arith.constant 0 : index
    %c0_79 = arith.constant 0 : index
    %353 = vector.load %arg2[%352, %c0_78, %c0_79] : memref<8x2x64xf32, #tpu.memory_space<vmem>>, vector<1x2x64xf32>
    %354 = vector.shape_cast %353 : vector<1x2x64xf32> to vector<2x64xf32>
    %355 = arith.truncf %338 : vector<2x16xf32> to vector<2x16xbf16>
    %cst_80 = arith.constant dense<0.000000e+00> : vector<2x64xf32>
    %356 = tpu.matmul %355, %4, %cst_80 {dimension_numbers = #tpu.dot_dimension_numbers<[1], [0], [0], [1], [0, 0, 1, 1], [], []>} : vector<2x16xbf16>, vector<16x64xbf16>, vector<2x64xf32> -> vector<2x64xf32>
    %357 = arith.addf %354, %356 : vector<2x64xf32>
    %358 = vector.extract_strided_slice %357 {offsets = [0, 0], sizes = [2, 16], strides = [1, 1]} : vector<2x64xf32> to vector<2x16xf32>
    %359 = arith.negf %358 : vector<2x16xf32>
    %360 = math.exp %359 : vector<2x16xf32>
    %cst_81 = arith.constant 1.000000e+00 : f32
    %361 = vector.broadcast %cst_81 : f32 to vector<2x16xf32>
    %362 = arith.addf %361, %360 : vector<2x16xf32>
    %363 = arith.divf %361, %362 : vector<2x16xf32>
    %364 = vector.extract_strided_slice %357 {offsets = [0, 16], sizes = [2, 16], strides = [1, 1]} : vector<2x64xf32> to vector<2x16xf32>
    %365 = arith.negf %364 : vector<2x16xf32>
    %366 = math.exp %365 : vector<2x16xf32>
    %cst_82 = arith.constant 1.000000e+00 : f32
    %367 = vector.broadcast %cst_82 : f32 to vector<2x16xf32>
    %368 = arith.addf %367, %366 : vector<2x16xf32>
    %369 = arith.divf %367, %368 : vector<2x16xf32>
    %370 = vector.extract_strided_slice %357 {offsets = [0, 32], sizes = [2, 16], strides = [1, 1]} : vector<2x64xf32> to vector<2x16xf32>
    %371 = math.tanh %370 : vector<2x16xf32>
    %372 = vector.extract_strided_slice %357 {offsets = [0, 48], sizes = [2, 16], strides = [1, 1]} : vector<2x64xf32> to vector<2x16xf32>
    %373 = arith.negf %372 : vector<2x16xf32>
    %374 = math.exp %373 : vector<2x16xf32>
    %cst_83 = arith.constant 1.000000e+00 : f32
    %375 = vector.broadcast %cst_83 : f32 to vector<2x16xf32>
    %376 = arith.addf %375, %374 : vector<2x16xf32>
    %377 = arith.divf %375, %376 : vector<2x16xf32>
    %378 = arith.mulf %369, %341 : vector<2x16xf32>
    %379 = arith.mulf %363, %371 : vector<2x16xf32>
    %380 = arith.addf %378, %379 : vector<2x16xf32>
    %381 = math.tanh %380 : vector<2x16xf32>
    %382 = arith.mulf %377, %381 : vector<2x16xf32>
    %383 = vector.broadcast %351 : i32 to vector<2x1xi32>
    %384 = arith.cmpi slt, %383, %3 : vector<2x1xi32>
    %385 = vector.shape_cast %384 : vector<2x1xi1> to vector<2x1xi1>
    %386 = vector.broadcast %385 : vector<2x1xi1> to vector<2x16xi1>
    %387 = arith.select %386, %382, %338 : vector<2x16xi1>, vector<2x16xf32>
    %388 = vector.shape_cast %384 : vector<2x1xi1> to vector<2x1xi1>
    %389 = vector.broadcast %388 : vector<2x1xi1> to vector<2x16xi1>
    %390 = arith.select %389, %380, %341 : vector<2x16xi1>, vector<2x16xf32>
    %cst_84 = arith.constant 0.000000e+00 : f32
    %391 = vector.broadcast %cst_84 : f32 to vector<2x16xf32>
    %392 = vector.shape_cast %384 : vector<2x1xi1> to vector<2x1xi1>
    %393 = vector.broadcast %392 : vector<2x1xi1> to vector<2x16xi1>
    %394 = arith.select %393, %382, %391 : vector<2x16xi1>, vector<2x16xf32>
    %395 = arith.index_cast %c7_i32 : i32 to index
    %c0_85 = arith.constant 0 : index
    %c0_86 = arith.constant 0 : index
    %396 = vector.load %arg4[%395, %c0_85, %c0_86] : memref<8x2x16xf32, #tpu.memory_space<vmem>>, vector<1x2x16xf32>
    %397 = vector.shape_cast %396 : vector<1x2x16xf32> to vector<2x16xf32>
    %398 = vector.shape_cast %394 : vector<2x16xf32> to vector<1x2x16xf32>
    tpu.vector_store %arg4[%395, %c0_85, %c0_86], %398 {strides = array<i32>} : memref<8x2x16xf32, #tpu.memory_space<vmem>>, vector<1x2x16xf32>,
    %c8_i32_87 = arith.constant 8 : i32
    %c0_88 = arith.constant 0 : index
    %c0_89 = arith.constant 0 : index
    %399 = vector.load %arg5[%c0_88, %c0_89] : memref<2x16xf32, #tpu.memory_space<vmem>>, vector<2x16xf32>
    tpu.vector_store %arg5[%c0_88, %c0_89], %387 {strides = array<i32>} : memref<2x16xf32, #tpu.memory_space<vmem>>, vector<2x16xf32>,
    %c0_90 = arith.constant 0 : index
    %c0_91 = arith.constant 0 : index
    %400 = vector.load %arg6[%c0_90, %c0_91] : memref<2x16xf32, #tpu.memory_space<vmem>>, vector<2x16xf32>
    tpu.vector_store %arg6[%c0_90, %c0_91], %390 {strides = array<i32>} : memref<2x16xf32, #tpu.memory_space<vmem>>, vector<2x16xf32>,
    return
  }
  func.func @transform_0(%arg0: i32) -> (i32, i32) {
    %c0_i32 = arith.constant 0 : i32
    %c0_i32_0 = arith.constant 0 : i32
    %c0_i32_1 = arith.constant 0 : i32
    return %c0_i32, %c0_i32_0 : i32, i32
  }
  func.func @transform_1(%arg0: i32) -> (i32, i32, i32) {
    %c0_i32 = arith.constant 0 : i32
    %c0_i32_0 = arith.constant 0 : i32
    %c0_i32_1 = arith.constant 0 : i32
    return %arg0, %c0_i32, %c0_i32_0 : i32, i32, i32
  }
  func.func @transform_2(%arg0: i32) -> (i32, i32) {
    %c0_i32 = arith.constant 0 : i32
    %c0_i32_0 = arith.constant 0 : i32
    %c0_i32_1 = arith.constant 0 : i32
    return %c0_i32, %c0_i32_0 : i32, i32
  }
  func.func @transform_3(%arg0: i32) -> (i32, i32, i32) {
    %c0_i32 = arith.constant 0 : i32
    %c0_i32_0 = arith.constant 0 : i32
    %c0_i32_1 = arith.constant 0 : i32
    return %arg0, %c0_i32, %c0_i32_0 : i32, i32, i32
  }
}

module attributes {stable_mosaic.version = 11 : i64} {
  func.func @_lstm_rec_kernel(%arg0: i32, %arg1: memref<2x1xi32, #tpu.memory_space<vmem>>, %arg2: memref<8x2x64xf32, #tpu.memory_space<vmem>>, %arg3: memref<16x64xbf16, #tpu.memory_space<vmem>>, %arg4: memref<8x2x16xf32, #tpu.memory_space<vmem>>, %arg5: memref<2x16xf32, #tpu.memory_space<vmem>>, %arg6: memref<2x16xf32, #tpu.memory_space<vmem>>) attributes {dimension_semantics = [#tpu.dimension_semantics<arbitrary>], iteration_bounds = array<i64: 1>, scalar_prefetch = 0 : i64, scratch_operands = 2 : i64, tpu.core_type = #tpu.core_type<tc>, window_params = [{pipeline_mode = #tpu.pipeline_mode<synchronous>, transform_indices = @transform_0, window_bounds = array<i64: 2, 1>}, {transform_indices = @transform_1, window_bounds = array<i64: 8, 2, 64>}, {pipeline_mode = #tpu.pipeline_mode<synchronous>, transform_indices = @transform_2, window_bounds = array<i64: 16, 64>}, {transform_indices = @transform_3, window_bounds = array<i64: 8, 2, 16>}]} {
    %c0_i32 = arith.constant 0 : i32
    %0 = arith.cmpi eq, %arg0, %c0_i32 : i32
    %1 = arith.extui %0 : i1 to i32
    %c0_i32_0 = arith.constant 0 : i32
    %2 = arith.cmpi ne, %1, %c0_i32_0 : i32
    scf.if %2 {
      %cst_108 = arith.constant 0.000000e+00 : f32
      %417 = vector.broadcast %cst_108 : f32 to vector<2x16xf32>
      %c0_109 = arith.constant 0 : index
      %c0_110 = arith.constant 0 : index
      %418 = vector.load %arg5[%c0_109, %c0_110] : memref<2x16xf32, #tpu.memory_space<vmem>>, vector<2x16xf32>
      tpu.vector_store %arg5[%c0_109, %c0_110], %417 {strides = array<i32>} : memref<2x16xf32, #tpu.memory_space<vmem>>, vector<2x16xf32>,
      %cst_111 = arith.constant 0.000000e+00 : f32
      %419 = vector.broadcast %cst_111 : f32 to vector<2x16xf32>
      %c0_112 = arith.constant 0 : index
      %c0_113 = arith.constant 0 : index
      %420 = vector.load %arg6[%c0_112, %c0_113] : memref<2x16xf32, #tpu.memory_space<vmem>>, vector<2x16xf32>
      tpu.vector_store %arg6[%c0_112, %c0_113], %419 {strides = array<i32>} : memref<2x16xf32, #tpu.memory_space<vmem>>, vector<2x16xf32>,
    } else {
    }
    %c0 = arith.constant 0 : index
    %c0_1 = arith.constant 0 : index
    %3 = vector.load %arg1[%c0, %c0_1] : memref<2x1xi32, #tpu.memory_space<vmem>>, vector<2x1xi32>
    %c0_2 = arith.constant 0 : index
    %c0_3 = arith.constant 0 : index
    %4 = vector.load %arg3[%c0_2, %c0_3] : memref<16x64xbf16, #tpu.memory_space<vmem>>, vector<16x64xbf16>
    %c0_4 = arith.constant 0 : index
    %c0_5 = arith.constant 0 : index
    %5 = vector.load %arg5[%c0_4, %c0_5] : memref<2x16xf32, #tpu.memory_space<vmem>>, vector<2x16xf32>
    %c0_6 = arith.constant 0 : index
    %c0_7 = arith.constant 0 : index
    %6 = vector.load %arg6[%c0_6, %c0_7] : memref<2x16xf32, #tpu.memory_space<vmem>>, vector<2x16xf32>
    %c0_i32_8 = arith.constant 0 : i32
    %c7_i32 = arith.constant 7 : i32
    %7 = arith.subi %c7_i32, %c0_i32_8 : i32
    %c8_i32 = arith.constant 8 : i32
    %8 = arith.muli %arg0, %c8_i32 : i32
    %9 = arith.addi %8, %c0_i32_8 : i32
    %c7_i32_9 = arith.constant 7 : i32
    %10 = arith.subi %c7_i32_9, %9 : i32
    %11 = arith.index_cast %7 : i32 to index
    %c0_10 = arith.constant 0 : index
    %c0_11 = arith.constant 0 : index
    %12 = vector.load %arg2[%11, %c0_10, %c0_11] : memref<8x2x64xf32, #tpu.memory_space<vmem>>, vector<1x2x64xf32>
    %13 = vector.shape_cast %12 : vector<1x2x64xf32> to vector<2x64xf32>
    %14 = arith.truncf %5 : vector<2x16xf32> to vector<2x16xbf16>
    %cst = arith.constant dense<0.000000e+00> : vector<2x64xf32>
    %15 = tpu.matmul %14, %4, %cst {dimension_numbers = #tpu.dot_dimension_numbers<[1], [0], [0], [1], [0, 0, 1, 1], [], []>} : vector<2x16xbf16>, vector<16x64xbf16>, vector<2x64xf32> -> vector<2x64xf32>
    %16 = arith.addf %13, %15 : vector<2x64xf32>
    %17 = vector.extract_strided_slice %16 {offsets = [0, 0], sizes = [2, 16], strides = [1, 1]} : vector<2x64xf32> to vector<2x16xf32>
    %18 = arith.negf %17 : vector<2x16xf32>
    %19 = math.exp %18 : vector<2x16xf32>
    %cst_12 = arith.constant 1.000000e+00 : f32
    %20 = vector.broadcast %cst_12 : f32 to vector<2x16xf32>
    %21 = arith.addf %20, %19 : vector<2x16xf32>
    %22 = arith.divf %20, %21 : vector<2x16xf32>
    %23 = vector.extract_strided_slice %16 {offsets = [0, 16], sizes = [2, 16], strides = [1, 1]} : vector<2x64xf32> to vector<2x16xf32>
    %24 = arith.negf %23 : vector<2x16xf32>
    %25 = math.exp %24 : vector<2x16xf32>
    %cst_13 = arith.constant 1.000000e+00 : f32
    %26 = vector.broadcast %cst_13 : f32 to vector<2x16xf32>
    %27 = arith.addf %26, %25 : vector<2x16xf32>
    %28 = arith.divf %26, %27 : vector<2x16xf32>
    %29 = vector.extract_strided_slice %16 {offsets = [0, 32], sizes = [2, 16], strides = [1, 1]} : vector<2x64xf32> to vector<2x16xf32>
    %30 = math.tanh %29 : vector<2x16xf32>
    %31 = vector.extract_strided_slice %16 {offsets = [0, 48], sizes = [2, 16], strides = [1, 1]} : vector<2x64xf32> to vector<2x16xf32>
    %32 = arith.negf %31 : vector<2x16xf32>
    %33 = math.exp %32 : vector<2x16xf32>
    %cst_14 = arith.constant 1.000000e+00 : f32
    %34 = vector.broadcast %cst_14 : f32 to vector<2x16xf32>
    %35 = arith.addf %34, %33 : vector<2x16xf32>
    %36 = arith.divf %34, %35 : vector<2x16xf32>
    %37 = arith.mulf %28, %6 : vector<2x16xf32>
    %38 = arith.mulf %22, %30 : vector<2x16xf32>
    %39 = arith.addf %37, %38 : vector<2x16xf32>
    %40 = math.tanh %39 : vector<2x16xf32>
    %41 = arith.mulf %36, %40 : vector<2x16xf32>
    %42 = vector.broadcast %10 : i32 to vector<2x1xi32>
    %43 = arith.cmpi slt, %42, %3 : vector<2x1xi32>
    %44 = vector.shape_cast %43 : vector<2x1xi1> to vector<2x1xi1>
    %45 = vector.broadcast %44 : vector<2x1xi1> to vector<2x16xi1>
    %46 = arith.select %45, %41, %5 : vector<2x16xi1>, vector<2x16xf32>
    %47 = vector.shape_cast %43 : vector<2x1xi1> to vector<2x1xi1>
    %48 = vector.broadcast %47 : vector<2x1xi1> to vector<2x16xi1>
    %49 = arith.select %48, %39, %6 : vector<2x16xi1>, vector<2x16xf32>
    %cst_15 = arith.constant 0.000000e+00 : f32
    %50 = vector.broadcast %cst_15 : f32 to vector<2x16xf32>
    %51 = vector.shape_cast %43 : vector<2x1xi1> to vector<2x1xi1>
    %52 = vector.broadcast %51 : vector<2x1xi1> to vector<2x16xi1>
    %53 = arith.select %52, %41, %50 : vector<2x16xi1>, vector<2x16xf32>
    %54 = arith.index_cast %7 : i32 to index
    %c0_16 = arith.constant 0 : index
    %c0_17 = arith.constant 0 : index
    %55 = vector.load %arg4[%54, %c0_16, %c0_17] : memref<8x2x16xf32, #tpu.memory_space<vmem>>, vector<1x2x16xf32>
    %56 = vector.shape_cast %55 : vector<1x2x16xf32> to vector<2x16xf32>
    %57 = vector.shape_cast %53 : vector<2x16xf32> to vector<1x2x16xf32>
    tpu.vector_store %arg4[%54, %c0_16, %c0_17], %57 {strides = array<i32>} : memref<8x2x16xf32, #tpu.memory_space<vmem>>, vector<1x2x16xf32>,
    %c1_i32 = arith.constant 1 : i32
    %c7_i32_18 = arith.constant 7 : i32
    %58 = arith.subi %c7_i32_18, %c1_i32 : i32
    %c8_i32_19 = arith.constant 8 : i32
    %59 = arith.muli %arg0, %c8_i32_19 : i32
    %60 = arith.addi %59, %c1_i32 : i32
    %c7_i32_20 = arith.constant 7 : i32
    %61 = arith.subi %c7_i32_20, %60 : i32
    %62 = arith.index_cast %58 : i32 to index
    %c0_21 = arith.constant 0 : index
    %c0_22 = arith.constant 0 : index
    %63 = vector.load %arg2[%62, %c0_21, %c0_22] : memref<8x2x64xf32, #tpu.memory_space<vmem>>, vector<1x2x64xf32>
    %64 = vector.shape_cast %63 : vector<1x2x64xf32> to vector<2x64xf32>
    %65 = arith.truncf %46 : vector<2x16xf32> to vector<2x16xbf16>
    %cst_23 = arith.constant dense<0.000000e+00> : vector<2x64xf32>
    %66 = tpu.matmul %65, %4, %cst_23 {dimension_numbers = #tpu.dot_dimension_numbers<[1], [0], [0], [1], [0, 0, 1, 1], [], []>} : vector<2x16xbf16>, vector<16x64xbf16>, vector<2x64xf32> -> vector<2x64xf32>
    %67 = arith.addf %64, %66 : vector<2x64xf32>
    %68 = vector.extract_strided_slice %67 {offsets = [0, 0], sizes = [2, 16], strides = [1, 1]} : vector<2x64xf32> to vector<2x16xf32>
    %69 = arith.negf %68 : vector<2x16xf32>
    %70 = math.exp %69 : vector<2x16xf32>
    %cst_24 = arith.constant 1.000000e+00 : f32
    %71 = vector.broadcast %cst_24 : f32 to vector<2x16xf32>
    %72 = arith.addf %71, %70 : vector<2x16xf32>
    %73 = arith.divf %71, %72 : vector<2x16xf32>
    %74 = vector.extract_strided_slice %67 {offsets = [0, 16], sizes = [2, 16], strides = [1, 1]} : vector<2x64xf32> to vector<2x16xf32>
    %75 = arith.negf %74 : vector<2x16xf32>
    %76 = math.exp %75 : vector<2x16xf32>
    %cst_25 = arith.constant 1.000000e+00 : f32
    %77 = vector.broadcast %cst_25 : f32 to vector<2x16xf32>
    %78 = arith.addf %77, %76 : vector<2x16xf32>
    %79 = arith.divf %77, %78 : vector<2x16xf32>
    %80 = vector.extract_strided_slice %67 {offsets = [0, 32], sizes = [2, 16], strides = [1, 1]} : vector<2x64xf32> to vector<2x16xf32>
    %81 = math.tanh %80 : vector<2x16xf32>
    %82 = vector.extract_strided_slice %67 {offsets = [0, 48], sizes = [2, 16], strides = [1, 1]} : vector<2x64xf32> to vector<2x16xf32>
    %83 = arith.negf %82 : vector<2x16xf32>
    %84 = math.exp %83 : vector<2x16xf32>
    %cst_26 = arith.constant 1.000000e+00 : f32
    %85 = vector.broadcast %cst_26 : f32 to vector<2x16xf32>
    %86 = arith.addf %85, %84 : vector<2x16xf32>
    %87 = arith.divf %85, %86 : vector<2x16xf32>
    %88 = arith.mulf %79, %49 : vector<2x16xf32>
    %89 = arith.mulf %73, %81 : vector<2x16xf32>
    %90 = arith.addf %88, %89 : vector<2x16xf32>
    %91 = math.tanh %90 : vector<2x16xf32>
    %92 = arith.mulf %87, %91 : vector<2x16xf32>
    %93 = vector.broadcast %61 : i32 to vector<2x1xi32>
    %94 = arith.cmpi slt, %93, %3 : vector<2x1xi32>
    %95 = vector.shape_cast %94 : vector<2x1xi1> to vector<2x1xi1>
    %96 = vector.broadcast %95 : vector<2x1xi1> to vector<2x16xi1>
    %97 = arith.select %96, %92, %46 : vector<2x16xi1>, vector<2x16xf32>
    %98 = vector.shape_cast %94 : vector<2x1xi1> to vector<2x1xi1>
    %99 = vector.broadcast %98 : vector<2x1xi1> to vector<2x16xi1>
    %100 = arith.select %99, %90, %49 : vector<2x16xi1>, vector<2x16xf32>
    %cst_27 = arith.constant 0.000000e+00 : f32
    %101 = vector.broadcast %cst_27 : f32 to vector<2x16xf32>
    %102 = vector.shape_cast %94 : vector<2x1xi1> to vector<2x1xi1>
    %103 = vector.broadcast %102 : vector<2x1xi1> to vector<2x16xi1>
    %104 = arith.select %103, %92, %101 : vector<2x16xi1>, vector<2x16xf32>
    %105 = arith.index_cast %58 : i32 to index
    %c0_28 = arith.constant 0 : index
    %c0_29 = arith.constant 0 : index
    %106 = vector.load %arg4[%105, %c0_28, %c0_29] : memref<8x2x16xf32, #tpu.memory_space<vmem>>, vector<1x2x16xf32>
    %107 = vector.shape_cast %106 : vector<1x2x16xf32> to vector<2x16xf32>
    %108 = vector.shape_cast %104 : vector<2x16xf32> to vector<1x2x16xf32>
    tpu.vector_store %arg4[%105, %c0_28, %c0_29], %108 {strides = array<i32>} : memref<8x2x16xf32, #tpu.memory_space<vmem>>, vector<1x2x16xf32>,
    %c2_i32 = arith.constant 2 : i32
    %c7_i32_30 = arith.constant 7 : i32
    %109 = arith.subi %c7_i32_30, %c2_i32 : i32
    %c8_i32_31 = arith.constant 8 : i32
    %110 = arith.muli %arg0, %c8_i32_31 : i32
    %111 = arith.addi %110, %c2_i32 : i32
    %c7_i32_32 = arith.constant 7 : i32
    %112 = arith.subi %c7_i32_32, %111 : i32
    %113 = arith.index_cast %109 : i32 to index
    %c0_33 = arith.constant 0 : index
    %c0_34 = arith.constant 0 : index
    %114 = vector.load %arg2[%113, %c0_33, %c0_34] : memref<8x2x64xf32, #tpu.memory_space<vmem>>, vector<1x2x64xf32>
    %115 = vector.shape_cast %114 : vector<1x2x64xf32> to vector<2x64xf32>
    %116 = arith.truncf %97 : vector<2x16xf32> to vector<2x16xbf16>
    %cst_35 = arith.constant dense<0.000000e+00> : vector<2x64xf32>
    %117 = tpu.matmul %116, %4, %cst_35 {dimension_numbers = #tpu.dot_dimension_numbers<[1], [0], [0], [1], [0, 0, 1, 1], [], []>} : vector<2x16xbf16>, vector<16x64xbf16>, vector<2x64xf32> -> vector<2x64xf32>
    %118 = arith.addf %115, %117 : vector<2x64xf32>
    %119 = vector.extract_strided_slice %118 {offsets = [0, 0], sizes = [2, 16], strides = [1, 1]} : vector<2x64xf32> to vector<2x16xf32>
    %120 = arith.negf %119 : vector<2x16xf32>
    %121 = math.exp %120 : vector<2x16xf32>
    %cst_36 = arith.constant 1.000000e+00 : f32
    %122 = vector.broadcast %cst_36 : f32 to vector<2x16xf32>
    %123 = arith.addf %122, %121 : vector<2x16xf32>
    %124 = arith.divf %122, %123 : vector<2x16xf32>
    %125 = vector.extract_strided_slice %118 {offsets = [0, 16], sizes = [2, 16], strides = [1, 1]} : vector<2x64xf32> to vector<2x16xf32>
    %126 = arith.negf %125 : vector<2x16xf32>
    %127 = math.exp %126 : vector<2x16xf32>
    %cst_37 = arith.constant 1.000000e+00 : f32
    %128 = vector.broadcast %cst_37 : f32 to vector<2x16xf32>
    %129 = arith.addf %128, %127 : vector<2x16xf32>
    %130 = arith.divf %128, %129 : vector<2x16xf32>
    %131 = vector.extract_strided_slice %118 {offsets = [0, 32], sizes = [2, 16], strides = [1, 1]} : vector<2x64xf32> to vector<2x16xf32>
    %132 = math.tanh %131 : vector<2x16xf32>
    %133 = vector.extract_strided_slice %118 {offsets = [0, 48], sizes = [2, 16], strides = [1, 1]} : vector<2x64xf32> to vector<2x16xf32>
    %134 = arith.negf %133 : vector<2x16xf32>
    %135 = math.exp %134 : vector<2x16xf32>
    %cst_38 = arith.constant 1.000000e+00 : f32
    %136 = vector.broadcast %cst_38 : f32 to vector<2x16xf32>
    %137 = arith.addf %136, %135 : vector<2x16xf32>
    %138 = arith.divf %136, %137 : vector<2x16xf32>
    %139 = arith.mulf %130, %100 : vector<2x16xf32>
    %140 = arith.mulf %124, %132 : vector<2x16xf32>
    %141 = arith.addf %139, %140 : vector<2x16xf32>
    %142 = math.tanh %141 : vector<2x16xf32>
    %143 = arith.mulf %138, %142 : vector<2x16xf32>
    %144 = vector.broadcast %112 : i32 to vector<2x1xi32>
    %145 = arith.cmpi slt, %144, %3 : vector<2x1xi32>
    %146 = vector.shape_cast %145 : vector<2x1xi1> to vector<2x1xi1>
    %147 = vector.broadcast %146 : vector<2x1xi1> to vector<2x16xi1>
    %148 = arith.select %147, %143, %97 : vector<2x16xi1>, vector<2x16xf32>
    %149 = vector.shape_cast %145 : vector<2x1xi1> to vector<2x1xi1>
    %150 = vector.broadcast %149 : vector<2x1xi1> to vector<2x16xi1>
    %151 = arith.select %150, %141, %100 : vector<2x16xi1>, vector<2x16xf32>
    %cst_39 = arith.constant 0.000000e+00 : f32
    %152 = vector.broadcast %cst_39 : f32 to vector<2x16xf32>
    %153 = vector.shape_cast %145 : vector<2x1xi1> to vector<2x1xi1>
    %154 = vector.broadcast %153 : vector<2x1xi1> to vector<2x16xi1>
    %155 = arith.select %154, %143, %152 : vector<2x16xi1>, vector<2x16xf32>
    %156 = arith.index_cast %109 : i32 to index
    %c0_40 = arith.constant 0 : index
    %c0_41 = arith.constant 0 : index
    %157 = vector.load %arg4[%156, %c0_40, %c0_41] : memref<8x2x16xf32, #tpu.memory_space<vmem>>, vector<1x2x16xf32>
    %158 = vector.shape_cast %157 : vector<1x2x16xf32> to vector<2x16xf32>
    %159 = vector.shape_cast %155 : vector<2x16xf32> to vector<1x2x16xf32>
    tpu.vector_store %arg4[%156, %c0_40, %c0_41], %159 {strides = array<i32>} : memref<8x2x16xf32, #tpu.memory_space<vmem>>, vector<1x2x16xf32>,
    %c3_i32 = arith.constant 3 : i32
    %c7_i32_42 = arith.constant 7 : i32
    %160 = arith.subi %c7_i32_42, %c3_i32 : i32
    %c8_i32_43 = arith.constant 8 : i32
    %161 = arith.muli %arg0, %c8_i32_43 : i32
    %162 = arith.addi %161, %c3_i32 : i32
    %c7_i32_44 = arith.constant 7 : i32
    %163 = arith.subi %c7_i32_44, %162 : i32
    %164 = arith.index_cast %160 : i32 to index
    %c0_45 = arith.constant 0 : index
    %c0_46 = arith.constant 0 : index
    %165 = vector.load %arg2[%164, %c0_45, %c0_46] : memref<8x2x64xf32, #tpu.memory_space<vmem>>, vector<1x2x64xf32>
    %166 = vector.shape_cast %165 : vector<1x2x64xf32> to vector<2x64xf32>
    %167 = arith.truncf %148 : vector<2x16xf32> to vector<2x16xbf16>
    %cst_47 = arith.constant dense<0.000000e+00> : vector<2x64xf32>
    %168 = tpu.matmul %167, %4, %cst_47 {dimension_numbers = #tpu.dot_dimension_numbers<[1], [0], [0], [1], [0, 0, 1, 1], [], []>} : vector<2x16xbf16>, vector<16x64xbf16>, vector<2x64xf32> -> vector<2x64xf32>
    %169 = arith.addf %166, %168 : vector<2x64xf32>
    %170 = vector.extract_strided_slice %169 {offsets = [0, 0], sizes = [2, 16], strides = [1, 1]} : vector<2x64xf32> to vector<2x16xf32>
    %171 = arith.negf %170 : vector<2x16xf32>
    %172 = math.exp %171 : vector<2x16xf32>
    %cst_48 = arith.constant 1.000000e+00 : f32
    %173 = vector.broadcast %cst_48 : f32 to vector<2x16xf32>
    %174 = arith.addf %173, %172 : vector<2x16xf32>
    %175 = arith.divf %173, %174 : vector<2x16xf32>
    %176 = vector.extract_strided_slice %169 {offsets = [0, 16], sizes = [2, 16], strides = [1, 1]} : vector<2x64xf32> to vector<2x16xf32>
    %177 = arith.negf %176 : vector<2x16xf32>
    %178 = math.exp %177 : vector<2x16xf32>
    %cst_49 = arith.constant 1.000000e+00 : f32
    %179 = vector.broadcast %cst_49 : f32 to vector<2x16xf32>
    %180 = arith.addf %179, %178 : vector<2x16xf32>
    %181 = arith.divf %179, %180 : vector<2x16xf32>
    %182 = vector.extract_strided_slice %169 {offsets = [0, 32], sizes = [2, 16], strides = [1, 1]} : vector<2x64xf32> to vector<2x16xf32>
    %183 = math.tanh %182 : vector<2x16xf32>
    %184 = vector.extract_strided_slice %169 {offsets = [0, 48], sizes = [2, 16], strides = [1, 1]} : vector<2x64xf32> to vector<2x16xf32>
    %185 = arith.negf %184 : vector<2x16xf32>
    %186 = math.exp %185 : vector<2x16xf32>
    %cst_50 = arith.constant 1.000000e+00 : f32
    %187 = vector.broadcast %cst_50 : f32 to vector<2x16xf32>
    %188 = arith.addf %187, %186 : vector<2x16xf32>
    %189 = arith.divf %187, %188 : vector<2x16xf32>
    %190 = arith.mulf %181, %151 : vector<2x16xf32>
    %191 = arith.mulf %175, %183 : vector<2x16xf32>
    %192 = arith.addf %190, %191 : vector<2x16xf32>
    %193 = math.tanh %192 : vector<2x16xf32>
    %194 = arith.mulf %189, %193 : vector<2x16xf32>
    %195 = vector.broadcast %163 : i32 to vector<2x1xi32>
    %196 = arith.cmpi slt, %195, %3 : vector<2x1xi32>
    %197 = vector.shape_cast %196 : vector<2x1xi1> to vector<2x1xi1>
    %198 = vector.broadcast %197 : vector<2x1xi1> to vector<2x16xi1>
    %199 = arith.select %198, %194, %148 : vector<2x16xi1>, vector<2x16xf32>
    %200 = vector.shape_cast %196 : vector<2x1xi1> to vector<2x1xi1>
    %201 = vector.broadcast %200 : vector<2x1xi1> to vector<2x16xi1>
    %202 = arith.select %201, %192, %151 : vector<2x16xi1>, vector<2x16xf32>
    %cst_51 = arith.constant 0.000000e+00 : f32
    %203 = vector.broadcast %cst_51 : f32 to vector<2x16xf32>
    %204 = vector.shape_cast %196 : vector<2x1xi1> to vector<2x1xi1>
    %205 = vector.broadcast %204 : vector<2x1xi1> to vector<2x16xi1>
    %206 = arith.select %205, %194, %203 : vector<2x16xi1>, vector<2x16xf32>
    %207 = arith.index_cast %160 : i32 to index
    %c0_52 = arith.constant 0 : index
    %c0_53 = arith.constant 0 : index
    %208 = vector.load %arg4[%207, %c0_52, %c0_53] : memref<8x2x16xf32, #tpu.memory_space<vmem>>, vector<1x2x16xf32>
    %209 = vector.shape_cast %208 : vector<1x2x16xf32> to vector<2x16xf32>
    %210 = vector.shape_cast %206 : vector<2x16xf32> to vector<1x2x16xf32>
    tpu.vector_store %arg4[%207, %c0_52, %c0_53], %210 {strides = array<i32>} : memref<8x2x16xf32, #tpu.memory_space<vmem>>, vector<1x2x16xf32>,
    %c4_i32 = arith.constant 4 : i32
    %c7_i32_54 = arith.constant 7 : i32
    %211 = arith.subi %c7_i32_54, %c4_i32 : i32
    %c8_i32_55 = arith.constant 8 : i32
    %212 = arith.muli %arg0, %c8_i32_55 : i32
    %213 = arith.addi %212, %c4_i32 : i32
    %c7_i32_56 = arith.constant 7 : i32
    %214 = arith.subi %c7_i32_56, %213 : i32
    %215 = arith.index_cast %211 : i32 to index
    %c0_57 = arith.constant 0 : index
    %c0_58 = arith.constant 0 : index
    %216 = vector.load %arg2[%215, %c0_57, %c0_58] : memref<8x2x64xf32, #tpu.memory_space<vmem>>, vector<1x2x64xf32>
    %217 = vector.shape_cast %216 : vector<1x2x64xf32> to vector<2x64xf32>
    %218 = arith.truncf %199 : vector<2x16xf32> to vector<2x16xbf16>
    %cst_59 = arith.constant dense<0.000000e+00> : vector<2x64xf32>
    %219 = tpu.matmul %218, %4, %cst_59 {dimension_numbers = #tpu.dot_dimension_numbers<[1], [0], [0], [1], [0, 0, 1, 1], [], []>} : vector<2x16xbf16>, vector<16x64xbf16>, vector<2x64xf32> -> vector<2x64xf32>
    %220 = arith.addf %217, %219 : vector<2x64xf32>
    %221 = vector.extract_strided_slice %220 {offsets = [0, 0], sizes = [2, 16], strides = [1, 1]} : vector<2x64xf32> to vector<2x16xf32>
    %222 = arith.negf %221 : vector<2x16xf32>
    %223 = math.exp %222 : vector<2x16xf32>
    %cst_60 = arith.constant 1.000000e+00 : f32
    %224 = vector.broadcast %cst_60 : f32 to vector<2x16xf32>
    %225 = arith.addf %224, %223 : vector<2x16xf32>
    %226 = arith.divf %224, %225 : vector<2x16xf32>
    %227 = vector.extract_strided_slice %220 {offsets = [0, 16], sizes = [2, 16], strides = [1, 1]} : vector<2x64xf32> to vector<2x16xf32>
    %228 = arith.negf %227 : vector<2x16xf32>
    %229 = math.exp %228 : vector<2x16xf32>
    %cst_61 = arith.constant 1.000000e+00 : f32
    %230 = vector.broadcast %cst_61 : f32 to vector<2x16xf32>
    %231 = arith.addf %230, %229 : vector<2x16xf32>
    %232 = arith.divf %230, %231 : vector<2x16xf32>
    %233 = vector.extract_strided_slice %220 {offsets = [0, 32], sizes = [2, 16], strides = [1, 1]} : vector<2x64xf32> to vector<2x16xf32>
    %234 = math.tanh %233 : vector<2x16xf32>
    %235 = vector.extract_strided_slice %220 {offsets = [0, 48], sizes = [2, 16], strides = [1, 1]} : vector<2x64xf32> to vector<2x16xf32>
    %236 = arith.negf %235 : vector<2x16xf32>
    %237 = math.exp %236 : vector<2x16xf32>
    %cst_62 = arith.constant 1.000000e+00 : f32
    %238 = vector.broadcast %cst_62 : f32 to vector<2x16xf32>
    %239 = arith.addf %238, %237 : vector<2x16xf32>
    %240 = arith.divf %238, %239 : vector<2x16xf32>
    %241 = arith.mulf %232, %202 : vector<2x16xf32>
    %242 = arith.mulf %226, %234 : vector<2x16xf32>
    %243 = arith.addf %241, %242 : vector<2x16xf32>
    %244 = math.tanh %243 : vector<2x16xf32>
    %245 = arith.mulf %240, %244 : vector<2x16xf32>
    %246 = vector.broadcast %214 : i32 to vector<2x1xi32>
    %247 = arith.cmpi slt, %246, %3 : vector<2x1xi32>
    %248 = vector.shape_cast %247 : vector<2x1xi1> to vector<2x1xi1>
    %249 = vector.broadcast %248 : vector<2x1xi1> to vector<2x16xi1>
    %250 = arith.select %249, %245, %199 : vector<2x16xi1>, vector<2x16xf32>
    %251 = vector.shape_cast %247 : vector<2x1xi1> to vector<2x1xi1>
    %252 = vector.broadcast %251 : vector<2x1xi1> to vector<2x16xi1>
    %253 = arith.select %252, %243, %202 : vector<2x16xi1>, vector<2x16xf32>
    %cst_63 = arith.constant 0.000000e+00 : f32
    %254 = vector.broadcast %cst_63 : f32 to vector<2x16xf32>
    %255 = vector.shape_cast %247 : vector<2x1xi1> to vector<2x1xi1>
    %256 = vector.broadcast %255 : vector<2x1xi1> to vector<2x16xi1>
    %257 = arith.select %256, %245, %254 : vector<2x16xi1>, vector<2x16xf32>
    %258 = arith.index_cast %211 : i32 to index
    %c0_64 = arith.constant 0 : index
    %c0_65 = arith.constant 0 : index
    %259 = vector.load %arg4[%258, %c0_64, %c0_65] : memref<8x2x16xf32, #tpu.memory_space<vmem>>, vector<1x2x16xf32>
    %260 = vector.shape_cast %259 : vector<1x2x16xf32> to vector<2x16xf32>
    %261 = vector.shape_cast %257 : vector<2x16xf32> to vector<1x2x16xf32>
    tpu.vector_store %arg4[%258, %c0_64, %c0_65], %261 {strides = array<i32>} : memref<8x2x16xf32, #tpu.memory_space<vmem>>, vector<1x2x16xf32>,
    %c5_i32 = arith.constant 5 : i32
    %c7_i32_66 = arith.constant 7 : i32
    %262 = arith.subi %c7_i32_66, %c5_i32 : i32
    %c8_i32_67 = arith.constant 8 : i32
    %263 = arith.muli %arg0, %c8_i32_67 : i32
    %264 = arith.addi %263, %c5_i32 : i32
    %c7_i32_68 = arith.constant 7 : i32
    %265 = arith.subi %c7_i32_68, %264 : i32
    %266 = arith.index_cast %262 : i32 to index
    %c0_69 = arith.constant 0 : index
    %c0_70 = arith.constant 0 : index
    %267 = vector.load %arg2[%266, %c0_69, %c0_70] : memref<8x2x64xf32, #tpu.memory_space<vmem>>, vector<1x2x64xf32>
    %268 = vector.shape_cast %267 : vector<1x2x64xf32> to vector<2x64xf32>
    %269 = arith.truncf %250 : vector<2x16xf32> to vector<2x16xbf16>
    %cst_71 = arith.constant dense<0.000000e+00> : vector<2x64xf32>
    %270 = tpu.matmul %269, %4, %cst_71 {dimension_numbers = #tpu.dot_dimension_numbers<[1], [0], [0], [1], [0, 0, 1, 1], [], []>} : vector<2x16xbf16>, vector<16x64xbf16>, vector<2x64xf32> -> vector<2x64xf32>
    %271 = arith.addf %268, %270 : vector<2x64xf32>
    %272 = vector.extract_strided_slice %271 {offsets = [0, 0], sizes = [2, 16], strides = [1, 1]} : vector<2x64xf32> to vector<2x16xf32>
    %273 = arith.negf %272 : vector<2x16xf32>
    %274 = math.exp %273 : vector<2x16xf32>
    %cst_72 = arith.constant 1.000000e+00 : f32
    %275 = vector.broadcast %cst_72 : f32 to vector<2x16xf32>
    %276 = arith.addf %275, %274 : vector<2x16xf32>
    %277 = arith.divf %275, %276 : vector<2x16xf32>
    %278 = vector.extract_strided_slice %271 {offsets = [0, 16], sizes = [2, 16], strides = [1, 1]} : vector<2x64xf32> to vector<2x16xf32>
    %279 = arith.negf %278 : vector<2x16xf32>
    %280 = math.exp %279 : vector<2x16xf32>
    %cst_73 = arith.constant 1.000000e+00 : f32
    %281 = vector.broadcast %cst_73 : f32 to vector<2x16xf32>
    %282 = arith.addf %281, %280 : vector<2x16xf32>
    %283 = arith.divf %281, %282 : vector<2x16xf32>
    %284 = vector.extract_strided_slice %271 {offsets = [0, 32], sizes = [2, 16], strides = [1, 1]} : vector<2x64xf32> to vector<2x16xf32>
    %285 = math.tanh %284 : vector<2x16xf32>
    %286 = vector.extract_strided_slice %271 {offsets = [0, 48], sizes = [2, 16], strides = [1, 1]} : vector<2x64xf32> to vector<2x16xf32>
    %287 = arith.negf %286 : vector<2x16xf32>
    %288 = math.exp %287 : vector<2x16xf32>
    %cst_74 = arith.constant 1.000000e+00 : f32
    %289 = vector.broadcast %cst_74 : f32 to vector<2x16xf32>
    %290 = arith.addf %289, %288 : vector<2x16xf32>
    %291 = arith.divf %289, %290 : vector<2x16xf32>
    %292 = arith.mulf %283, %253 : vector<2x16xf32>
    %293 = arith.mulf %277, %285 : vector<2x16xf32>
    %294 = arith.addf %292, %293 : vector<2x16xf32>
    %295 = math.tanh %294 : vector<2x16xf32>
    %296 = arith.mulf %291, %295 : vector<2x16xf32>
    %297 = vector.broadcast %265 : i32 to vector<2x1xi32>
    %298 = arith.cmpi slt, %297, %3 : vector<2x1xi32>
    %299 = vector.shape_cast %298 : vector<2x1xi1> to vector<2x1xi1>
    %300 = vector.broadcast %299 : vector<2x1xi1> to vector<2x16xi1>
    %301 = arith.select %300, %296, %250 : vector<2x16xi1>, vector<2x16xf32>
    %302 = vector.shape_cast %298 : vector<2x1xi1> to vector<2x1xi1>
    %303 = vector.broadcast %302 : vector<2x1xi1> to vector<2x16xi1>
    %304 = arith.select %303, %294, %253 : vector<2x16xi1>, vector<2x16xf32>
    %cst_75 = arith.constant 0.000000e+00 : f32
    %305 = vector.broadcast %cst_75 : f32 to vector<2x16xf32>
    %306 = vector.shape_cast %298 : vector<2x1xi1> to vector<2x1xi1>
    %307 = vector.broadcast %306 : vector<2x1xi1> to vector<2x16xi1>
    %308 = arith.select %307, %296, %305 : vector<2x16xi1>, vector<2x16xf32>
    %309 = arith.index_cast %262 : i32 to index
    %c0_76 = arith.constant 0 : index
    %c0_77 = arith.constant 0 : index
    %310 = vector.load %arg4[%309, %c0_76, %c0_77] : memref<8x2x16xf32, #tpu.memory_space<vmem>>, vector<1x2x16xf32>
    %311 = vector.shape_cast %310 : vector<1x2x16xf32> to vector<2x16xf32>
    %312 = vector.shape_cast %308 : vector<2x16xf32> to vector<1x2x16xf32>
    tpu.vector_store %arg4[%309, %c0_76, %c0_77], %312 {strides = array<i32>} : memref<8x2x16xf32, #tpu.memory_space<vmem>>, vector<1x2x16xf32>,
    %c6_i32 = arith.constant 6 : i32
    %c7_i32_78 = arith.constant 7 : i32
    %313 = arith.subi %c7_i32_78, %c6_i32 : i32
    %c8_i32_79 = arith.constant 8 : i32
    %314 = arith.muli %arg0, %c8_i32_79 : i32
    %315 = arith.addi %314, %c6_i32 : i32
    %c7_i32_80 = arith.constant 7 : i32
    %316 = arith.subi %c7_i32_80, %315 : i32
    %317 = arith.index_cast %313 : i32 to index
    %c0_81 = arith.constant 0 : index
    %c0_82 = arith.constant 0 : index
    %318 = vector.load %arg2[%317, %c0_81, %c0_82] : memref<8x2x64xf32, #tpu.memory_space<vmem>>, vector<1x2x64xf32>
    %319 = vector.shape_cast %318 : vector<1x2x64xf32> to vector<2x64xf32>
    %320 = arith.truncf %301 : vector<2x16xf32> to vector<2x16xbf16>
    %cst_83 = arith.constant dense<0.000000e+00> : vector<2x64xf32>
    %321 = tpu.matmul %320, %4, %cst_83 {dimension_numbers = #tpu.dot_dimension_numbers<[1], [0], [0], [1], [0, 0, 1, 1], [], []>} : vector<2x16xbf16>, vector<16x64xbf16>, vector<2x64xf32> -> vector<2x64xf32>
    %322 = arith.addf %319, %321 : vector<2x64xf32>
    %323 = vector.extract_strided_slice %322 {offsets = [0, 0], sizes = [2, 16], strides = [1, 1]} : vector<2x64xf32> to vector<2x16xf32>
    %324 = arith.negf %323 : vector<2x16xf32>
    %325 = math.exp %324 : vector<2x16xf32>
    %cst_84 = arith.constant 1.000000e+00 : f32
    %326 = vector.broadcast %cst_84 : f32 to vector<2x16xf32>
    %327 = arith.addf %326, %325 : vector<2x16xf32>
    %328 = arith.divf %326, %327 : vector<2x16xf32>
    %329 = vector.extract_strided_slice %322 {offsets = [0, 16], sizes = [2, 16], strides = [1, 1]} : vector<2x64xf32> to vector<2x16xf32>
    %330 = arith.negf %329 : vector<2x16xf32>
    %331 = math.exp %330 : vector<2x16xf32>
    %cst_85 = arith.constant 1.000000e+00 : f32
    %332 = vector.broadcast %cst_85 : f32 to vector<2x16xf32>
    %333 = arith.addf %332, %331 : vector<2x16xf32>
    %334 = arith.divf %332, %333 : vector<2x16xf32>
    %335 = vector.extract_strided_slice %322 {offsets = [0, 32], sizes = [2, 16], strides = [1, 1]} : vector<2x64xf32> to vector<2x16xf32>
    %336 = math.tanh %335 : vector<2x16xf32>
    %337 = vector.extract_strided_slice %322 {offsets = [0, 48], sizes = [2, 16], strides = [1, 1]} : vector<2x64xf32> to vector<2x16xf32>
    %338 = arith.negf %337 : vector<2x16xf32>
    %339 = math.exp %338 : vector<2x16xf32>
    %cst_86 = arith.constant 1.000000e+00 : f32
    %340 = vector.broadcast %cst_86 : f32 to vector<2x16xf32>
    %341 = arith.addf %340, %339 : vector<2x16xf32>
    %342 = arith.divf %340, %341 : vector<2x16xf32>
    %343 = arith.mulf %334, %304 : vector<2x16xf32>
    %344 = arith.mulf %328, %336 : vector<2x16xf32>
    %345 = arith.addf %343, %344 : vector<2x16xf32>
    %346 = math.tanh %345 : vector<2x16xf32>
    %347 = arith.mulf %342, %346 : vector<2x16xf32>
    %348 = vector.broadcast %316 : i32 to vector<2x1xi32>
    %349 = arith.cmpi slt, %348, %3 : vector<2x1xi32>
    %350 = vector.shape_cast %349 : vector<2x1xi1> to vector<2x1xi1>
    %351 = vector.broadcast %350 : vector<2x1xi1> to vector<2x16xi1>
    %352 = arith.select %351, %347, %301 : vector<2x16xi1>, vector<2x16xf32>
    %353 = vector.shape_cast %349 : vector<2x1xi1> to vector<2x1xi1>
    %354 = vector.broadcast %353 : vector<2x1xi1> to vector<2x16xi1>
    %355 = arith.select %354, %345, %304 : vector<2x16xi1>, vector<2x16xf32>
    %cst_87 = arith.constant 0.000000e+00 : f32
    %356 = vector.broadcast %cst_87 : f32 to vector<2x16xf32>
    %357 = vector.shape_cast %349 : vector<2x1xi1> to vector<2x1xi1>
    %358 = vector.broadcast %357 : vector<2x1xi1> to vector<2x16xi1>
    %359 = arith.select %358, %347, %356 : vector<2x16xi1>, vector<2x16xf32>
    %360 = arith.index_cast %313 : i32 to index
    %c0_88 = arith.constant 0 : index
    %c0_89 = arith.constant 0 : index
    %361 = vector.load %arg4[%360, %c0_88, %c0_89] : memref<8x2x16xf32, #tpu.memory_space<vmem>>, vector<1x2x16xf32>
    %362 = vector.shape_cast %361 : vector<1x2x16xf32> to vector<2x16xf32>
    %363 = vector.shape_cast %359 : vector<2x16xf32> to vector<1x2x16xf32>
    tpu.vector_store %arg4[%360, %c0_88, %c0_89], %363 {strides = array<i32>} : memref<8x2x16xf32, #tpu.memory_space<vmem>>, vector<1x2x16xf32>,
    %c7_i32_90 = arith.constant 7 : i32
    %c7_i32_91 = arith.constant 7 : i32
    %364 = arith.subi %c7_i32_91, %c7_i32_90 : i32
    %c8_i32_92 = arith.constant 8 : i32
    %365 = arith.muli %arg0, %c8_i32_92 : i32
    %366 = arith.addi %365, %c7_i32_90 : i32
    %c7_i32_93 = arith.constant 7 : i32
    %367 = arith.subi %c7_i32_93, %366 : i32
    %368 = arith.index_cast %364 : i32 to index
    %c0_94 = arith.constant 0 : index
    %c0_95 = arith.constant 0 : index
    %369 = vector.load %arg2[%368, %c0_94, %c0_95] : memref<8x2x64xf32, #tpu.memory_space<vmem>>, vector<1x2x64xf32>
    %370 = vector.shape_cast %369 : vector<1x2x64xf32> to vector<2x64xf32>
    %371 = arith.truncf %352 : vector<2x16xf32> to vector<2x16xbf16>
    %cst_96 = arith.constant dense<0.000000e+00> : vector<2x64xf32>
    %372 = tpu.matmul %371, %4, %cst_96 {dimension_numbers = #tpu.dot_dimension_numbers<[1], [0], [0], [1], [0, 0, 1, 1], [], []>} : vector<2x16xbf16>, vector<16x64xbf16>, vector<2x64xf32> -> vector<2x64xf32>
    %373 = arith.addf %370, %372 : vector<2x64xf32>
    %374 = vector.extract_strided_slice %373 {offsets = [0, 0], sizes = [2, 16], strides = [1, 1]} : vector<2x64xf32> to vector<2x16xf32>
    %375 = arith.negf %374 : vector<2x16xf32>
    %376 = math.exp %375 : vector<2x16xf32>
    %cst_97 = arith.constant 1.000000e+00 : f32
    %377 = vector.broadcast %cst_97 : f32 to vector<2x16xf32>
    %378 = arith.addf %377, %376 : vector<2x16xf32>
    %379 = arith.divf %377, %378 : vector<2x16xf32>
    %380 = vector.extract_strided_slice %373 {offsets = [0, 16], sizes = [2, 16], strides = [1, 1]} : vector<2x64xf32> to vector<2x16xf32>
    %381 = arith.negf %380 : vector<2x16xf32>
    %382 = math.exp %381 : vector<2x16xf32>
    %cst_98 = arith.constant 1.000000e+00 : f32
    %383 = vector.broadcast %cst_98 : f32 to vector<2x16xf32>
    %384 = arith.addf %383, %382 : vector<2x16xf32>
    %385 = arith.divf %383, %384 : vector<2x16xf32>
    %386 = vector.extract_strided_slice %373 {offsets = [0, 32], sizes = [2, 16], strides = [1, 1]} : vector<2x64xf32> to vector<2x16xf32>
    %387 = math.tanh %386 : vector<2x16xf32>
    %388 = vector.extract_strided_slice %373 {offsets = [0, 48], sizes = [2, 16], strides = [1, 1]} : vector<2x64xf32> to vector<2x16xf32>
    %389 = arith.negf %388 : vector<2x16xf32>
    %390 = math.exp %389 : vector<2x16xf32>
    %cst_99 = arith.constant 1.000000e+00 : f32
    %391 = vector.broadcast %cst_99 : f32 to vector<2x16xf32>
    %392 = arith.addf %391, %390 : vector<2x16xf32>
    %393 = arith.divf %391, %392 : vector<2x16xf32>
    %394 = arith.mulf %385, %355 : vector<2x16xf32>
    %395 = arith.mulf %379, %387 : vector<2x16xf32>
    %396 = arith.addf %394, %395 : vector<2x16xf32>
    %397 = math.tanh %396 : vector<2x16xf32>
    %398 = arith.mulf %393, %397 : vector<2x16xf32>
    %399 = vector.broadcast %367 : i32 to vector<2x1xi32>
    %400 = arith.cmpi slt, %399, %3 : vector<2x1xi32>
    %401 = vector.shape_cast %400 : vector<2x1xi1> to vector<2x1xi1>
    %402 = vector.broadcast %401 : vector<2x1xi1> to vector<2x16xi1>
    %403 = arith.select %402, %398, %352 : vector<2x16xi1>, vector<2x16xf32>
    %404 = vector.shape_cast %400 : vector<2x1xi1> to vector<2x1xi1>
    %405 = vector.broadcast %404 : vector<2x1xi1> to vector<2x16xi1>
    %406 = arith.select %405, %396, %355 : vector<2x16xi1>, vector<2x16xf32>
    %cst_100 = arith.constant 0.000000e+00 : f32
    %407 = vector.broadcast %cst_100 : f32 to vector<2x16xf32>
    %408 = vector.shape_cast %400 : vector<2x1xi1> to vector<2x1xi1>
    %409 = vector.broadcast %408 : vector<2x1xi1> to vector<2x16xi1>
    %410 = arith.select %409, %398, %407 : vector<2x16xi1>, vector<2x16xf32>
    %411 = arith.index_cast %364 : i32 to index
    %c0_101 = arith.constant 0 : index
    %c0_102 = arith.constant 0 : index
    %412 = vector.load %arg4[%411, %c0_101, %c0_102] : memref<8x2x16xf32, #tpu.memory_space<vmem>>, vector<1x2x16xf32>
    %413 = vector.shape_cast %412 : vector<1x2x16xf32> to vector<2x16xf32>
    %414 = vector.shape_cast %410 : vector<2x16xf32> to vector<1x2x16xf32>
    tpu.vector_store %arg4[%411, %c0_101, %c0_102], %414 {strides = array<i32>} : memref<8x2x16xf32, #tpu.memory_space<vmem>>, vector<1x2x16xf32>,
    %c8_i32_103 = arith.constant 8 : i32
    %c0_104 = arith.constant 0 : index
    %c0_105 = arith.constant 0 : index
    %415 = vector.load %arg5[%c0_104, %c0_105] : memref<2x16xf32, #tpu.memory_space<vmem>>, vector<2x16xf32>
    tpu.vector_store %arg5[%c0_104, %c0_105], %403 {strides = array<i32>} : memref<2x16xf32, #tpu.memory_space<vmem>>, vector<2x16xf32>,
    %c0_106 = arith.constant 0 : index
    %c0_107 = arith.constant 0 : index
    %416 = vector.load %arg6[%c0_106, %c0_107] : memref<2x16xf32, #tpu.memory_space<vmem>>, vector<2x16xf32>
    tpu.vector_store %arg6[%c0_106, %c0_107], %406 {strides = array<i32>} : memref<2x16xf32, #tpu.memory_space<vmem>>, vector<2x16xf32>,
    return
  }
  func.func @transform_0(%arg0: i32) -> (i32, i32) {
    %c0_i32 = arith.constant 0 : i32
    %c0_i32_0 = arith.constant 0 : i32
    %c0_i32_1 = arith.constant 0 : i32
    return %c0_i32, %c0_i32_0 : i32, i32
  }
  func.func @transform_1(%arg0: i32) -> (i32, i32, i32) {
    %c0_i32 = arith.constant 0 : i32
    %0 = arith.subi %c0_i32, %arg0 : i32
    %c0_i32_0 = arith.constant 0 : i32
    %c0_i32_1 = arith.constant 0 : i32
    %c0_i32_2 = arith.constant 0 : i32
    return %0, %c0_i32_0, %c0_i32_1 : i32, i32, i32
  }
  func.func @transform_2(%arg0: i32) -> (i32, i32) {
    %c0_i32 = arith.constant 0 : i32
    %c0_i32_0 = arith.constant 0 : i32
    %c0_i32_1 = arith.constant 0 : i32
    return %c0_i32, %c0_i32_0 : i32, i32
  }
  func.func @transform_3(%arg0: i32) -> (i32, i32, i32) {
    %c0_i32 = arith.constant 0 : i32
    %0 = arith.subi %c0_i32, %arg0 : i32
    %c0_i32_0 = arith.constant 0 : i32
    %c0_i32_1 = arith.constant 0 : i32
    %c0_i32_2 = arith.constant 0 : i32
    return %0, %c0_i32_0, %c0_i32_1 : i32, i32, i32
  }
}

module attributes {stable_mosaic.version = 11 : i64} {
  func.func @_linear_bias_kernel(%arg0: i32, %arg1: memref<128x32xbf16, #tpu.memory_space<vmem>>, %arg2: memref<32x128xbf16, #tpu.memory_space<vmem>>, %arg3: memref<1x128xf32, #tpu.memory_space<vmem>>, %arg4: memref<128x128xf32, #tpu.memory_space<vmem>>) attributes {dimension_semantics = [#tpu.dimension_semantics<parallel>], iteration_bounds = array<i64: 1>, scalar_prefetch = 0 : i64, scratch_operands = 0 : i64, tpu.core_type = #tpu.core_type<tc>, window_params = [{transform_indices = @transform_0, window_bounds = array<i64: 128, 32>}, {pipeline_mode = #tpu.pipeline_mode<synchronous>, transform_indices = @transform_1, window_bounds = array<i64: 32, 128>}, {pipeline_mode = #tpu.pipeline_mode<synchronous>, transform_indices = @transform_2, window_bounds = array<i64: 1, 128>}, {transform_indices = @transform_3, window_bounds = array<i64: 128, 128>}]} {
    %c0 = arith.constant 0 : index
    %c0_0 = arith.constant 0 : index
    %0 = vector.load %arg1[%c0, %c0_0] : memref<128x32xbf16, #tpu.memory_space<vmem>>, vector<128x32xbf16>
    %c0_1 = arith.constant 0 : index
    %c0_2 = arith.constant 0 : index
    %1 = vector.load %arg2[%c0_1, %c0_2] : memref<32x128xbf16, #tpu.memory_space<vmem>>, vector<32x128xbf16>
    %cst = arith.constant dense<0.000000e+00> : vector<128x128xf32>
    %2 = tpu.matmul %0, %1, %cst {dimension_numbers = #tpu.dot_dimension_numbers<[1], [0], [0], [1], [0, 0, 1, 1], [], []>} : vector<128x32xbf16>, vector<32x128xbf16>, vector<128x128xf32> -> vector<128x128xf32>
    %c0_3 = arith.constant 0 : index
    %c0_4 = arith.constant 0 : index
    %3 = vector.load %arg3[%c0_3, %c0_4] : memref<1x128xf32, #tpu.memory_space<vmem>>, vector<1x128xf32>
    %4 = vector.broadcast %3 : vector<1x128xf32> to vector<128x128xf32>
    %5 = arith.addf %2, %4 : vector<128x128xf32>
    %c0_5 = arith.constant 0 : index
    %c0_6 = arith.constant 0 : index
    %6 = vector.load %arg4[%c0_5, %c0_6] : memref<128x128xf32, #tpu.memory_space<vmem>>, vector<128x128xf32>
    tpu.vector_store %arg4[%c0_5, %c0_6], %5 {strides = array<i32>} : memref<128x128xf32, #tpu.memory_space<vmem>>, vector<128x128xf32>,
    return
  }
  func.func @transform_0(%arg0: i32) -> (i32, i32) {
    %c0_i32 = arith.constant 0 : i32
    %c0_i32_0 = arith.constant 0 : i32
    return %arg0, %c0_i32 : i32, i32
  }
  func.func @transform_1(%arg0: i32) -> (i32, i32) {
    %c0_i32 = arith.constant 0 : i32
    %c0_i32_0 = arith.constant 0 : i32
    %c0_i32_1 = arith.constant 0 : i32
    return %c0_i32, %c0_i32_0 : i32, i32
  }
  func.func @transform_2(%arg0: i32) -> (i32, i32) {
    %c0_i32 = arith.constant 0 : i32
    %c0_i32_0 = arith.constant 0 : i32
    %c0_i32_1 = arith.constant 0 : i32
    return %c0_i32, %c0_i32_0 : i32, i32
  }
  func.func @transform_3(%arg0: i32) -> (i32, i32) {
    %c0_i32 = arith.constant 0 : i32
    %c0_i32_0 = arith.constant 0 : i32
    return %arg0, %c0_i32 : i32, i32
  }
}

module attributes {stable_mosaic.version = 11 : i64} {
  func.func @_linear_bias_kernel(%arg0: i32, %arg1: memref<128x32xbf16, #tpu.memory_space<vmem>>, %arg2: memref<32x20xbf16, #tpu.memory_space<vmem>>, %arg3: memref<1x20xf32, #tpu.memory_space<vmem>>, %arg4: memref<128x20xf32, #tpu.memory_space<vmem>>) attributes {dimension_semantics = [#tpu.dimension_semantics<parallel>], iteration_bounds = array<i64: 1>, scalar_prefetch = 0 : i64, scratch_operands = 0 : i64, tpu.core_type = #tpu.core_type<tc>, window_params = [{transform_indices = @transform_0, window_bounds = array<i64: 128, 32>}, {pipeline_mode = #tpu.pipeline_mode<synchronous>, transform_indices = @transform_1, window_bounds = array<i64: 32, 20>}, {pipeline_mode = #tpu.pipeline_mode<synchronous>, transform_indices = @transform_2, window_bounds = array<i64: 1, 20>}, {transform_indices = @transform_3, window_bounds = array<i64: 128, 20>}]} {
    %c0 = arith.constant 0 : index
    %c0_0 = arith.constant 0 : index
    %0 = vector.load %arg1[%c0, %c0_0] : memref<128x32xbf16, #tpu.memory_space<vmem>>, vector<128x32xbf16>
    %c0_1 = arith.constant 0 : index
    %c0_2 = arith.constant 0 : index
    %1 = vector.load %arg2[%c0_1, %c0_2] : memref<32x20xbf16, #tpu.memory_space<vmem>>, vector<32x20xbf16>
    %cst = arith.constant dense<0.000000e+00> : vector<128x20xf32>
    %2 = tpu.matmul %0, %1, %cst {dimension_numbers = #tpu.dot_dimension_numbers<[1], [0], [0], [1], [0, 0, 1, 1], [], []>} : vector<128x32xbf16>, vector<32x20xbf16>, vector<128x20xf32> -> vector<128x20xf32>
    %c0_3 = arith.constant 0 : index
    %c0_4 = arith.constant 0 : index
    %3 = vector.load %arg3[%c0_3, %c0_4] : memref<1x20xf32, #tpu.memory_space<vmem>>, vector<1x20xf32>
    %4 = vector.broadcast %3 : vector<1x20xf32> to vector<128x20xf32>
    %5 = arith.addf %2, %4 : vector<128x20xf32>
    %c0_5 = arith.constant 0 : index
    %c0_6 = arith.constant 0 : index
    %6 = vector.load %arg4[%c0_5, %c0_6] : memref<128x20xf32, #tpu.memory_space<vmem>>, vector<128x20xf32>
    tpu.vector_store %arg4[%c0_5, %c0_6], %5 {strides = array<i32>} : memref<128x20xf32, #tpu.memory_space<vmem>>, vector<128x20xf32>,
    return
  }
  func.func @transform_0(%arg0: i32) -> (i32, i32) {
    %c0_i32 = arith.constant 0 : i32
    %c0_i32_0 = arith.constant 0 : i32
    return %arg0, %c0_i32 : i32, i32
  }
  func.func @transform_1(%arg0: i32) -> (i32, i32) {
    %c0_i32 = arith.constant 0 : i32
    %c0_i32_0 = arith.constant 0 : i32
    %c0_i32_1 = arith.constant 0 : i32
    return %c0_i32, %c0_i32_0 : i32, i32
  }
  func.func @transform_2(%arg0: i32) -> (i32, i32) {
    %c0_i32 = arith.constant 0 : i32
    %c0_i32_0 = arith.constant 0 : i32
    %c0_i32_1 = arith.constant 0 : i32
    return %c0_i32, %c0_i32_0 : i32, i32
  }
  func.func @transform_3(%arg0: i32) -> (i32, i32) {
    %c0_i32 = arith.constant 0 : i32
    %c0_i32_0 = arith.constant 0 : i32
    return %arg0, %c0_i32 : i32, i32
  }
}

</mosaic_0001>

<bundles_post_ra>
// kernel: char_lstm_crf_forward.7
= control target key start
LH: loop header
LB: loop body
LE: loop exit
PB: predicated region body
PF: predicated region fallthrough
CT: control target
= control target key end

     0   :  { %vm766_vm0 = vcmask 261120   ;;  %s2145_s1 = inlined_call_operand.vmem [shape: bf16[800,128], index: 1, kind: input, shape index: {}]   ;;  %s2146_s0 = inlined_call_operand.vmem [shape: bf16[128,800], index: 0, kind: input, shape index: {}]   ;;  %s2147_s2 = inlined_call_operand.vmem [shape: f32[1,128], index: 2, kind: input, shape index: {}]   ;;  %s2148_s3 = inlined_call_operand.vmem [shape: f32[128,128], index: 3, kind: output, shape index: {}]  }
   0x1   :  { %v1552_v0 = vld [vmem:[%s2145_s1 + $0x40] sm:$0xff]   ;;  %v1556_v4 = vld [vmem:[%s2145_s1 + $0x48] sm:$0xff]   ;;  %v1560_v8 = vld [vmem:[%s2145_s1 + $0x50] sm:$0xff]  }
   0x2   :  { %v1553_v1 = vld [vmem:[%s2145_s1 + $0xc0] sm:$0xff]   ;;  %1314 = vmatprep.subr.bf16.mxu0 %v1552_v0  ;;  %v1557_v5 = vld [vmem:[%s2145_s1 + $0xc8] sm:$0xff]   ;;  %v1561_v9 = vld [vmem:[%s2145_s1 + $0xd0] sm:$0xff]  }
   0x3   :  { %v1554_v2 = vld [vmem:[%s2145_s1] sm:$0xff]   ;;  %1378 = vmatprep.subr.bf16.mxu1 %v1553_v1  ;;  %v1558_v6 = vld [vmem:[%s2145_s1 + $0x8] sm:$0xff]   ;;  %v1562_v10 = vld [vmem:[%s2145_s1 + $0x10] sm:$0xff]  }
   0x4   :  { %v1555_v3 = vld [vmem:[%s2145_s1 + $0x80] sm:$0xff]   ;;  %1315 = vmatpush3.bf16.msra.mxu0 %v1554_v2  ;;  %v1559_v7 = vld [vmem:[%s2145_s1 + $0x88] sm:$0xff]   ;;  %v1563_v11 = vld [vmem:[%s2145_s1 + $0x90] sm:$0xff]  }
   0x5   :  { %1379 = vmatpush3.bf16.msra.mxu1 %v1555_v3  ;;  %1316 = vmatprep.subr.bf16.mxu0 %v1556_v4  ;;  %v1564_v12 = vld [vmem:[%s2145_s1 + $0x58] sm:$0xff]   ;;  %v1568_v16 = vld [vmem:[%s2145_s1 + $0x60] sm:$0xff]   ;;  %v1572_v20 = vld [vmem:[%s2145_s1 + $0x68] sm:$0xff]  }
   0x6   :  { %1380 = vmatprep.subr.bf16.mxu1 %v1557_v5  ;;  %v1565_v13 = vld [vmem:[%s2145_s1 + $0xd8] sm:$0xff]   ;;  %v1569_v17 = vld [vmem:[%s2145_s1 + $0xe0] sm:$0xff]   ;;  %v1573_v21 = vld [vmem:[%s2145_s1 + $0xe8] sm:$0xff]  }
   0x7   :  { %v1566_v14 = vld [vmem:[%s2145_s1 + $0x18] sm:$0xff]   ;;  %v1570_v18 = vld [vmem:[%s2145_s1 + $0x20] sm:$0xff]   ;;  %v1574_v22 = vld [vmem:[%s2145_s1 + $0x28] sm:$0xff]  }
   0x8   :  { %1317 = vmatpush3.bf16.msra.mxu0 %v1558_v6  ;;  %v1567_v15 = vld [vmem:[%s2145_s1 + $0x98] sm:$0xff]   ;;  %v1571_v19 = vld [vmem:[%s2145_s1 + $0xa0] sm:$0xff]   ;;  %v1575_v23 = vld [vmem:[%s2145_s1 + $0xa8] sm:$0xff]  }
   0x9   :  { %1381 = vmatpush3.bf16.msra.mxu1 %v1559_v7  ;;  %1318 = vmatprep.subr.bf16.mxu0 %v1560_v8  ;;  %v1576_v24 = vld [vmem:[%s2145_s1 + $0x70] sm:$0xff]   ;;  %v1580_v28 = vld [vmem:[%s2145_s1 + $0x78] sm:$0xff]   ;;  %v1586_v33 = vld [vmem:[%s2146_s0 + $0x4] ss:$28 sps:$4 sm:$0xff]  }
   0xa   :  { %1382 = vmatprep.subr.bf16.mxu1 %v1561_v9  ;;  %v1577_v25 = vld [vmem:[%s2145_s1 + $0xf0] sm:$0xff]   ;;  %v1581_v29 = vld [vmem:[%s2145_s1 + $0xf8] sm:$0xff]   ;;  %v1587_v34 = vld [vmem:[%s2146_s0 + $0x8] ss:$28 sps:$4 sm:$0xff]   ;;  %823 = vmatprep.mubr.bf16.mxu0 %v1586_v33 }
   0xb   :  { %v1578_v26 = vld [vmem:[%s2145_s1 + $0x30] sm:$0xff]   ;;  %v1582_v30 = vld [vmem:[%s2145_s1 + $0x38] sm:$0xff]   ;;  %v1589_v35 = vld [vmem:[%s2146_s0 + $0xc] ss:$28 sps:$4 sm:$0xff]  }
   0xc   :  { %1319 = vmatpush3.bf16.msra.mxu0 %v1562_v10  ;;  %v1579_v27 = vld [vmem:[%s2145_s1 + $0xb0] sm:$0xff]   ;;  %v1583_v31 = vld [vmem:[%s2145_s1 + $0xb8] sm:$0xff]   ;;  %v1590_v36 = vld [vmem:[%s2145_s1 + $0x140] sm:$0xff]   ;;  %920 = vmatprep.mubr.bf16.mxu1 %v1589_v35 }
   0xd   :  { %1383 = vmatpush3.bf16.msra.mxu1 %v1563_v11  ;;  %1320 = vmatprep.subr.bf16.mxu0 %v1564_v12  ;;  %v1584_v32 = vld [vmem:[%s2146_s0] ss:$28 sps:$4 sm:$0xff]   ;;  %v1596_v40 = vld [vmem:[%s2146_s0 + $0x38] ss:$28 sps:$4 sm:$0xff]   ;;  %v1598_v42 = vld [vmem:[%s2145_s1 + $0x148] sm:$0xff]  }
   0xe   :  { %1384 = vmatprep.subr.bf16.mxu1 %v1565_v13  ;;  %v1591_v37 = vld [vmem:[%s2145_s1 + $0x100] sm:$0xff]   ;;  %v1592_v38 = vld [vmem:[%s2146_s0 + $0x3c] ss:$28 sps:$4 sm:$0xff]   ;;  %v1599_v43 = vld [vmem:[%s2145_s1 + $0x108] sm:$0xff]  }
   0xf   :  { %v1594_v39 = vld [vmem:[%s2146_s0 + $0x44] ss:$28 sps:$4 sm:$0xff]   ;;  %v1600_v44 = vld [vmem:[%s2146_s0 + $0x74] ss:$28 sps:$4 sm:$0xff]   ;;  %v1602_v45 = vld [vmem:[%s2146_s0 + $0x7c] ss:$28 sps:$4 sm:$0xff]  }
  0x10   :  { %1321 = vmatpush3.bf16.msra.mxu0 %v1566_v14  ;;  %v1597_v41 = vld [vmem:[%s2146_s0 + $0x40] ss:$28 sps:$4 sm:$0xff]   ;;  %v1606_v46 = vld [vmem:[%s2145_s1 + $0x150] sm:$0xff]   ;;  %v1608_v50 = vld [vmem:[%s2146_s0 + $0xac] ss:$28 sps:$4 sm:$0xff]  }
  0x11   :  { %1385 = vmatpush3.bf16.msra.mxu1 %v1567_v15  ;;  %1322 = vmatprep.subr.bf16.mxu0 %v1568_v16  ;;  %v1607_v47 = vld [vmem:[%s2145_s1 + $0x110] sm:$0xff]   ;;  %v1614_v52 = vld [vmem:[%s2145_s1 + $0x158] sm:$0xff]   ;;  %v1622_v54 = vld [vmem:[%s2145_s1 + $0x160] sm:$0xff]  }
  0x12   :  { %1386 = vmatprep.subr.bf16.mxu1 %v1569_v17  ;;  %v1604_v48 = vld [vmem:[%s2146_s0 + $0x70] ss:$28 sps:$4 sm:$0xff]   ;;  %v1605_v49 = vld [vmem:[%s2146_s0 + $0x78] ss:$28 sps:$4 sm:$0xff]   ;;  %v1623_v55 = vld [vmem:[%s2145_s1 + $0x120] sm:$0xff]  }
  0x13   :  { %v1610_v51 = vld [vmem:[%s2146_s0 + $0xb4] ss:$28 sps:$4 sm:$0xff]   ;;  %v1615_v53 = vld [vmem:[%s2145_s1 + $0x118] sm:$0xff]   ;;  %v1612_v56 = vld [vmem:[%s2146_s0 + $0xa8] ss:$28 sps:$4 sm:$0xff]  }
  0x14   :  { %1323 = vmatpush3.bf16.msra.mxu0 %v1570_v18  ;;  %v1613_v57 = vld [vmem:[%s2146_s0 + $0xb0] ss:$28 sps:$4 sm:$0xff]   ;;  %v1616_v58 = vld [vmem:[%s2146_s0 + $0xe4] ss:$28 sps:$4 sm:$0xff]   ;;  %v1624_v2 = vld [vmem:[%s2146_s0 + $0x11c] ss:$28 sps:$4 sm:$0xff]  }
  0x15   :  { %1387 = vmatpush3.bf16.msra.mxu1 %v1571_v19  ;;  %1324 = vmatprep.subr.bf16.mxu0 %v1572_v20  ;;  %v1618_v59 = vld [vmem:[%s2146_s0 + $0xec] ss:$28 sps:$4 sm:$0xff]   ;;  %v1620_v62 = vld [vmem:[%s2146_s0 + $0xe0] ss:$28 sps:$4 sm:$0xff]   ;;  %v1638_v0 = vld [vmem:[%s2145_s1 + $0x170] sm:$0xff]  }
  0x16   :  { %1388 = vmatprep.subr.bf16.mxu1 %v1573_v21  ;;  %v1630_v60 = vld [vmem:[%s2145_s1 + $0x168] sm:$0xff]   ;;  %v1639_v1 = vld [vmem:[%s2145_s1 + $0x130] sm:$0xff]   ;;  %v1626_v3 = vld [vmem:[%s2146_s0 + $0x124] ss:$28 sps:$4 sm:$0xff]  }
  0x17   :  { %v1631_v61 = vld [vmem:[%s2145_s1 + $0x128] sm:$0xff]   ;;  %v1646_v4 = vld [vmem:[%s2145_s1 + $0x178] sm:$0xff]   ;;  %v1654_v8 = vld [vmem:[%s2145_s1 + $0x180] sm:$0xff]  }
  0x18   :  { %1325 = vmatpush3.bf16.msra.mxu0 %v1574_v22  ;;  %v1621_v63 = vld [vmem:[%s2146_s0 + $0xe8] ss:$28 sps:$4 sm:$0xff]   ;;  %v1647_v5 = vld [vmem:[%s2145_s1 + $0x138] sm:$0xff]   ;;  %v1632_v9 = vld [vmem:[%s2146_s0 + $0x154] ss:$28 sps:$4 sm:$0xff]  }
  0x19   :  { %1389 = vmatpush3.bf16.msra.mxu1 %v1575_v23  ;;  %1326 = vmatprep.subr.bf16.mxu0 %v1576_v24  ;;  %v1628_v6 = vld [vmem:[%s2146_s0 + $0x118] ss:$28 sps:$4 sm:$0xff]   ;;  %v1629_v7 = vld [vmem:[%s2146_s0 + $0x120] ss:$28 sps:$4 sm:$0xff]   ;;  %v1636_v11 = vld [vmem:[%s2146_s0 + $0x150] ss:$28 sps:$4 sm:$0xff]  }
  0x1a   :  { %1390 = vmatprep.subr.bf16.mxu1 %v1577_v25  ;;  %v1634_v10 = vld [vmem:[%s2146_s0 + $0x15c] ss:$28 sps:$4 sm:$0xff]   ;;  %v1640_v13 = vld [vmem:[%s2146_s0 + $0x18c] ss:$28 sps:$4 sm:$0xff]   ;;  %v1642_v14 = vld [vmem:[%s2146_s0 + $0x194] ss:$28 sps:$4 sm:$0xff]  }
  0x1b   :  { %v1637_v12 = vld [vmem:[%s2146_s0 + $0x158] ss:$28 sps:$4 sm:$0xff]   ;;  %v1644_v15 = vld [vmem:[%s2146_s0 + $0x188] ss:$28 sps:$4 sm:$0xff]   ;;  %v1645_v16 = vld [vmem:[%s2146_s0 + $0x190] ss:$28 sps:$4 sm:$0xff]  }
  0x1c   :  { %1327 = vmatpush3.bf16.msra.mxu0 %v1578_v26  ;;  %v1650_v17 = vld [vmem:[%s2146_s0 + $0x14] ss:$28 sps:$4 sm:$0xff]   ;;  %v1653_v18 = vld [vmem:[%s2146_s0 + $0x164] ss:$28 sps:$4 sm:$0xff]   ;;  %v1655_v21 = vld [vmem:[%s2146_s0 + $0x4c] ss:$28 sps:$4 sm:$0xff]  }
  0x1d   :  { %1391 = vmatpush3.bf16.msra.mxu1 %v1579_v27  ;;  %1328 = vmatprep.subr.bf16.mxu0 %v1580_v28  ;;  %v1648_v19 = vld [vmem:[%s2146_s0 + $0x10] ss:$28 sps:$4 sm:$0xff]   ;;  %v1651_v20 = vld [vmem:[%s2146_s0 + $0x160] ss:$28 sps:$4 sm:$0xff]   ;;  %v1659_v24 = vld [vmem:[%s2146_s0 + $0x48] ss:$28 sps:$4 sm:$0xff]  }
  0x1e   :  { %1392 = vmatprep.subr.bf16.mxu1 %v1581_v29  ;;  %v1657_v22 = vld [vmem:[%s2146_s0 + $0x19c] ss:$28 sps:$4 sm:$0xff]   ;;  %v1661_v23 = vld [vmem:[%s2145_s1 + $0x188] sm:$0xff]   ;;  %v1662_v26 = vld [vmem:[%s2146_s0 + $0x84] ss:$28 sps:$4 sm:$0xff]  }
  0x1f   :  { %v1660_v25 = vld [vmem:[%s2146_s0 + $0x198] ss:$28 sps:$4 sm:$0xff]   ;;  %v1665_v28 = vld [vmem:[%s2146_s0 + $0x80] ss:$28 sps:$4 sm:$0xff]   ;;  %v1666_v29 = vld [vmem:[%s2146_s0 + $0x50] ss:$28 sps:$4 sm:$0xff]  }
  0x20   :  { %1329 = vmatpush3.bf16.msra.mxu0 %v1582_v30  ;;  %v1664_v27 = vld [vmem:[%s2146_s0 + $0x18] ss:$28 sps:$4 sm:$0xff]   ;;  %v1671_v33 = vld [vmem:[%s2146_s0 + $0xc0] ss:$28 sps:$4 sm:$0xff]  }
  0x21   :  { %1393 = vmatpush3.bf16.msra.mxu1 %v1583_v31  ;;  %1442 = vmatprep.subr.bf16.mxu0 %v1590_v36  ;;  %v1667_v30 = vld [vmem:[%s2146_s0 + $0xbc] ss:$28 sps:$4 sm:$0xff]   ;;  %v1669_v31 = vld [vmem:[%s2146_s0 + $0x88] ss:$28 sps:$4 sm:$0xff]  }
  0x22   :  { %1536 = vmatprep.subr.bf16.mxu1 %v1590_v36  ;;  %v1674_v35 = vld [vmem:[%s2146_s0 + $0xf8] ss:$28 sps:$4 sm:$0xff]   ;;  %v1675_v36 = vld [vmem:[%s2146_s0 + $0xf0] ss:$28 sps:$4 sm:$0xff]  }
  0x23   :  { %824 = vmatmul.mubr.bf16.vlgmr.msra.gmra.mrb[0].mxu0 %v1584_v32  ;;  %v1670_v32 = vld [vmem:[%s2146_s0 + $0xb8] ss:$28 sps:$4 sm:$0xff]  }
  0x24   :  { %921 = vmatmul.mubr.bf16.vlgmr.msra.gmra.mrb[0].mxu1 %v1587_v34  ;;  %1443 = vmatpush3.bf16.msra.mxu0 %v1591_v37  ;;  %v1672_v34 = vld [vmem:[%s2146_s0 + $0xf4] ss:$28 sps:$4 sm:$0xff]  }
  0x25   :  { %1544 = vmatpush3.bf16.msra.mxu1 %v1591_v37  ;;  %831 = vmatprep.mubr.bf16.mxu0 %v1592_v38  ;;  %v1676_v37 = vld [vmem:[%s2146_s0 + $0x130] ss:$28 sps:$4 sm:$0xff]  }
  0x26   :  { %928 = vmatprep.mubr.bf16.mxu1 %v1594_v39  ;;  %1444 = vmatprep.subr.bf16.mxu0 %v1598_v42  ;;  %v1677_v38 = vld [vmem:[%s2146_s0 + $0x12c] ss:$28 sps:$4 sm:$0xff]  }
  0x27   :  { %1537 = vmatprep.subr.bf16.mxu1 %v1598_v42  ;;  %v1679_v39 = vld [vmem:[%s2146_s0 + $0x168] ss:$28 sps:$4 sm:$0xff]  }
  0x28   :  { %1445 = vmatpush3.bf16.msra.mxu0 %v1599_v43 }
  0x29   :  { %1545 = vmatpush3.bf16.msra.mxu1 %v1599_v43  ;;  %1446 = vmatprep.subr.bf16.mxu0 %v1606_v46  ;;  %v2031_v43 = vld [vmem:[%s2147_s2] ss:$0 sm:$0xff] }
  0x2a   :  { %1538 = vmatprep.subr.bf16.mxu1 %v1606_v46 }
  0x2b   :  { %832 = vmatmul.mubr.bf16.gmra.mrb[4].mxu0 %v1596_v40  ;;  %v1680_v40 = vld [vmem:[%s2146_s0 + $0x128] ss:$28 sps:$4 sm:$0xff]  }
  0x2c   :  { %929 = vmatmul.mubr.bf16.gmra.mrb[4].mxu1 %v1597_v41  ;;  %839 = vmatprep.mubr.bf16.mxu0 %v1600_v44  ;;  %v1681_v41 = vld [vmem:[%s2146_s0 + $0x1a0] ss:$28 sps:$4 sm:$0xff]  }
  0x2d   :  { %936 = vmatprep.mubr.bf16.mxu1 %v1602_v45  ;;  %1447 = vmatpush3.bf16.msra.mxu0 %v1607_v47 }
  0x2e   :  { %1546 = vmatpush3.bf16.msra.mxu1 %v1607_v47  ;;  %1448 = vmatprep.subr.bf16.mxu0 %v1614_v52 }
  0x2f   :  { %1539 = vmatprep.subr.bf16.mxu1 %v1614_v52 }
  0x31   :  { %1449 = vmatpush3.bf16.msra.mxu0 %v1615_v53 }
  0x32   :  { %1547 = vmatpush3.bf16.msra.mxu1 %v1615_v53  ;;  %1450 = vmatprep.subr.bf16.mxu0 %v1622_v54 }
  0x33   :  { %840 = vmatmul.mubr.bf16.gmra.mrb[8].mxu0 %v1604_v48  ;;  %1540 = vmatprep.subr.bf16.mxu1 %v1622_v54 }
  0x34   :  { %937 = vmatmul.mubr.bf16.gmra.mrb[8].mxu1 %v1605_v49  ;;  %847 = vmatprep.mubr.bf16.mxu0 %v1608_v50 }
  0x35   :  { %944 = vmatprep.mubr.bf16.mxu1 %v1610_v51  ;;  %1451 = vmatpush3.bf16.msra.mxu0 %v1623_v55 }
  0x36   :  { %1548 = vmatpush3.bf16.msra.mxu1 %v1623_v55  ;;  %1452 = vmatprep.subr.bf16.mxu0 %v1630_v60 }
  0x37   :  { %1541 = vmatprep.subr.bf16.mxu1 %v1630_v60 }
  0x39   :  { %1453 = vmatpush3.bf16.msra.mxu0 %v1631_v61 }
  0x3a   :  { %1549 = vmatpush3.bf16.msra.mxu1 %v1631_v61  ;;  %1454 = vmatprep.subr.bf16.mxu0 %v1638_v0 }
  0x3b   :  { %848 = vmatmul.mubr.bf16.gmra.mrb[12].mxu0 %v1612_v56  ;;  %1542 = vmatprep.subr.bf16.mxu1 %v1638_v0 }
  0x3c   :  { %945 = vmatmul.mubr.bf16.gmra.mrb[12].mxu1 %v1613_v57  ;;  %855 = vmatprep.mubr.bf16.mxu0 %v1616_v58 }
  0x3d   :  { %952 = vmatprep.mubr.bf16.mxu1 %v1618_v59  ;;  %1455 = vmatpush3.bf16.msra.mxu0 %v1639_v1 }
  0x3e   :  { %1550 = vmatpush3.bf16.msra.mxu1 %v1639_v1  ;;  %1456 = vmatprep.subr.bf16.mxu0 %v1646_v4 }
  0x3f   :  { %1543 = vmatprep.subr.bf16.mxu1 %v1646_v4 }
  0x41   :  { %1457 = vmatpush3.bf16.msra.mxu0 %v1647_v5 }
  0x42   :  { %1551 = vmatpush3.bf16.msra.mxu1 %v1647_v5 }
  0x43   :  { %856 = vmatmul.mubr.bf16.gmra.mrb[16].mxu0 %v1620_v62  ;;  %1516 = vmatprep.subr.bf16.mxu1 %v1654_v8 }
  0x44   :  { %953 = vmatmul.mubr.bf16.gmra.mrb[16].mxu1 %v1621_v63  ;;  %863 = vmatprep.mubr.bf16.mxu0 %v1624_v2 }
  0x45   :  { %960 = vmatprep.mubr.bf16.mxu1 %v1626_v3 }
  0x4b   :  { %864 = vmatmul.mubr.bf16.gmra.mrb[20].mxu0 %v1628_v6 }
  0x4c   :  { %961 = vmatmul.mubr.bf16.gmra.mrb[20].mxu1 %v1629_v7  ;;  %871 = vmatprep.mubr.bf16.mxu0 %v1632_v9 }
  0x4d   :  { %968 = vmatprep.mubr.bf16.mxu1 %v1634_v10 }
  0x53   :  { %872 = vmatmul.mubr.bf16.gmra.mrb[24].mxu0 %v1636_v11 }
  0x54   :  { %969 = vmatmul.mubr.bf16.gmra.mrb[24].mxu1 %v1637_v12  ;;  %879 = vmatprep.mubr.bf16.mxu0 %v1640_v13 }
  0x55   :  { %976 = vmatprep.mubr.bf16.mxu1 %v1642_v14 }
  0x5b   :  { %880 = vmatmul.mubr.bf16.gmra.mrb[28].mxu0 %v1644_v15 }
  0x5c   :  { %977 = vmatmul.mubr.bf16.gmra.mrb[28].mxu1 %v1645_v16  ;;  %1017 = vmatprep.mubr.bf16.mxu0 %v1650_v17 }
  0x5d   :  { %1065 = vmatprep.mubr.bf16.mxu1 %v1653_v18 }
  0x63   :  { %1018 = vmatmul.mubr.bf16.vlgmr.msra.gmra.mrb[32].mxu0 %v1648_v19 }
  0x64   :  { %1066 = vmatmul.mubr.bf16.vlgmr.msra.gmra.mrb[32].mxu1 %v1651_v20  ;;  %1025 = vmatprep.mubr.bf16.mxu0 %v1655_v21 }
  0x65   :  { %1517 = vmatpush3.bf16.msra.mxu1 %v1654_v8  ;;  %1073 = vmatprep.mubr.bf16.mxu1 %v1657_v22 }
  0x66   :  { %1518 = vmatprep.subr.bf16.mxu1 %v1661_v23 }
  0x69   :  { %1519 = vmatpush3.bf16.msra.mxu1 %v1661_v23 }
  0x6b   :  { %1026 = vmatmul.mubr.bf16.gmra.mrb[36].mxu0 %v1659_v24 }
  0x6c   :  { %1074 = vmatmul.mubr.bf16.gmra.mrb[36].mxu1 %v1660_v25  ;;  %1033 = vmatprep.mubr.bf16.mxu0 %v1662_v26 }
  0x6d   :  { %1520 = vmatprep.mubr.msk.bf16.mxu1 %vm766_vm0, %v1664_v27 }
  0x73   :  { %1034 = vmatmul.mubr.bf16.gmra.mrb[40].mxu0 %v1665_v28 }
  0x74   :  { %1521 = vmatmul.mubr.msk.bf16.vlgmr.msra.gmra.mrb[40].mxu1 %vm766_vm0, %v1666_v29  ;;  %1041 = vmatprep.mubr.bf16.mxu0 %v1667_v30 }
  0x75   :  { %1524 = vmatprep.mubr.msk.bf16.mxu1 %vm766_vm0, %v1669_v31 }
  0x7b   :  { %1042 = vmatmul.mubr.bf16.gmra.mrb[44].mxu0 %v1670_v32 }
  0x7c   :  { %1525 = vmatmul.mubr.msk.bf16.gmra.mrb[44].mxu1 %vm766_vm0, %v1671_v33  ;;  %1049 = vmatprep.mubr.bf16.mxu0 %v1672_v34 }
  0x7d   :  { %1528 = vmatprep.mubr.msk.bf16.mxu1 %vm766_vm0, %v1674_v35 }
  0x83   :  { %1050 = vmatmul.mubr.bf16.gmra.mrb[48].mxu0 %v1675_v36 }
  0x84   :  { %1529 = vmatmul.mubr.msk.bf16.gmra.mrb[48].mxu1 %vm766_vm0, %v1676_v37  ;;  %1057 = vmatprep.mubr.bf16.mxu0 %v1677_v38 }
  0x85   :  { %1532 = vmatprep.mubr.msk.bf16.mxu1 %vm766_vm0, %v1679_v39 }
  0x8b   :  { %1058 = vmatmul.mubr.bf16.gmra.mrb[52].mxu0 %v1680_v40 }
  0x8c   :  { %1533 = vmatmul.mubr.msk.bf16.gmra.mrb[52].mxu1 %vm766_vm0, %v1681_v41 }
  0xf6   :  { %v1330_v42 = vpop.f32.mrb[0].mxu0 }
  0xf7   :  { %v1331_v44 = vpop.f32.mrb[1].mxu0  ;;  %v1394_v45 = vpop.f32.mrb[0].mxu1 }
  0xf8   :  { %v1332_v46 = vadd.f32 %v1331_v44, %v1330_v42  ;;  %v1333_v47 = vpop.f32.mrb[2].mxu0  ;;  %v1395_v48 = vpop.f32.mrb[1].mxu1 }
  0xf9   :  { %v1334_v49 = vpop.f32.mrb[3].mxu0  ;;  %v1396_v50 = vadd.f32 %v1395_v48, %v1394_v45  ;;  %v1397_v51 = vpop.f32.mrb[2].mxu1 }
  0xfa   :  { %v826_v52 = vadd.f32 %v1332_v46, %v2031_v43  ;;  %v1335_v53 = vadd.f32 %v1334_v49, %v1333_v47  ;;  %v1398_v54 = vpop.f32.mrb[3].mxu1 }
  0xfb   :  { %v1399_v55 = vadd.f32 %v1398_v54, %v1397_v51 }
  0xfc   :  { %v829_v56 = vadd.f32 %v1335_v53, %v2031_v43  ;;  %v2035_v57 = vadd.f32 %v1396_v50, %v826_v52 }
  0xfe   :  { %v2037_v58 = vadd.f32 %v1399_v55, %v829_v56  ;;  %v1336_v59 = vpop.f32.mrb[4].mxu0 }
  0xff   :  { %v1337_v60 = vpop.f32.mrb[5].mxu0  ;;  %v1400_v61 = vpop.f32.mrb[4].mxu1 }
 0x100   :  { %v1338_v62 = vadd.f32 %v1337_v60, %v1336_v59  ;;  %v1339_v63 = vpop.f32.mrb[6].mxu0  ;;  %v1401_v0 = vpop.f32.mrb[5].mxu1 }
 0x101   :  { %v1340_v1 = vpop.f32.mrb[7].mxu0  ;;  %v1402_v2 = vadd.f32 %v1401_v0, %v1400_v61  ;;  %v1403_v3 = vpop.f32.mrb[6].mxu1 }
 0x102   :  { %v834_v4 = vadd.f32 %v1338_v62, %v2031_v43  ;;  %v1341_v5 = vadd.f32 %v1340_v1, %v1339_v63  ;;  %v1404_v6 = vpop.f32.mrb[7].mxu1 }
 0x103   :  { %v1405_v7 = vadd.f32 %v1404_v6, %v1403_v3 }
 0x104   :  { %v837_v8 = vadd.f32 %v1341_v5, %v2031_v43  ;;  %v2041_v9 = vadd.f32 %v1402_v2, %v834_v4 }
 0x106   :  { %v2043_v10 = vadd.f32 %v1405_v7, %v837_v8  ;;  %v1342_v11 = vpop.f32.mrb[8].mxu0 }
 0x107   :  { %v1343_v12 = vpop.f32.mrb[9].mxu0  ;;  %v1406_v13 = vpop.f32.mrb[8].mxu1 }
 0x108   :  { %v1344_v14 = vadd.f32 %v1343_v12, %v1342_v11  ;;  %v1345_v15 = vpop.f32.mrb[10].mxu0  ;;  %v1407_v16 = vpop.f32.mrb[9].mxu1 }
 0x109   :  { %v1346_v17 = vpop.f32.mrb[11].mxu0  ;;  %v1408_v18 = vadd.f32 %v1407_v16, %v1406_v13  ;;  %v1409_v19 = vpop.f32.mrb[10].mxu1 }
 0x10a   :  { %v842_v20 = vadd.f32 %v1344_v14, %v2031_v43  ;;  %v1347_v21 = vadd.f32 %v1346_v17, %v1345_v15  ;;  %v1410_v22 = vpop.f32.mrb[11].mxu1 }
 0x10b   :  { %v1411_v23 = vadd.f32 %v1410_v22, %v1409_v19 }
 0x10c   :  { %v845_v24 = vadd.f32 %v1347_v21, %v2031_v43  ;;  %v2047_v25 = vadd.f32 %v1408_v18, %v842_v20 }
 0x10e   :  { %v2049_v26 = vadd.f32 %v1411_v23, %v845_v24  ;;  %v1348_v27 = vpop.f32.mrb[12].mxu0 }
 0x10f   :  { %v1349_v28 = vpop.f32.mrb[13].mxu0  ;;  %v1412_v29 = vpop.f32.mrb[12].mxu1 }
 0x110   :  { %v1350_v30 = vadd.f32 %v1349_v28, %v1348_v27  ;;  %v1351_v31 = vpop.f32.mrb[14].mxu0  ;;  %v1413_v32 = vpop.f32.mrb[13].mxu1 }
 0x111   :  { %v1352_v33 = vpop.f32.mrb[15].mxu0  ;;  %v1414_v34 = vadd.f32 %v1413_v32, %v1412_v29  ;;  %v1415_v35 = vpop.f32.mrb[14].mxu1 }
 0x112   :  { %v850_v36 = vadd.f32 %v1350_v30, %v2031_v43  ;;  %v1353_v37 = vadd.f32 %v1352_v33, %v1351_v31  ;;  %v1416_v38 = vpop.f32.mrb[15].mxu1 }
 0x113   :  { %v1417_v39 = vadd.f32 %v1416_v38, %v1415_v35 }
 0x114   :  { %v853_v40 = vadd.f32 %v1353_v37, %v2031_v43  ;;  %v2053_v41 = vadd.f32 %v1414_v34, %v850_v36 }
 0x116   :  { %v2055_v42 = vadd.f32 %v1417_v39, %v853_v40  ;;  %v1354_v44 = vpop.f32.mrb[16].mxu0 }
 0x117   :  { %v1355_v45 = vpop.f32.mrb[17].mxu0  ;;  %v1418_v46 = vpop.f32.mrb[16].mxu1 }
 0x118   :  { %v1356_v47 = vadd.f32 %v1355_v45, %v1354_v44  ;;  %v1357_v48 = vpop.f32.mrb[18].mxu0  ;;  %v1419_v49 = vpop.f32.mrb[17].mxu1 }
 0x119   :  { %v1358_v50 = vpop.f32.mrb[19].mxu0  ;;  %v1420_v51 = vadd.f32 %v1419_v49, %v1418_v46  ;;  %v1421_v52 = vpop.f32.mrb[18].mxu1 }
 0x11a   :  { %v858_v53 = vadd.f32 %v1356_v47, %v2031_v43  ;;  %v1359_v54 = vadd.f32 %v1358_v50, %v1357_v48  ;;  %v1422_v55 = vpop.f32.mrb[19].mxu1 }
 0x11b   :  { %v1423_v56 = vadd.f32 %v1422_v55, %v1421_v52 }
 0x11c   :  { %v861_v59 = vadd.f32 %v1359_v54, %v2031_v43  ;;  %v2059_v60 = vadd.f32 %v1420_v51, %v858_v53 }
 0x11e   :  { %v2061_v61 = vadd.f32 %v1423_v56, %v861_v59  ;;  %v1360_v62 = vpop.f32.mrb[20].mxu0 }
 0x11f   :  { %v1361_v63 = vpop.f32.mrb[21].mxu0  ;;  %v1424_v0 = vpop.f32.mrb[20].mxu1 }
 0x120   :  { %v1362_v1 = vadd.f32 %v1361_v63, %v1360_v62  ;;  %v1363_v2 = vpop.f32.mrb[22].mxu0  ;;  %v1425_v3 = vpop.f32.mrb[21].mxu1 }
 0x121   :  { %v1364_v4 = vpop.f32.mrb[23].mxu0  ;;  %v1426_v5 = vadd.f32 %v1425_v3, %v1424_v0  ;;  %v1427_v6 = vpop.f32.mrb[22].mxu1 }
 0x122   :  { %v866_v7 = vadd.f32 %v1362_v1, %v2031_v43  ;;  %v1365_v8 = vadd.f32 %v1364_v4, %v1363_v2  ;;  %v1428_v11 = vpop.f32.mrb[23].mxu1 }
 0x123   :  { %v1429_v12 = vadd.f32 %v1428_v11, %v1427_v6 }
 0x124   :  { %v869_v13 = vadd.f32 %v1365_v8, %v2031_v43  ;;  %v2065_v14 = vadd.f32 %v1426_v5, %v866_v7 }
 0x126   :  { %v2067_v15 = vadd.f32 %v1429_v12, %v869_v13  ;;  %v1366_v16 = vpop.f32.mrb[24].mxu0 }
 0x127   :  { %v1367_v17 = vpop.f32.mrb[25].mxu0  ;;  %v1430_v18 = vpop.f32.mrb[24].mxu1 }
 0x128   :  { %v1368_v19 = vadd.f32 %v1367_v17, %v1366_v16  ;;  %v1369_v20 = vpop.f32.mrb[26].mxu0  ;;  %v1431_v21 = vpop.f32.mrb[25].mxu1 }
 0x129   :  { %v1370_v22 = vpop.f32.mrb[27].mxu0  ;;  %v1432_v23 = vadd.f32 %v1431_v21, %v1430_v18  ;;  %v1433_v24 = vpop.f32.mrb[26].mxu1 }
 0x12a   :  { %v874_v27 = vadd.f32 %v1368_v19, %v2031_v43  ;;  %v1371_v28 = vadd.f32 %v1370_v22, %v1369_v20  ;;  %v1434_v29 = vpop.f32.mrb[27].mxu1 }
 0x12b   :  { %v1435_v30 = vadd.f32 %v1434_v29, %v1433_v24 }
 0x12c   :  { %v877_v31 = vadd.f32 %v1371_v28, %v2031_v43  ;;  %v971_v32 = vadd.f32 %v1432_v23, %v874_v27 }
 0x12e   :  { %v974_v33 = vadd.f32 %v1435_v30, %v877_v31  ;;  %v1372_v34 = vpop.f32.mrb[28].mxu0 }
 0x12f   :  { %v1373_v35 = vpop.f32.mrb[29].mxu0  ;;  %v1436_v36 = vpop.f32.mrb[28].mxu1 }
 0x130   :  { %v1374_v37 = vadd.f32 %v1373_v35, %v1372_v34  ;;  %v1375_v38 = vpop.f32.mrb[30].mxu0  ;;  %v1437_v39 = vpop.f32.mrb[29].mxu1 }
 0x131   :  { %v1376_v40 = vpop.f32.mrb[31].mxu0  ;;  %v1438_v44 = vadd.f32 %v1437_v39, %v1436_v36  ;;  %v1439_v45 = vpop.f32.mrb[30].mxu1 }
 0x132   :  { %v882_v46 = vadd.f32 %v1374_v37, %v2031_v43  ;;  %v1377_v47 = vadd.f32 %v1376_v40, %v1375_v38  ;;  %v1440_v48 = vpop.f32.mrb[31].mxu1 }
 0x133   :  { %v1441_v49 = vadd.f32 %v1440_v48, %v1439_v45 }
 0x134   :  { %v885_v50 = vadd.f32 %v1377_v47, %v2031_v43  ;;  %v979_v51 = vadd.f32 %v1438_v44, %v882_v46 }
 0x136   :  { %v982_v52 = vadd.f32 %v1441_v49, %v885_v50  ;;  %v1458_v53 = vpop.f32.mrb[32].mxu0 }
 0x137   :  { %v1494_v54 = vpop.f32.mrb[32].mxu1  ;;  %v1459_v55 = vpop.f32.mrb[33].mxu0 }
 0x138   :  { %v1460_v56 = vadd.f32 %v1459_v55, %v1458_v53  ;;  %v1495_v59 = vpop.f32.mrb[33].mxu1  ;;  %v1461_v62 = vpop.f32.mrb[34].mxu0 }
 0x139   :  { %v1496_v63 = vadd.f32 %v1495_v59, %v1494_v54  ;;  %v1497_v0 = vpop.f32.mrb[34].mxu1  ;;  %v1462_v1 = vpop.f32.mrb[35].mxu0 }
 0x13a   :  { %v1463_v2 = vadd.f32 %v1462_v1, %v1461_v62  ;;  %v1498_v3 = vpop.f32.mrb[35].mxu1  ;;  %v1020_v4 = vadd.f32 %v1460_v56, %v2035_v57 }
 0x13b   :  { %v1499_v5 = vadd.f32 %v1498_v3, %v1497_v0  ;;  %v2074_v6 = vadd.f32 %v1496_v63, %v971_v32 }
 0x13c   :  { %v1023_v43 = vadd.f32 %v1463_v2, %v2037_v58 }
 0x13d   :  { %v2077_v7 = vadd.f32 %v1499_v5, %v974_v33 }
 0x13e   :  { %v1464_v8 = vpop.f32.mrb[36].mxu0 }
 0x13f   :  { %v1500_v11 = vpop.f32.mrb[36].mxu1  ;;  %v1465_v12 = vpop.f32.mrb[37].mxu0 }
 0x140   :  { %v1466_v13 = vadd.f32 %v1465_v12, %v1464_v8  ;;  %v1501_v16 = vpop.f32.mrb[37].mxu1  ;;  %v1467_v17 = vpop.f32.mrb[38].mxu0 }
 0x141   :  { %v1502_v18 = vadd.f32 %v1501_v16, %v1500_v11  ;;  %v1503_v19 = vpop.f32.mrb[38].mxu1  ;;  %v1468_v20 = vpop.f32.mrb[39].mxu0 }
 0x142   :  { %v1469_v21 = vadd.f32 %v1468_v20, %v1467_v17  ;;  %v1504_v22 = vpop.f32.mrb[39].mxu1  ;;  %v1028_v57 = vadd.f32 %v1466_v13, %v2041_v9 }
 0x143   :  { %v1505_v23 = vadd.f32 %v1504_v22, %v1503_v19  ;;  %v2080_v24 = vadd.f32 %v1502_v18, %v979_v51 }
 0x144   :  { %v1031_v58 = vadd.f32 %v1469_v21, %v2043_v10 }
 0x145   :  { %v2083_v27 = vadd.f32 %v1505_v23, %v982_v52 }
 0x146   :  { %v1470_v28 = vpop.f32.mrb[40].mxu0 }
 0x147   :  { %v1522_v29 = vpop.f32.mrb[40].mxu1  ;;  %v1471_v30 = vpop.f32.mrb[41].mxu0 }
 0x148   :  { %v1125_v31 = vadd.f32 %v1522_v29, %v1028_v57  ;;  %v1472_v32 = vadd.f32 %v1471_v30, %v1470_v28  ;;  %v1116_v33 = vpop.f32.mrb[41].mxu1  ;;  %v1473_v34 = vpop.f32.mrb[42].mxu0 }
 0x149   :  { %v1117_v35 = vadd.f32 %v1116_v33, %v1020_v4  ;;  %v1523_v36 = vpop.f32.mrb[42].mxu1  ;;  %v1474_v37 = vpop.f32.mrb[43].mxu0 }
 0x14a   :  { %1181 = vst [vmem:[%s2148_s3 + $0x10] sm:$0xff] %v1125_v31  ;;  %v1128_v9 = vadd.f32 %v1523_v36, %v1031_v58  ;;  %v1475_v38 = vadd.f32 %v1474_v37, %v1473_v34  ;;  %v1119_v39 = vpop.f32.mrb[43].mxu1  ;;  %v1036_v10 = vadd.f32 %v1472_v32, %v2047_v25 }
 0x14b   :  { %1179 = vst [vmem:[%s2148_s3] sm:$0xff] %v1117_v35  ;;  %v1120_v40 = vadd.f32 %v1119_v39, %v1023_v43 }
 0x14c   :  { %1182 = vst [vmem:[%s2148_s3 + $0x18] sm:$0xff] %v1128_v9  ;;  %v1039_v44 = vadd.f32 %v1475_v38, %v2049_v26 }
 0x14d   :  { %1180 = vst [vmem:[%s2148_s3 + $0x8] sm:$0xff] %v1120_v40 }
 0x14e   :  { %v1476_v45 = vpop.f32.mrb[44].mxu0 }
 0x14f   :  { %v1526_v46 = vpop.f32.mrb[44].mxu1  ;;  %v1477_v47 = vpop.f32.mrb[45].mxu0 }
 0x150   :  { %v1478_v48 = vadd.f32 %v1477_v47, %v1476_v45  ;;  %v1132_v25 = vpop.f32.mrb[45].mxu1  ;;  %v1479_v49 = vpop.f32.mrb[46].mxu0 }
 0x151   :  { %v1133_v50 = vadd.f32 %v1132_v25, %v1036_v10  ;;  %v1527_v51 = vpop.f32.mrb[46].mxu1  ;;  %v1480_v52 = vpop.f32.mrb[47].mxu0 }
 0x152   :  { %v1044_v53 = vadd.f32 %v1478_v48, %v2053_v41  ;;  %v1481_v54 = vadd.f32 %v1480_v52, %v1479_v49  ;;  %v1135_v55 = vpop.f32.mrb[47].mxu1 }
 0x153   :  { %1183 = vst [vmem:[%s2148_s3 + $0x20] sm:$0xff] %v1133_v50  ;;  %v1136_v26 = vadd.f32 %v1135_v55, %v1039_v44 }
 0x154   :  { %v1141_v56 = vadd.f32 %v1526_v46, %v1044_v53  ;;  %v1047_v59 = vadd.f32 %v1481_v54, %v2055_v42 }
 0x155   :  { %1184 = vst [vmem:[%s2148_s3 + $0x28] sm:$0xff] %v1136_v26 }
 0x156   :  { %1185 = vst [vmem:[%s2148_s3 + $0x30] sm:$0xff] %v1141_v56  ;;  %v1144_v62 = vadd.f32 %v1527_v51, %v1047_v59  ;;  %v1482_v41 = vpop.f32.mrb[48].mxu0 }
 0x157   :  { %v1483_v63 = vpop.f32.mrb[49].mxu0  ;;  %v1530_v0 = vpop.f32.mrb[48].mxu1 }
 0x158   :  { %1186 = vst [vmem:[%s2148_s3 + $0x38] sm:$0xff] %v1144_v62  ;;  %v1484_v1 = vadd.f32 %v1483_v63, %v1482_v41  ;;  %v1485_v2 = vpop.f32.mrb[50].mxu0  ;;  %v1148_v3 = vpop.f32.mrb[49].mxu1 }
 0x159   :  { %v1486_v42 = vpop.f32.mrb[51].mxu0  ;;  %v1531_v4 = vpop.f32.mrb[50].mxu1 }
 0x15a   :  { %v1487_v5 = vadd.f32 %v1486_v42, %v1485_v2  ;;  %v1052_v43 = vadd.f32 %v1484_v1, %v2059_v60  ;;  %v1151_v8 = vpop.f32.mrb[51].mxu1 }
 0x15c   :  { %v1149_v11 = vadd.f32 %v1148_v3, %v1052_v43  ;;  %v1055_v12 = vadd.f32 %v1487_v5, %v2061_v61 }
 0x15e   :  { %1187 = vst [vmem:[%s2148_s3 + $0x40] sm:$0xff] %v1149_v11  ;;  %v1152_v13 = vadd.f32 %v1151_v8, %v1055_v12  ;;  %v1488_v16 = vpop.f32.mrb[52].mxu0 }
 0x15f   :  { %v1534_v17 = vpop.f32.mrb[52].mxu1  ;;  %v1489_v18 = vpop.f32.mrb[53].mxu0 }
 0x160   :  { %1188 = vst [vmem:[%s2148_s3 + $0x48] sm:$0xff] %v1152_v13  ;;  %v1173_v19 = vadd.f32 %v1534_v17, %v2080_v24  ;;  %v1490_v20 = vadd.f32 %v1489_v18, %v1488_v16  ;;  %v1164_v60 = vpop.f32.mrb[53].mxu1  ;;  %v1491_v21 = vpop.f32.mrb[54].mxu0 }
 0x161   :  { %v1165_v22 = vadd.f32 %v1164_v60, %v2074_v6  ;;  %v1535_v61 = vpop.f32.mrb[54].mxu1  ;;  %v1492_v57 = vpop.f32.mrb[55].mxu0 }
 0x162   :  { %1193 = vst [vmem:[%s2148_s3 + $0x70] sm:$0xff] %v1173_v19  ;;  %v1060_v23 = vadd.f32 %v1490_v20, %v2065_v14  ;;  %v1176_v58 = vadd.f32 %v1535_v61, %v2083_v27  ;;  %v1493_v28 = vadd.f32 %v1492_v57, %v1491_v21  ;;  %v1167_v29 = vpop.f32.mrb[55].mxu1 }
 0x163   :  { %1191 = vst [vmem:[%s2148_s3 + $0x60] sm:$0xff] %v1165_v22  ;;  %v1168_v24 = vadd.f32 %v1167_v29, %v2077_v7 }
 0x164   :  { %v1157_v30 = vadd.f32 %v1530_v0, %v1060_v23  ;;  %1194 = vst [vmem:[%s2148_s3 + $0x78] sm:$0xff] %v1176_v58  ;;  %v1063_v6 = vadd.f32 %v1493_v28, %v2067_v15 }
 0x165   :  { %1192 = vst [vmem:[%s2148_s3 + $0x68] sm:$0xff] %v1168_v24 }
 0x166   :  { %1189 = vst [vmem:[%s2148_s3 + $0x50] sm:$0xff] %v1157_v30  ;;  %v1160_v14 = vadd.f32 %v1531_v4, %v1063_v6 }
 0x168   :  { %1190 = vst [vmem:[%s2148_s3 + $0x58] sm:$0xff] %v1160_v14 }

// kernel: char_lstm_crf_forward.10
= control target key start
LH: loop header
LB: loop body
LE: loop exit
PB: predicated region body
PF: predicated region fallthrough
CT: control target
= control target key end

     0   :  { %vm94_vm0 = vcmask 261120   ;;  %s408_s1 = inlined_call_operand.vmem [shape: bf16[32,128], index: 1, kind: input, shape index: {}]   ;;  %s409_s0 = inlined_call_operand.vmem [shape: bf16[128,32], index: 0, kind: input, shape index: {}]   ;;  %s410_s2 = inlined_call_operand.vmem [shape: f32[1,128], index: 2, kind: input, shape index: {}]   ;;  %s411_s3 = inlined_call_operand.vmem [shape: f32[128,128], index: 3, kind: output, shape index: {}]  }
   0x1   :  { %v289_v0 = vld [vmem:[%s408_s1] sm:$0xff]   ;;  %v290_v1 = vld [vmem:[%s408_s1 + $0x8] sm:$0xff]   ;;  %v295_v6 = vld [vmem:[%s409_s0 + $0x10] sm:$0xff]  }
   0x2   :  { %265 = vmatprep.subr.bf16.mxu0 %v289_v0  ;;  %285 = vmatprep.subr.bf16.mxu1 %v289_v0  ;;  %v291_v2 = vld [vmem:[%s409_s0] sm:$0xff]   ;;  %v293_v4 = vld [vmem:[%s409_s0 + $0x8] sm:$0xff]   ;;  %v296_v7 = vld [vmem:[%s409_s0 + $0x30] sm:$0xff]  }
   0x3   :  { %266 = vmatpush3.bf16.msra.mxu0 %v289_v0  ;;  %287 = vmatpush3.bf16.msra.mxu1 %v289_v0  ;;  %v292_v3 = vld [vmem:[%s409_s0 + $0x20] sm:$0xff]   ;;  %v294_v5 = vld [vmem:[%s409_s0 + $0x28] sm:$0xff]   ;;  %v297_v8 = vld [vmem:[%s409_s0 + $0x18] sm:$0xff]  }
   0x4   :  { %267 = vmatprep.subr.bf16.mxu0 %v290_v1  ;;  %286 = vmatprep.subr.bf16.mxu1 %v290_v1  ;;  %v298_v9 = vld [vmem:[%s409_s0 + $0x38] sm:$0xff]   ;;  %v236_v10 = vld [vmem:[%s410_s2] ss:$0 sm:$0xff] }
   0x5   :  { %269 = vmatprep.mubr.msk.bf16.mxu0 %vm94_vm0, %v291_v2  ;;  %277 = vmatprep.mubr.msk.bf16.mxu1 %vm94_vm0, %v292_v3 }
   0x7   :  { %268 = vmatpush3.bf16.msra.mxu0 %v290_v1  ;;  %288 = vmatpush3.bf16.msra.mxu1 %v290_v1 }
   0xa   :  { %270 = vmatmul.mubr.msk.bf16.vlgmr.msra.gmra.mrb[0].mxu0 %vm94_vm0, %v293_v4  ;;  %278 = vmatmul.mubr.msk.bf16.vlgmr.msra.gmra.mrb[0].mxu1 %vm94_vm0, %v294_v5 }
   0xb   :  { %273 = vmatprep.mubr.msk.bf16.mxu0 %vm94_vm0, %v295_v6  ;;  %281 = vmatprep.mubr.msk.bf16.mxu1 %vm94_vm0, %v296_v7 }
  0x12   :  { %274 = vmatmul.mubr.msk.bf16.gmra.mrb[4].mxu0 %vm94_vm0, %v297_v8  ;;  %282 = vmatmul.mubr.msk.bf16.gmra.mrb[4].mxu1 %vm94_vm0, %v298_v9 }
  0xdd   :  { %v271_v11 = vpop.f32.mrb[0].mxu0  ;;  %v279_v12 = vpop.f32.mrb[0].mxu1 }
  0xde   :  { %v162_v13 = vadd.f32 %v271_v11, %v236_v10  ;;  %v194_v14 = vadd.f32 %v279_v12, %v236_v10  ;;  %v153_v15 = vpop.f32.mrb[1].mxu0  ;;  %v185_v16 = vpop.f32.mrb[1].mxu1 }
  0xdf   :  { %v154_v17 = vadd.f32 %v236_v10, %v153_v15  ;;  %v186_v18 = vadd.f32 %v236_v10, %v185_v16  ;;  %v272_v19 = vpop.f32.mrb[2].mxu0  ;;  %v280_v20 = vpop.f32.mrb[2].mxu1 }
  0xe0   :  { %218 = vst [vmem:[%s411_s3 + $0x10] sm:$0xff] %v162_v13  ;;  %226 = vst [vmem:[%s411_s3 + $0x50] sm:$0xff] %v194_v14  ;;  %v165_v21 = vadd.f32 %v272_v19, %v236_v10  ;;  %v197_v22 = vadd.f32 %v280_v20, %v236_v10  ;;  %v156_v23 = vpop.f32.mrb[3].mxu0  ;;  %v188_v24 = vpop.f32.mrb[3].mxu1 }
  0xe1   :  { %216 = vst [vmem:[%s411_s3] sm:$0xff] %v154_v17  ;;  %224 = vst [vmem:[%s411_s3 + $0x40] sm:$0xff] %v186_v18  ;;  %v157_v25 = vadd.f32 %v236_v10, %v156_v23  ;;  %v189_v26 = vadd.f32 %v236_v10, %v188_v24 }
  0xe2   :  { %219 = vst [vmem:[%s411_s3 + $0x18] sm:$0xff] %v165_v21  ;;  %227 = vst [vmem:[%s411_s3 + $0x58] sm:$0xff] %v197_v22 }
  0xe3   :  { %217 = vst [vmem:[%s411_s3 + $0x8] sm:$0xff] %v157_v25  ;;  %225 = vst [vmem:[%s411_s3 + $0x48] sm:$0xff] %v189_v26 }
  0xe5   :  { %v275_v27 = vpop.f32.mrb[4].mxu0  ;;  %v283_v28 = vpop.f32.mrb[4].mxu1 }
  0xe6   :  { %v178_v29 = vadd.f32 %v275_v27, %v236_v10  ;;  %v210_v30 = vadd.f32 %v283_v28, %v236_v10  ;;  %v169_v31 = vpop.f32.mrb[5].mxu0  ;;  %v201_v32 = vpop.f32.mrb[5].mxu1 }
  0xe7   :  { %v170_v33 = vadd.f32 %v236_v10, %v169_v31  ;;  %v202_v34 = vadd.f32 %v236_v10, %v201_v32  ;;  %v276_v35 = vpop.f32.mrb[6].mxu0  ;;  %v284_v36 = vpop.f32.mrb[6].mxu1 }
  0xe8   :  { %222 = vst [vmem:[%s411_s3 + $0x30] sm:$0xff] %v178_v29  ;;  %230 = vst [vmem:[%s411_s3 + $0x70] sm:$0xff] %v210_v30  ;;  %v181_v37 = vadd.f32 %v276_v35, %v236_v10  ;;  %v213_v38 = vadd.f32 %v284_v36, %v236_v10  ;;  %v172_v39 = vpop.f32.mrb[7].mxu0  ;;  %v204_v40 = vpop.f32.mrb[7].mxu1 }
  0xe9   :  { %220 = vst [vmem:[%s411_s3 + $0x20] sm:$0xff] %v170_v33  ;;  %228 = vst [vmem:[%s411_s3 + $0x60] sm:$0xff] %v202_v34  ;;  %v173_v41 = vadd.f32 %v236_v10, %v172_v39  ;;  %v205_v42 = vadd.f32 %v236_v10, %v204_v40 }
  0xea   :  { %223 = vst [vmem:[%s411_s3 + $0x38] sm:$0xff] %v181_v37  ;;  %231 = vst [vmem:[%s411_s3 + $0x78] sm:$0xff] %v213_v38 }
  0xeb   :  { %221 = vst [vmem:[%s411_s3 + $0x28] sm:$0xff] %v173_v41  ;;  %229 = vst [vmem:[%s411_s3 + $0x68] sm:$0xff] %v205_v42 }

// kernel: char_lstm_crf_forward.8
= control target key start
LH: loop header
LB: loop body
LE: loop exit
PB: predicated region body
PF: predicated region fallthrough
CT: control target
= control target key end

     0   :  { %vm19_vm0 = vcmask 123904   ;;  %v959_v0 = vmov 0.0   ;;  %vm960_vm1 = vmmov 0   ;;  %vm36_vm2 = vcmask 130048   ;;  %s962_s15 = smov 96   ;;  %s963_s16 = smov 16   ;;  %s1245_s2 = inlined_call_operand.vmem [shape: bf16[16,64], index: 2, kind: input, shape index: {}]   ;;  %s1246_s1 = inlined_call_operand.vmem [shape: f32[8,2,64], index: 1, kind: input, shape index: {}]   ;;  %s1247_s0 = inlined_call_operand.vmem [shape: s32[2,1], index: 0, kind: input, shape index: {}]   ;;  %s1248_s3 = inlined_call_operand.vmem [shape: f32[8,2,16], index: 3, kind: output, shape index: {}]  }
   0x1   :  { %835 = vmatprep.subr.bf16.mxu0 %v959_v0  ;;  %v992_v1 = vld [vmem:[%s1245_s2] sm:$0xff]   ;;  %837 = vmatprep.mubr.msk.bf16.mxu0 %vm960_vm1, %v959_v0  ;;  %20 = vst.msk [vmem:[#allocation2] sm:$0x3] %vm19_vm0, %v959_v0  ;;  %21 = vst.msk [vmem:[#allocation3] sm:$0x3] %vm19_vm0, %v959_v0  ;;  %v961_v10 = vmov 0  }
   0x2   :  { %841 = vmatprep.subr.bf16.mxu1 %v959_v0  ;;  %843 = vmatprep.mubr.msk.bf16.mxu1 %vm960_vm1, %v959_v0  ;;  %v28_v4 = vld [vmem:[%s1246_s1] sm:$0x3]  ;;  %s964_s19 = smov 48   ;;  %s966_s20 = smov 80   ;;  %v784_v33 = vld [vmem:[%s1246_s1 + $0x2] sm:$0x3] }
   0x3   :  { %836 = vmatpush3.bf16.msra.mxu0 %v992_v1  ;;  %842 = vmatpush3.bf16.msra.mxu1 %v992_v1  ;;  %v1022_v16 = vld [vmem:[%s1247_s0] sm:$0x3]  ;;  %s965_s0 = smov 32   ;;  %v789_v58 = vld [vmem:[%s1246_s1 + $0x4] sm:$0x3] }
   0x4   :  { %847 = vmatprep.subr.bf16.mxu0 %v959_v0  ;;  %853 = vmatprep.subr.bf16.mxu1 %v959_v0  ;;  %vm783_vm3 = vcmp.gt.s32.totalorder %v1022_v16, 0  ;;  %vm787_vm5 = vcmp.gt.s32.totalorder %v1022_v16, 1  ;;  %vm792_vm7 = vcmp.gt.s32.totalorder %v1022_v16, 2  ;;  %vm797_vm9 = vcmp.gt.s32.totalorder %v1022_v16, 3 }
   0x5   :  { %892 = vset.pattern.permute.xlu1 %v961_v10  ;;  %893 = vset.pattern.permute.xlu0 %v961_v10  ;;  %v111_v20 = vsel %vm783_vm3, 1, %v961_v10  ;;  %v206_v40 = vsel %vm787_vm5, 1, %v961_v10  ;;  %vm802_vm11 = vcmp.gt.s32.totalorder %v1022_v16, 4  ;;  %vm807_vm13 = vcmp.gt.s32.totalorder %v1022_v16, 5 }
   0x6   :  { %vm812_vm15 = vcmp.gt.s32.totalorder %v1022_v16, 6  ;;  %vm817_vm3 = vcmp.gt.s32.totalorder %v1022_v16, 7 }
   0x8   :  { %v25_v2 = vld [vmem:[#allocation2] sm:$0x3]  ;;  %v26_v12 = vld [vmem:[#allocation3] sm:$0x3] }
   0x9   :  { %v29_v3 = vpack.c.bf16 %v25_v2, %v25_v2 }
   0xb   :  { %838 = vmatmul.mubr.msk.bf16.vlgmr.msra.gmra.mrb[0].mxu0 %vm36_vm2, %v29_v3  ;;  %v297_v3 = vsel %vm792_vm7, 1, %v961_v10 }
   0xc   :  { %848 = vmatpush3.bf16.msra.mxu0 %v992_v1  ;;  %849 = vmatprep.mubr.msk.bf16.mxu0 %vm960_vm1, %v959_v0 }
   0xd   :  { %859 = vmatprep.subr.bf16.mxu0 %v959_v0 }
  0xde   :  { %v74_v5 = vpop.f32.mrb[0].mxu0 }
  0xdf   :  { %v80_v6 = vadd.f32 %v74_v5, %v28_v4  ;;  %v839_v7 = vpop.f32.mrb[1].mxu0 }
  0xe0   :  { %v77_v8 = vpop.f32.mrb[2].mxu0 }
  0xe1   :  { %895 = vtanh.f32 %v80_v6  ;;  %v840_v9 = vpop.f32.mrb[3].mxu0  ;;  %v782_v13 = vmul.f32 -1.442695, %v80_v6 }
  0xe3   :  { %897 = vpow2.f32 %v782_v13 }
  0xeb   :  { %v896_v11 = vpop.eup %895 }
  0xec   :  { %94 = vrot.lane.b32.xlu0 %v896_v11, %s962_s15 }
  0xed   :  { %v898_v14 = vpop.eup %897 }
  0xee   :  { %v84_v15 = vadd.f32 1.0, %v898_v14 }
  0xf0   :  { %89 = vrot.lane.b32.xlu0 %v26_v12, %s963_s16  ;;  %899 = vrcp.f32 %v84_v15 }
  0xfa   :  { %v900_v17 = vpop.eup %899 }
 0x15e   :  { %v95_v18 = vpop.permute.xlu0 %94 }
 0x15f   :  { %v97_v19 = vmul.f32 %v900_v17, %v95_v18 }
 0x161   :  { %99 = vrot.lane.b32.xlu1 %v97_v19, %s963_s16 }
 0x162   :  { %v90_v21 = vpop.permute.xlu0 %89 }
 0x163   :  { %v92_v22 = vmul.f32 %v900_v17, %v90_v21 }
 0x165   :  { %113 = vperm.xlu1 %892, %v111_v20  }
 0x169   :  { %117 = vrot.lane.b32.xlu1 %v25_v2, %s964_s19 }
 0x1d3   :  { %v100_v23 = vpop.permute.xlu1 %99 }
 0x1d4   :  { %v102_v24 = vadd.f32 %v100_v23, %v92_v22  ;;  %v794_v23 = vld [vmem:[%s1246_s1 + $0x6] sm:$0x3] }
 0x1d6   :  { %901 = vtanh.f32 %v102_v24 }
 0x1e0   :  { %v902_v25 = vpop.eup %901 }
 0x1e1   :  { %105 = vrot.lane.b32.xlu0 %v902_v25, %s965_s0 }
 0x1e4   :  { %v1028_v26 = vpop.permute.xlu1 %113 }
 0x1e5   :  { %vm115_vm4 = vcmp.eq.s32.totalorder %v1028_v26, 1 }
 0x1e6   :  { %v121_v47 = vsel %vm115_vm4, %v102_v24, %v90_v21 }
 0x1e8   :  { %v118_v28 = vpop.permute.xlu1 %117 }
 0x253   :  { %v106_v27 = vpop.permute.xlu0 %105 }
 0x254   :  { %v1030_v29 = vmul.f32 %v900_v17, %v106_v27 }
 0x256   :  { %v120_v30 = vsel %vm115_vm4, %v1030_v29, %v118_v28 }
 0x257   :  { %v132_v31 = vpack.c.bf16 %v120_v30, %v120_v30 }
 0x259   :  { %134 = vrot.lane.b32.xlu0 %v132_v31, %s966_s20 }
 0x2cb   :  { %v135_v32 = vpop.permute.xlu0 %134 }
 0x2cc   :  { %844 = vmatmul.mubr.msk.bf16.vlgmr.msra.gmra.mrb[0].mxu1 %vm36_vm2, %v135_v32  ;;  %v388_v32 = vsel %vm797_vm9, 1, %v961_v10 }
 0x2cd   :  { %854 = vmatpush3.bf16.msra.mxu1 %v992_v1  ;;  %855 = vmatprep.mubr.msk.bf16.mxu1 %vm960_vm1, %v959_v0 }
 0x2ce   :  { %865 = vmatprep.subr.bf16.mxu1 %v959_v0 }
 0x39f   :  { %v173_v34 = vpop.f32.mrb[0].mxu1 }
 0x3a0   :  { %v179_v35 = vadd.f32 %v784_v33, %v173_v34  ;;  %v845_v36 = vpop.f32.mrb[1].mxu1 }
 0x3a1   :  { %v176_v37 = vpop.f32.mrb[2].mxu1 }
 0x3a2   :  { %903 = vtanh.f32 %v179_v35  ;;  %v846_v38 = vpop.f32.mrb[3].mxu1  ;;  %v786_v41 = vmul.f32 -1.442695, %v179_v35 }
 0x3a4   :  { %905 = vpow2.f32 %v786_v41 }
 0x3ac   :  { %v904_v39 = vpop.eup %903 }
 0x3ad   :  { %189 = vrot.lane.b32.xlu1 %v904_v39, %s962_s15 }
 0x3ae   :  { %v906_v42 = vpop.eup %905 }
 0x3af   :  { %v183_v43 = vadd.f32 1.0, %v906_v42 }
 0x3b1   :  { %208 = vperm.xlu1 %892, %v206_v40   ;;  %907 = vrcp.f32 %v183_v43 }
 0x3bb   :  { %v908_v44 = vpop.eup %907 }
 0x3bc   :  { %v187_v48 = vmul.f32 %v908_v44, %v121_v47 }
 0x41f   :  { %v190_v45 = vpop.permute.xlu1 %189 }
 0x420   :  { %v192_v46 = vmul.f32 %v908_v44, %v190_v45 }
 0x422   :  { %194 = vrot.lane.b32.xlu0 %v192_v46, %s963_s16 }
 0x430   :  { %v1052_v52 = vpop.permute.xlu1 %208 }
 0x431   :  { %vm210_vm6 = vcmp.eq.s32.totalorder %v1052_v52, 1 }
 0x494   :  { %v195_v49 = vpop.permute.xlu0 %194 }
 0x495   :  { %v197_v50 = vadd.f32 %v195_v49, %v187_v48 }
 0x497   :  { %909 = vtanh.f32 %v197_v50  ;;  %v212_v11 = vsel %vm210_vm6, %v197_v50, %v121_v47  ;;  %v799_v50 = vld [vmem:[%s1246_s1 + $0x8] sm:$0x3] }
 0x4a1   :  { %v910_v51 = vpop.eup %909 }
 0x4a2   :  { %200 = vrot.lane.b32.xlu0 %v910_v51, %s965_s0 }
 0x514   :  { %v201_v53 = vpop.permute.xlu0 %200 }
 0x515   :  { %v1054_v54 = vmul.f32 %v908_v44, %v201_v53 }
 0x517   :  { %v211_v55 = vsel %vm210_vm6, %v1054_v54, %v120_v30 }
 0x518   :  { %v223_v56 = vpack.c.bf16 %v211_v55, %v211_v55 }
 0x51a   :  { %225 = vrot.lane.b32.xlu1 %v223_v56, %s966_s20 }
 0x58c   :  { %v226_v57 = vpop.permute.xlu1 %225 }
 0x58d   :  { %850 = vmatmul.mubr.msk.bf16.vlgmr.msra.gmra.mrb[4].mxu0 %vm36_vm2, %v226_v57 }
 0x58e   :  { %860 = vmatpush3.bf16.msra.mxu0 %v992_v1  ;;  %861 = vmatprep.mubr.msk.bf16.mxu0 %vm960_vm1, %v959_v0 }
 0x58f   :  { %871 = vmatprep.subr.bf16.mxu0 %v959_v0 }
 0x660   :  { %v264_v59 = vpop.f32.mrb[4].mxu0 }
 0x661   :  { %v270_v60 = vadd.f32 %v789_v58, %v264_v59  ;;  %v851_v61 = vpop.f32.mrb[5].mxu0  ;;  %v479_v59 = vsel %vm802_vm11, 1, %v961_v10 }
 0x662   :  { %v267_v62 = vpop.f32.mrb[6].mxu0 }
 0x663   :  { %911 = vtanh.f32 %v270_v60  ;;  %v852_v63 = vpop.f32.mrb[7].mxu0  ;;  %v791_v4 = vmul.f32 -1.442695, %v270_v60 }
 0x665   :  { %913 = vpow2.f32 %v791_v4 }
 0x66d   :  { %v912_v2 = vpop.eup %911 }
 0x66e   :  { %280 = vrot.lane.b32.xlu0 %v912_v2, %s962_s15 }
 0x66f   :  { %v914_v5 = vpop.eup %913 }
 0x670   :  { %v274_v6 = vadd.f32 1.0, %v914_v5 }
 0x672   :  { %299 = vperm.xlu0 %893, %v297_v3   ;;  %915 = vrcp.f32 %v274_v6 }
 0x67c   :  { %v916_v7 = vpop.eup %915 }
 0x67d   :  { %v278_v12 = vmul.f32 %v916_v7, %v212_v11 }
 0x6e0   :  { %v281_v8 = vpop.permute.xlu0 %280 }
 0x6e1   :  { %v283_v9 = vmul.f32 %v916_v7, %v281_v8 }
 0x6e3   :  { %285 = vrot.lane.b32.xlu1 %v283_v9, %s963_s16 }
 0x6f1   :  { %v1076_v17 = vpop.permute.xlu0 %299 }
 0x6f2   :  { %vm301_vm8 = vcmp.eq.s32.totalorder %v1076_v17, 1 }
 0x755   :  { %v286_v13 = vpop.permute.xlu1 %285 }
 0x756   :  { %v288_v14 = vadd.f32 %v286_v13, %v278_v12 }
 0x758   :  { %917 = vtanh.f32 %v288_v14  ;;  %v303_v39 = vsel %vm301_vm8, %v288_v14, %v212_v11 }
 0x762   :  { %v918_v15 = vpop.eup %917 }
 0x763   :  { %291 = vrot.lane.b32.xlu1 %v918_v15, %s965_s0 }
 0x7d5   :  { %v292_v18 = vpop.permute.xlu1 %291 }
 0x7d6   :  { %v1078_v19 = vmul.f32 %v916_v7, %v292_v18  ;;  %v804_v18 = vld [vmem:[%s1246_s1 + $0xa] sm:$0x3] }
 0x7d8   :  { %v302_v20 = vsel %vm301_vm8, %v1078_v19, %v211_v55 }
 0x7d9   :  { %v314_v21 = vpack.c.bf16 %v302_v20, %v302_v20 }
 0x7db   :  { %316 = vrot.lane.b32.xlu1 %v314_v21, %s966_s20 }
 0x84d   :  { %v317_v22 = vpop.permute.xlu1 %316 }
 0x84e   :  { %856 = vmatmul.mubr.msk.bf16.vlgmr.msra.gmra.mrb[4].mxu1 %vm36_vm2, %v317_v22 }
 0x84f   :  { %866 = vmatpush3.bf16.msra.mxu1 %v992_v1  ;;  %867 = vmatprep.mubr.msk.bf16.mxu1 %vm960_vm1, %v959_v0 }
 0x850   :  { %877 = vmatprep.subr.bf16.mxu1 %v959_v0 }
 0x921   :  { %v355_v24 = vpop.f32.mrb[4].mxu1 }
 0x922   :  { %v361_v25 = vadd.f32 %v794_v23, %v355_v24  ;;  %v857_v27 = vpop.f32.mrb[5].mxu1 }
 0x923   :  { %v358_v28 = vpop.f32.mrb[6].mxu1 }
 0x924   :  { %919 = vtanh.f32 %v361_v25  ;;  %v858_v30 = vpop.f32.mrb[7].mxu1  ;;  %v796_v33 = vmul.f32 -1.442695, %v361_v25 }
 0x926   :  { %921 = vpow2.f32 %v796_v33 }
 0x92e   :  { %v920_v31 = vpop.eup %919 }
 0x92f   :  { %371 = vrot.lane.b32.xlu0 %v920_v31, %s962_s15 }
 0x930   :  { %v922_v34 = vpop.eup %921 }
 0x931   :  { %v365_v35 = vadd.f32 1.0, %v922_v34 }
 0x933   :  { %390 = vperm.xlu0 %893, %v388_v32   ;;  %923 = vrcp.f32 %v365_v35 }
 0x93d   :  { %v924_v36 = vpop.eup %923 }
 0x93e   :  { %v369_v40 = vmul.f32 %v924_v36, %v303_v39 }
 0x9a1   :  { %v372_v37 = vpop.permute.xlu0 %371 }
 0x9a2   :  { %v374_v38 = vmul.f32 %v924_v36, %v372_v37 }
 0x9a4   :  { %376 = vrot.lane.b32.xlu1 %v374_v38, %s963_s16 }
 0x9b2   :  { %v1100_v44 = vpop.permute.xlu0 %390 }
 0x9b3   :  { %vm392_vm10 = vcmp.eq.s32.totalorder %v1100_v44, 1 }
 0xa16   :  { %v377_v41 = vpop.permute.xlu1 %376 }
 0xa17   :  { %v379_v42 = vadd.f32 %v377_v41, %v369_v40 }
 0xa19   :  { %925 = vtanh.f32 %v379_v42  ;;  %v394_v4 = vsel %vm392_vm10, %v379_v42, %v303_v39 }
 0xa23   :  { %v926_v43 = vpop.eup %925 }
 0xa24   :  { %382 = vrot.lane.b32.xlu1 %v926_v43, %s965_s0 }
 0xa96   :  { %v383_v45 = vpop.permute.xlu1 %382 }
 0xa97   :  { %v1102_v46 = vmul.f32 %v924_v36, %v383_v45  ;;  %v809_v45 = vld [vmem:[%s1246_s1 + $0xc] sm:$0x3] }
 0xa99   :  { %v393_v47 = vsel %vm392_vm10, %v1102_v46, %v302_v20 }
 0xa9a   :  { %v405_v48 = vpack.c.bf16 %v393_v47, %v393_v47 }
 0xa9c   :  { %407 = vrot.lane.b32.xlu0 %v405_v48, %s966_s20 }
 0xb0e   :  { %v408_v49 = vpop.permute.xlu0 %407 }
 0xb0f   :  { %862 = vmatmul.mubr.msk.bf16.vlgmr.msra.gmra.mrb[8].mxu0 %vm36_vm2, %v408_v49 }
 0xb10   :  { %872 = vmatpush3.bf16.msra.mxu0 %v992_v1  ;;  %873 = vmatprep.mubr.msk.bf16.mxu0 %vm960_vm1, %v959_v0 }
 0xbe2   :  { %v446_v51 = vpop.f32.mrb[8].mxu0 }
 0xbe3   :  { %v452_v53 = vadd.f32 %v799_v50, %v446_v51  ;;  %v863_v55 = vpop.f32.mrb[9].mxu0 }
 0xbe4   :  { %v449_v56 = vpop.f32.mrb[10].mxu0  ;;  %v661_v55 = vsel %vm812_vm15, 1, %v961_v10 }
 0xbe5   :  { %927 = vtanh.f32 %v452_v53  ;;  %v864_v57 = vpop.f32.mrb[11].mxu0  ;;  %v801_v60 = vmul.f32 -1.442695, %v452_v53 }
 0xbe7   :  { %929 = vpow2.f32 %v801_v60 }
 0xbef   :  { %v928_v58 = vpop.eup %927 }
 0xbf0   :  { %462 = vrot.lane.b32.xlu1 %v928_v58, %s962_s15 }
 0xbf1   :  { %v930_v61 = vpop.eup %929 }
 0xbf2   :  { %v456_v62 = vadd.f32 1.0, %v930_v61 }
 0xbf4   :  { %481 = vperm.xlu1 %892, %v479_v59   ;;  %931 = vrcp.f32 %v456_v62 }
 0xbfe   :  { %v932_v63 = vpop.eup %931 }
 0xbff   :  { %v460_v5 = vmul.f32 %v932_v63, %v394_v4 }
 0xc62   :  { %v463_v2 = vpop.permute.xlu1 %462 }
 0xc63   :  { %v465_v3 = vmul.f32 %v932_v63, %v463_v2 }
 0xc65   :  { %467 = vrot.lane.b32.xlu0 %v465_v3, %s963_s16 }
 0xc73   :  { %v1123_v9 = vpop.permute.xlu1 %481 }
 0xc74   :  { %vm483_vm12 = vcmp.eq.s32.totalorder %v1123_v9, 1 }
 0xcd7   :  { %v468_v6 = vpop.permute.xlu0 %467 }
 0xcd8   :  { %v470_v7 = vadd.f32 %v468_v6, %v460_v5 }
 0xcda   :  { %933 = vtanh.f32 %v470_v7  ;;  %v485_v33 = vsel %vm483_vm12, %v470_v7, %v394_v4 }
 0xce4   :  { %v934_v8 = vpop.eup %933 }
 0xce5   :  { %473 = vrot.lane.b32.xlu0 %v934_v8, %s965_s0 }
 0xd57   :  { %v474_v11 = vpop.permute.xlu0 %473 }
 0xd58   :  { %v1125_v12 = vmul.f32 %v932_v63, %v474_v11 }
 0xd5a   :  { %v484_v13 = vsel %vm483_vm12, %v1125_v12, %v393_v47  ;;  %v486_v16 = vsel %vm483_vm12, %v1125_v12, 0.0 }
 0xd5b   :  { %v496_v14 = vpack.c.bf16 %v484_v13, %v484_v13 }
 0xd5d   :  { %498 = vrot.lane.b32.xlu1 %v496_v14, %s966_s20  ;;  %v814_v14 = vld [vmem:[%s1246_s1 + $0xe] sm:$0x3] }
 0xdcf   :  { %v499_v15 = vpop.permute.xlu1 %498 }
 0xdd0   :  { %868 = vmatmul.mubr.msk.bf16.vlgmr.msra.gmra.mrb[8].mxu1 %vm36_vm2, %v499_v15 }
 0xdd1   :  { %878 = vmatpush3.bf16.msra.mxu1 %v992_v1  ;;  %879 = vmatprep.mubr.msk.bf16.mxu1 %vm960_vm1, %v959_v0  ;;  %v570_v1 = vsel %vm807_vm13, 1, %v961_v10 }
 0xea3   :  { %v537_v20 = vpop.f32.mrb[8].mxu1 }
 0xea4   :  { %v543_v21 = vadd.f32 %v804_v18, %v537_v20  ;;  %v869_v22 = vpop.f32.mrb[9].mxu1 }
 0xea5   :  { %v540_v23 = vpop.f32.mrb[10].mxu1 }
 0xea6   :  { %935 = vtanh.f32 %v543_v21  ;;  %v870_v24 = vpop.f32.mrb[11].mxu1  ;;  %v806_v27 = vmul.f32 -1.442695, %v543_v21 }
 0xea7   :  { %v752_v24 = vsel %vm817_vm3, 1, %v961_v10 }
 0xea8   :  { %937 = vpow2.f32 %v806_v27 }
 0xeb0   :  { %v936_v25 = vpop.eup %935 }
 0xeb1   :  { %553 = vrot.lane.b32.xlu0 %v936_v25, %s962_s15  ;;  %v122_v25 = vsel %vm115_vm4, %v1030_v29, 0.0 }
 0xeb2   :  { %v938_v0 = vpop.eup %937 }
 0xeb3   :  { %v547_v28 = vadd.f32 1.0, %v938_v0 }
 0xeb5   :  { %572 = vperm.xlu0 %893, %v570_v1   ;;  %939 = vrcp.f32 %v547_v28  ;;  %v304_v1 = vsel %vm301_vm8, %v1078_v19, 0.0 }
 0xebf   :  { %v940_v30 = vpop.eup %939 }
 0xec0   :  { %v551_v34 = vmul.f32 %v940_v30, %v485_v33 }
 0xf23   :  { %v554_v31 = vpop.permute.xlu0 %553 }
 0xf24   :  { %v556_v32 = vmul.f32 %v940_v30, %v554_v31 }
 0xf26   :  { %558 = vrot.lane.b32.xlu1 %v556_v32, %s963_s16 }
 0xf34   :  { %v1146_v38 = vpop.permute.xlu0 %572 }
 0xf35   :  { %vm574_vm14 = vcmp.eq.s32.totalorder %v1146_v38, 1 }
 0xf98   :  { %v559_v35 = vpop.permute.xlu1 %558 }
 0xf99   :  { %v561_v36 = vadd.f32 %v559_v35, %v551_v34 }
 0xf9b   :  { %941 = vtanh.f32 %v561_v36  ;;  %v576_v62 = vsel %vm574_vm14, %v561_v36, %v485_v33 }
 0xfa5   :  { %v942_v37 = vpop.eup %941 }
 0xfa6   :  { %564 = vrot.lane.b32.xlu1 %v942_v37, %s965_s0 }
0x1018   :  { %v565_v39 = vpop.permute.xlu1 %564 }
0x1019   :  { %v1148_v40 = vmul.f32 %v940_v30, %v565_v39  ;;  %v213_v39 = vsel %vm210_vm6, %v1054_v54, 0.0 }
0x101b   :  { %v575_v41 = vsel %vm574_vm14, %v1148_v40, %v484_v13 }
0x101c   :  { %v587_v42 = vpack.c.bf16 %v575_v41, %v575_v41 }
0x101e   :  { %589 = vrot.lane.b32.xlu0 %v587_v42, %s966_s20  ;;  %v577_v42 = vsel %vm574_vm14, %v1148_v40, 0.0 }
0x1090   :  { %v590_v43 = vpop.permute.xlu0 %589 }
0x1091   :  { %874 = vmatmul.mubr.msk.bf16.vlgmr.msra.gmra.mrb[12].mxu0 %vm36_vm2, %v590_v43 }
0x1164   :  { %v628_v47 = vpop.f32.mrb[12].mxu0 }
0x1165   :  { %v634_v48 = vadd.f32 %v809_v45, %v628_v47  ;;  %v875_v49 = vpop.f32.mrb[13].mxu0 }
0x1166   :  { %v631_v50 = vpop.f32.mrb[14].mxu0 }
0x1167   :  { %943 = vtanh.f32 %v634_v48  ;;  %v876_v51 = vpop.f32.mrb[15].mxu0  ;;  %v811_v56 = vmul.f32 -1.442695, %v634_v48 }
0x1169   :  { %945 = vpow2.f32 %v811_v56 }
0x1171   :  { %v944_v53 = vpop.eup %943 }
0x1172   :  { %644 = vrot.lane.b32.xlu1 %v944_v53, %s962_s15 }
0x1173   :  { %v946_v57 = vpop.eup %945 }
0x1174   :  { %v638_v58 = vadd.f32 1.0, %v946_v57 }
0x1176   :  { %663 = vperm.xlu1 %892, %v661_v55   ;;  %947 = vrcp.f32 %v638_v58 }
0x1180   :  { %v948_v59 = vpop.eup %947 }
0x1181   :  { %v642_v63 = vmul.f32 %v948_v59, %v576_v62 }
0x11e4   :  { %v645_v60 = vpop.permute.xlu1 %644 }
0x11e5   :  { %v647_v61 = vmul.f32 %v948_v59, %v645_v60 }
0x11e7   :  { %649 = vrot.lane.b32.xlu0 %v647_v61, %s963_s16 }
0x11f5   :  { %v664_v5 = vpop.permute.xlu1 %663 }
0x11f6   :  { %vm665_vm1 = vcmp.eq.s32.totalorder %v664_v5, 1 }
0x1259   :  { %v650_v2 = vpop.permute.xlu0 %649 }
0x125a   :  { %v652_v3 = vadd.f32 %v650_v2, %v642_v63 }
0x125c   :  { %949 = vtanh.f32 %v652_v3  ;;  %v667_v32 = vsel %vm665_vm1, %v652_v3, %v576_v62 }
0x1266   :  { %v950_v4 = vpop.eup %949 }
0x1267   :  { %655 = vrot.lane.b32.xlu0 %v950_v4, %s965_s0 }
0x12d9   :  { %v656_v6 = vpop.permute.xlu0 %655 }
0x12da   :  { %v658_v7 = vmul.f32 %v948_v59, %v656_v6 }
0x12dc   :  { %v1167_v8 = vsel %vm665_vm1, %v658_v7, %v575_v41  ;;  %v668_v10 = vsel %vm665_vm1, %v658_v7, 0.0  ;;  %v395_v41 = vsel %vm392_vm10, %v1102_v46, 0.0 }
0x12dd   :  { %v678_v11 = vpack.c.bf16 %v1167_v8, %v1167_v8 }
0x12df   :  { %680 = vrot.lane.b32.xlu1 %v678_v11, %s966_s20 }
0x1351   :  { %v681_v13 = vpop.permute.xlu1 %680 }
0x1352   :  { %880 = vmatmul.mubr.msk.bf16.vlgmr.msra.gmra.mrb[12].mxu1 %vm36_vm2, %v681_v13 }
0x1425   :  { %v719_v15 = vpop.f32.mrb[12].mxu1 }
0x1426   :  { %v725_v18 = vadd.f32 %v814_v14, %v719_v15  ;;  %v881_v20 = vpop.f32.mrb[13].mxu1 }
0x1427   :  { %v722_v21 = vpop.f32.mrb[14].mxu1 }
0x1428   :  { %951 = vtanh.f32 %v725_v18  ;;  %v882_v22 = vpop.f32.mrb[15].mxu1  ;;  %v816_v26 = vmul.f32 -1.442695, %v725_v18 }
0x142a   :  { %953 = vpow2.f32 %v816_v26 }
0x1432   :  { %v952_v23 = vpop.eup %951 }
0x1433   :  { %735 = vrot.lane.b32.xlu0 %v952_v23, %s962_s15 }
0x1434   :  { %v954_v29 = vpop.eup %953 }
0x1435   :  { %v729_v27 = vadd.f32 1.0, %v954_v29 }
0x1437   :  { %754 = vperm.xlu0 %893, %v752_v24   ;;  %955 = vrcp.f32 %v729_v27 }
0x143b   :  { %124 = vrot.lane.b32.xlu0 %v122_v25, %s966_s20 }
0x143f   :  { %306 = vrot.lane.b32.xlu0 %v304_v1, %s966_s20 }
0x1441   :  { %v956_v0 = vpop.eup %955 }
0x1442   :  { %v733_v33 = vmul.f32 %v956_v0, %v667_v32 }
0x1443   :  { %488 = vrot.lane.b32.xlu0 %v486_v16, %s966_s20 }
0x1447   :  { %670 = vrot.lane.b32.xlu0 %v668_v10, %s966_s20 }
0x14a5   :  { %v736_v17 = vpop.permute.xlu0 %735 }
0x14a6   :  { %v738_v19 = vmul.f32 %v956_v0, %v736_v17 }
0x14a8   :  { %740 = vrot.lane.b32.xlu1 %v738_v19, %s963_s16  ;;  %s967_s16 = smov 112  }
0x14b6   :  { %v755_v28 = vpop.permute.xlu0 %754 }
0x14b7   :  { %vm756_vm2 = vcmp.eq.s32.totalorder %v755_v28, 1 }
0x14ba   :  { %v125_v30 = vpop.permute.xlu0 %124 }
0x14bb   :  { %128 = vst.msk [vmem:[%s1248_s3] sm:$0x3] %vm19_vm0, %v125_v30 }
0x14be   :  { %v307_v9 = vpop.permute.xlu0 %306 }
0x14bf   :  { %793 = vst.msk [vmem:[%s1248_s3 + $0x4] sm:$0x3] %vm19_vm0, %v307_v9 }
0x14c2   :  { %v489_v12 = vpop.permute.xlu0 %488 }
0x14c3   :  { %803 = vst.msk [vmem:[%s1248_s3 + $0x8] sm:$0x3] %vm19_vm0, %v489_v12 }
0x14c6   :  { %v671_v31 = vpop.permute.xlu0 %670 }
0x14c7   :  { %813 = vst.msk [vmem:[%s1248_s3 + $0xc] sm:$0x3] %vm19_vm0, %v671_v31 }
0x151a   :  { %v741_v34 = vpop.permute.xlu1 %740 }
0x151b   :  { %v743_v35 = vadd.f32 %v741_v34, %v733_v33 }
0x151d   :  { %957 = vtanh.f32 %v743_v35  ;;  %v758_v36 = vsel %vm756_vm2, %v743_v35, %v667_v32 }
0x1527   :  { %v958_v37 = vpop.eup %957 }
0x1528   :  { %746 = vrot.lane.b32.xlu1 %v958_v37, %s965_s0 }
0x152c   :  { %215 = vrot.lane.b32.xlu1 %v213_v39, %s966_s20 }
0x1530   :  { %397 = vrot.lane.b32.xlu1 %v395_v41, %s966_s20 }
0x1534   :  { %579 = vrot.lane.b32.xlu1 %v577_v42, %s966_s20 }
0x159a   :  { %v747_v43 = vpop.permute.xlu1 %746 }
0x159b   :  { %v749_v45 = vmul.f32 %v956_v0, %v747_v43 }
0x159d   :  { %v759_v47 = vsel %vm756_vm2, %v749_v45, 0.0  ;;  %v757_v52 = vsel %vm756_vm2, %v749_v45, %v1167_v8 }
0x159e   :  { %761 = vrot.lane.b32.xlu1 %v759_v47, %s966_s20  ;;  %767 = vrot.lane.b32.xlu0 %v757_v52, %s966_s20  ;;  %v216_v54 = vpop.permute.xlu1 %215 }
0x159f   :  { %788 = vst.msk [vmem:[%s1248_s3 + $0x2] sm:$0x3] %vm19_vm0, %v216_v54 }
0x15a2   :  { %772 = vrot.lane.b32.xlu1 %v758_v36, %s967_s16  ;;  %v398_v44 = vpop.permute.xlu1 %397 }
0x15a3   :  { %798 = vst.msk [vmem:[%s1248_s3 + $0x6] sm:$0x3] %vm19_vm0, %v398_v44 }
0x15a6   :  { %v580_v46 = vpop.permute.xlu1 %579 }
0x15a7   :  { %808 = vst.msk [vmem:[%s1248_s3 + $0xa] sm:$0x3] %vm19_vm0, %v580_v46 }
0x1610   :  { %v768_v38 = vpop.permute.xlu0 %767  ;;  %v762_v40 = vpop.permute.xlu1 %761 }
0x1611   :  { %770 = vst.msk [vmem:[#allocation2] sm:$0x3] %vm19_vm0, %v768_v38  ;;  %818 = vst.msk [vmem:[%s1248_s3 + $0xe] sm:$0x3] %vm19_vm0, %v762_v40 }
0x1614   :  { %v773_v48 = vpop.permute.xlu1 %772 }
0x1615   :  { %775 = vst.msk [vmem:[#allocation3] sm:$0x3] %vm19_vm0, %v773_v48 }

// kernel: char_lstm_crf_forward.9
= control target key start
LH: loop header
LB: loop body
LE: loop exit
PB: predicated region body
PF: predicated region fallthrough
CT: control target
= control target key end

     0   :  { %vm55_vm0 = vcmask 123904   ;;  %v1024_v0 = vmov 0.0   ;;  %vm1025_vm1 = vmmov 0   ;;  %vm74_vm2 = vcmask 130048   ;;  %s1027_s15 = smov 96   ;;  %s1028_s16 = smov 16   ;;  %s1310_s2 = inlined_call_operand.vmem [shape: bf16[16,64], index: 2, kind: input, shape index: {}]   ;;  %s1311_s1 = inlined_call_operand.vmem [shape: f32[8,2,64], index: 1, kind: input, shape index: {}]   ;;  %s1312_s0 = inlined_call_operand.vmem [shape: s32[2,1], index: 0, kind: input, shape index: {}]   ;;  %s1313_s3 = inlined_call_operand.vmem [shape: f32[8,2,16], index: 3, kind: output, shape index: {}]  }
   0x1   :  { %900 = vmatprep.subr.bf16.mxu0 %v1024_v0  ;;  %v1057_v1 = vld [vmem:[%s1310_s2] sm:$0xff]   ;;  %902 = vmatprep.mubr.msk.bf16.mxu0 %vm1025_vm1, %v1024_v0  ;;  %56 = vst.msk [vmem:[#allocation2] sm:$0x3] %vm55_vm0, %v1024_v0  ;;  %57 = vst.msk [vmem:[#allocation3] sm:$0x3] %vm55_vm0, %v1024_v0  ;;  %v1026_v10 = vmov 0  }
   0x2   :  { %906 = vmatprep.subr.bf16.mxu1 %v1024_v0  ;;  %908 = vmatprep.mubr.msk.bf16.mxu1 %vm1025_vm1, %v1024_v0  ;;  %v845_v4 = vld [vmem:[%s1311_s1 + $0xe] sm:$0x3]  ;;  %v1087_v16 = vld [vmem:[%s1312_s0] sm:$0x3]  ;;  %s1029_s19 = smov 48   ;;  %s1030_s0 = smov 32  }
   0x3   :  { %901 = vmatpush3.bf16.msra.mxu0 %v1057_v1  ;;  %907 = vmatpush3.bf16.msra.mxu1 %v1057_v1  ;;  %vm849_vm3 = vcmp.gt.s32.totalorder %v1087_v16, 7  ;;  %s1031_s20 = smov 80   ;;  %v851_v33 = vld [vmem:[%s1311_s1 + $0xc] sm:$0x3]  ;;  %vm854_vm5 = vcmp.gt.s32.totalorder %v1087_v16, 6  ;;  %vm859_vm7 = vcmp.gt.s32.totalorder %v1087_v16, 5 }
   0x4   :  { %912 = vmatprep.subr.bf16.mxu0 %v1024_v0  ;;  %918 = vmatprep.subr.bf16.mxu1 %v1024_v0  ;;  %v149_v20 = vsel %vm849_vm3, 1, %v1026_v10  ;;  %v245_v40 = vsel %vm854_vm5, 1, %v1026_v10  ;;  %v856_v58 = vld [vmem:[%s1311_s1 + $0xa] sm:$0x3]  ;;  %vm864_vm9 = vcmp.gt.s32.totalorder %v1087_v16, 4  ;;  %vm869_vm11 = vcmp.gt.s32.totalorder %v1087_v16, 3 }
   0x5   :  { %957 = vset.pattern.permute.xlu1 %v1026_v10  ;;  %958 = vset.pattern.permute.xlu0 %v1026_v10  ;;  %vm874_vm13 = vcmp.gt.s32.totalorder %v1087_v16, 2  ;;  %vm879_vm15 = vcmp.gt.s32.totalorder %v1087_v16, 1  ;;  %vm883_vm3 = vcmp.gt.s32.totalorder %v1087_v16, 0 }
   0x8   :  { %v61_v2 = vld [vmem:[#allocation2] sm:$0x3]  ;;  %v62_v12 = vld [vmem:[#allocation3] sm:$0x3] }
   0x9   :  { %v67_v3 = vpack.c.bf16 %v61_v2, %v61_v2 }
   0xb   :  { %903 = vmatmul.mubr.msk.bf16.vlgmr.msra.gmra.mrb[0].mxu0 %vm74_vm2, %v67_v3  ;;  %v336_v3 = vsel %vm859_vm7, 1, %v1026_v10 }
   0xc   :  { %913 = vmatpush3.bf16.msra.mxu0 %v1057_v1  ;;  %914 = vmatprep.mubr.msk.bf16.mxu0 %vm1025_vm1, %v1024_v0 }
   0xd   :  { %924 = vmatprep.subr.bf16.mxu0 %v1024_v0 }
  0xde   :  { %v112_v5 = vpop.f32.mrb[0].mxu0 }
  0xdf   :  { %v118_v6 = vadd.f32 %v845_v4, %v112_v5  ;;  %v904_v7 = vpop.f32.mrb[1].mxu0 }
  0xe0   :  { %v115_v8 = vpop.f32.mrb[2].mxu0 }
  0xe1   :  { %960 = vtanh.f32 %v118_v6  ;;  %v905_v9 = vpop.f32.mrb[3].mxu0  ;;  %v848_v13 = vmul.f32 -1.442695, %v118_v6 }
  0xe3   :  { %962 = vpow2.f32 %v848_v13 }
  0xeb   :  { %v961_v11 = vpop.eup %960 }
  0xec   :  { %132 = vrot.lane.b32.xlu0 %v961_v11, %s1027_s15 }
  0xed   :  { %v963_v14 = vpop.eup %962 }
  0xee   :  { %v122_v15 = vadd.f32 1.0, %v963_v14 }
  0xf0   :  { %127 = vrot.lane.b32.xlu0 %v62_v12, %s1028_s16  ;;  %964 = vrcp.f32 %v122_v15 }
  0xfa   :  { %v965_v17 = vpop.eup %964 }
 0x15e   :  { %v133_v18 = vpop.permute.xlu0 %132 }
 0x15f   :  { %v135_v19 = vmul.f32 %v965_v17, %v133_v18 }
 0x161   :  { %137 = vrot.lane.b32.xlu1 %v135_v19, %s1028_s16 }
 0x162   :  { %v128_v21 = vpop.permute.xlu0 %127 }
 0x163   :  { %v130_v22 = vmul.f32 %v965_v17, %v128_v21 }
 0x165   :  { %151 = vperm.xlu1 %957, %v149_v20  }
 0x169   :  { %155 = vrot.lane.b32.xlu1 %v61_v2, %s1029_s19 }
 0x1d3   :  { %v138_v23 = vpop.permute.xlu1 %137 }
 0x1d4   :  { %v140_v24 = vadd.f32 %v138_v23, %v130_v22  ;;  %v861_v23 = vld [vmem:[%s1311_s1 + $0x8] sm:$0x3] }
 0x1d6   :  { %966 = vtanh.f32 %v140_v24 }
 0x1e0   :  { %v967_v25 = vpop.eup %966 }
 0x1e1   :  { %143 = vrot.lane.b32.xlu0 %v967_v25, %s1030_s0 }
 0x1e4   :  { %v1093_v26 = vpop.permute.xlu1 %151 }
 0x1e5   :  { %vm153_vm4 = vcmp.eq.s32.totalorder %v1093_v26, 1 }
 0x1e6   :  { %v159_v47 = vsel %vm153_vm4, %v140_v24, %v128_v21 }
 0x1e8   :  { %v156_v28 = vpop.permute.xlu1 %155 }
 0x253   :  { %v144_v27 = vpop.permute.xlu0 %143 }
 0x254   :  { %v1095_v29 = vmul.f32 %v965_v17, %v144_v27 }
 0x256   :  { %v158_v30 = vsel %vm153_vm4, %v1095_v29, %v156_v28 }
 0x257   :  { %v171_v31 = vpack.c.bf16 %v158_v30, %v158_v30 }
 0x259   :  { %173 = vrot.lane.b32.xlu0 %v171_v31, %s1031_s20 }
 0x2cb   :  { %v174_v32 = vpop.permute.xlu0 %173 }
 0x2cc   :  { %909 = vmatmul.mubr.msk.bf16.vlgmr.msra.gmra.mrb[0].mxu1 %vm74_vm2, %v174_v32  ;;  %v427_v32 = vsel %vm864_vm9, 1, %v1026_v10 }
 0x2cd   :  { %919 = vmatpush3.bf16.msra.mxu1 %v1057_v1  ;;  %920 = vmatprep.mubr.msk.bf16.mxu1 %vm1025_vm1, %v1024_v0 }
 0x2ce   :  { %930 = vmatprep.subr.bf16.mxu1 %v1024_v0 }
 0x39f   :  { %v212_v34 = vpop.f32.mrb[0].mxu1 }
 0x3a0   :  { %v218_v35 = vadd.f32 %v851_v33, %v212_v34  ;;  %v910_v36 = vpop.f32.mrb[1].mxu1 }
 0x3a1   :  { %v215_v37 = vpop.f32.mrb[2].mxu1 }
 0x3a2   :  { %968 = vtanh.f32 %v218_v35  ;;  %v911_v38 = vpop.f32.mrb[3].mxu1  ;;  %v853_v41 = vmul.f32 -1.442695, %v218_v35 }
 0x3a4   :  { %970 = vpow2.f32 %v853_v41 }
 0x3ac   :  { %v969_v39 = vpop.eup %968 }
 0x3ad   :  { %228 = vrot.lane.b32.xlu1 %v969_v39, %s1027_s15 }
 0x3ae   :  { %v971_v42 = vpop.eup %970 }
 0x3af   :  { %v222_v43 = vadd.f32 1.0, %v971_v42 }
 0x3b1   :  { %247 = vperm.xlu1 %957, %v245_v40   ;;  %972 = vrcp.f32 %v222_v43 }
 0x3bb   :  { %v973_v44 = vpop.eup %972 }
 0x3bc   :  { %v226_v48 = vmul.f32 %v973_v44, %v159_v47 }
 0x41f   :  { %v229_v45 = vpop.permute.xlu1 %228 }
 0x420   :  { %v231_v46 = vmul.f32 %v973_v44, %v229_v45 }
 0x422   :  { %233 = vrot.lane.b32.xlu0 %v231_v46, %s1028_s16 }
 0x430   :  { %v1117_v52 = vpop.permute.xlu1 %247 }
 0x431   :  { %vm249_vm6 = vcmp.eq.s32.totalorder %v1117_v52, 1 }
 0x494   :  { %v234_v49 = vpop.permute.xlu0 %233 }
 0x495   :  { %v236_v50 = vadd.f32 %v234_v49, %v226_v48 }
 0x497   :  { %974 = vtanh.f32 %v236_v50  ;;  %v251_v11 = vsel %vm249_vm6, %v236_v50, %v159_v47  ;;  %v866_v50 = vld [vmem:[%s1311_s1 + $0x6] sm:$0x3] }
 0x4a1   :  { %v975_v51 = vpop.eup %974 }
 0x4a2   :  { %239 = vrot.lane.b32.xlu0 %v975_v51, %s1030_s0 }
 0x514   :  { %v240_v53 = vpop.permute.xlu0 %239 }
 0x515   :  { %v1119_v54 = vmul.f32 %v973_v44, %v240_v53 }
 0x517   :  { %v250_v55 = vsel %vm249_vm6, %v1119_v54, %v158_v30 }
 0x518   :  { %v262_v56 = vpack.c.bf16 %v250_v55, %v250_v55 }
 0x51a   :  { %264 = vrot.lane.b32.xlu1 %v262_v56, %s1031_s20 }
 0x58c   :  { %v265_v57 = vpop.permute.xlu1 %264 }
 0x58d   :  { %915 = vmatmul.mubr.msk.bf16.vlgmr.msra.gmra.mrb[4].mxu0 %vm74_vm2, %v265_v57 }
 0x58e   :  { %925 = vmatpush3.bf16.msra.mxu0 %v1057_v1  ;;  %926 = vmatprep.mubr.msk.bf16.mxu0 %vm1025_vm1, %v1024_v0 }
 0x58f   :  { %936 = vmatprep.subr.bf16.mxu0 %v1024_v0 }
 0x660   :  { %v303_v59 = vpop.f32.mrb[4].mxu0 }
 0x661   :  { %v309_v60 = vadd.f32 %v856_v58, %v303_v59  ;;  %v916_v61 = vpop.f32.mrb[5].mxu0  ;;  %v518_v59 = vsel %vm869_vm11, 1, %v1026_v10 }
 0x662   :  { %v306_v62 = vpop.f32.mrb[6].mxu0 }
 0x663   :  { %976 = vtanh.f32 %v309_v60  ;;  %v917_v63 = vpop.f32.mrb[7].mxu0  ;;  %v858_v4 = vmul.f32 -1.442695, %v309_v60 }
 0x665   :  { %978 = vpow2.f32 %v858_v4 }
 0x66d   :  { %v977_v2 = vpop.eup %976 }
 0x66e   :  { %319 = vrot.lane.b32.xlu0 %v977_v2, %s1027_s15 }
 0x66f   :  { %v979_v5 = vpop.eup %978 }
 0x670   :  { %v313_v6 = vadd.f32 1.0, %v979_v5 }
 0x672   :  { %338 = vperm.xlu0 %958, %v336_v3   ;;  %980 = vrcp.f32 %v313_v6 }
 0x67c   :  { %v981_v7 = vpop.eup %980 }
 0x67d   :  { %v317_v12 = vmul.f32 %v981_v7, %v251_v11 }
 0x6e0   :  { %v320_v8 = vpop.permute.xlu0 %319 }
 0x6e1   :  { %v322_v9 = vmul.f32 %v981_v7, %v320_v8 }
 0x6e3   :  { %324 = vrot.lane.b32.xlu1 %v322_v9, %s1028_s16 }
 0x6f1   :  { %v1141_v17 = vpop.permute.xlu0 %338 }
 0x6f2   :  { %vm340_vm8 = vcmp.eq.s32.totalorder %v1141_v17, 1 }
 0x755   :  { %v325_v13 = vpop.permute.xlu1 %324 }
 0x756   :  { %v327_v14 = vadd.f32 %v325_v13, %v317_v12 }
 0x758   :  { %982 = vtanh.f32 %v327_v14  ;;  %v342_v39 = vsel %vm340_vm8, %v327_v14, %v251_v11 }
 0x762   :  { %v983_v15 = vpop.eup %982 }
 0x763   :  { %330 = vrot.lane.b32.xlu1 %v983_v15, %s1030_s0 }
 0x7d5   :  { %v331_v18 = vpop.permute.xlu1 %330 }
 0x7d6   :  { %v1143_v19 = vmul.f32 %v981_v7, %v331_v18  ;;  %v871_v18 = vld [vmem:[%s1311_s1 + $0x4] sm:$0x3] }
 0x7d8   :  { %v341_v20 = vsel %vm340_vm8, %v1143_v19, %v250_v55 }
 0x7d9   :  { %v353_v21 = vpack.c.bf16 %v341_v20, %v341_v20 }
 0x7db   :  { %355 = vrot.lane.b32.xlu1 %v353_v21, %s1031_s20 }
 0x84d   :  { %v356_v22 = vpop.permute.xlu1 %355 }
 0x84e   :  { %921 = vmatmul.mubr.msk.bf16.vlgmr.msra.gmra.mrb[4].mxu1 %vm74_vm2, %v356_v22 }
 0x84f   :  { %931 = vmatpush3.bf16.msra.mxu1 %v1057_v1  ;;  %932 = vmatprep.mubr.msk.bf16.mxu1 %vm1025_vm1, %v1024_v0 }
 0x850   :  { %942 = vmatprep.subr.bf16.mxu1 %v1024_v0 }
 0x921   :  { %v394_v24 = vpop.f32.mrb[4].mxu1 }
 0x922   :  { %v400_v25 = vadd.f32 %v861_v23, %v394_v24  ;;  %v922_v27 = vpop.f32.mrb[5].mxu1 }
 0x923   :  { %v397_v28 = vpop.f32.mrb[6].mxu1 }
 0x924   :  { %984 = vtanh.f32 %v400_v25  ;;  %v923_v30 = vpop.f32.mrb[7].mxu1  ;;  %v863_v33 = vmul.f32 -1.442695, %v400_v25 }
 0x926   :  { %986 = vpow2.f32 %v863_v33 }
 0x92e   :  { %v985_v31 = vpop.eup %984 }
 0x92f   :  { %410 = vrot.lane.b32.xlu0 %v985_v31, %s1027_s15 }
 0x930   :  { %v987_v34 = vpop.eup %986 }
 0x931   :  { %v404_v35 = vadd.f32 1.0, %v987_v34 }
 0x933   :  { %429 = vperm.xlu0 %958, %v427_v32   ;;  %988 = vrcp.f32 %v404_v35 }
 0x93d   :  { %v989_v36 = vpop.eup %988 }
 0x93e   :  { %v408_v40 = vmul.f32 %v989_v36, %v342_v39 }
 0x9a1   :  { %v411_v37 = vpop.permute.xlu0 %410 }
 0x9a2   :  { %v413_v38 = vmul.f32 %v989_v36, %v411_v37 }
 0x9a4   :  { %415 = vrot.lane.b32.xlu1 %v413_v38, %s1028_s16 }
 0x9b2   :  { %v1165_v44 = vpop.permute.xlu0 %429 }
 0x9b3   :  { %vm431_vm10 = vcmp.eq.s32.totalorder %v1165_v44, 1 }
 0xa16   :  { %v416_v41 = vpop.permute.xlu1 %415 }
 0xa17   :  { %v418_v42 = vadd.f32 %v416_v41, %v408_v40 }
 0xa19   :  { %990 = vtanh.f32 %v418_v42  ;;  %v433_v4 = vsel %vm431_vm10, %v418_v42, %v342_v39 }
 0xa23   :  { %v991_v43 = vpop.eup %990 }
 0xa24   :  { %421 = vrot.lane.b32.xlu1 %v991_v43, %s1030_s0 }
 0xa96   :  { %v422_v45 = vpop.permute.xlu1 %421 }
 0xa97   :  { %v1167_v46 = vmul.f32 %v989_v36, %v422_v45  ;;  %v876_v45 = vld [vmem:[%s1311_s1 + $0x2] sm:$0x3] }
 0xa99   :  { %v432_v47 = vsel %vm431_vm10, %v1167_v46, %v341_v20 }
 0xa9a   :  { %v444_v48 = vpack.c.bf16 %v432_v47, %v432_v47 }
 0xa9c   :  { %446 = vrot.lane.b32.xlu0 %v444_v48, %s1031_s20 }
 0xb0e   :  { %v447_v49 = vpop.permute.xlu0 %446 }
 0xb0f   :  { %927 = vmatmul.mubr.msk.bf16.vlgmr.msra.gmra.mrb[8].mxu0 %vm74_vm2, %v447_v49 }
 0xb10   :  { %937 = vmatpush3.bf16.msra.mxu0 %v1057_v1  ;;  %938 = vmatprep.mubr.msk.bf16.mxu0 %vm1025_vm1, %v1024_v0 }
 0xbe2   :  { %v485_v51 = vpop.f32.mrb[8].mxu0 }
 0xbe3   :  { %v491_v53 = vadd.f32 %v866_v50, %v485_v51  ;;  %v928_v55 = vpop.f32.mrb[9].mxu0 }
 0xbe4   :  { %v488_v56 = vpop.f32.mrb[10].mxu0  ;;  %v700_v55 = vsel %vm879_vm15, 1, %v1026_v10 }
 0xbe5   :  { %992 = vtanh.f32 %v491_v53  ;;  %v929_v57 = vpop.f32.mrb[11].mxu0  ;;  %v868_v60 = vmul.f32 -1.442695, %v491_v53 }
 0xbe7   :  { %994 = vpow2.f32 %v868_v60 }
 0xbef   :  { %v993_v58 = vpop.eup %992 }
 0xbf0   :  { %501 = vrot.lane.b32.xlu1 %v993_v58, %s1027_s15 }
 0xbf1   :  { %v995_v61 = vpop.eup %994 }
 0xbf2   :  { %v495_v62 = vadd.f32 1.0, %v995_v61 }
 0xbf4   :  { %520 = vperm.xlu1 %957, %v518_v59   ;;  %996 = vrcp.f32 %v495_v62 }
 0xbfe   :  { %v997_v63 = vpop.eup %996 }
 0xbff   :  { %v499_v5 = vmul.f32 %v997_v63, %v433_v4 }
 0xc62   :  { %v502_v2 = vpop.permute.xlu1 %501 }
 0xc63   :  { %v504_v3 = vmul.f32 %v997_v63, %v502_v2 }
 0xc65   :  { %506 = vrot.lane.b32.xlu0 %v504_v3, %s1028_s16 }
 0xc73   :  { %v1188_v9 = vpop.permute.xlu1 %520 }
 0xc74   :  { %vm522_vm12 = vcmp.eq.s32.totalorder %v1188_v9, 1 }
 0xcd7   :  { %v507_v6 = vpop.permute.xlu0 %506 }
 0xcd8   :  { %v509_v7 = vadd.f32 %v507_v6, %v499_v5 }
 0xcda   :  { %998 = vtanh.f32 %v509_v7  ;;  %v524_v33 = vsel %vm522_vm12, %v509_v7, %v433_v4 }
 0xce4   :  { %v999_v8 = vpop.eup %998 }
 0xce5   :  { %512 = vrot.lane.b32.xlu0 %v999_v8, %s1030_s0 }
 0xd57   :  { %v513_v11 = vpop.permute.xlu0 %512 }
 0xd58   :  { %v1190_v12 = vmul.f32 %v997_v63, %v513_v11 }
 0xd5a   :  { %v523_v13 = vsel %vm522_vm12, %v1190_v12, %v432_v47  ;;  %v525_v16 = vsel %vm522_vm12, %v1190_v12, 0.0 }
 0xd5b   :  { %v535_v14 = vpack.c.bf16 %v523_v13, %v523_v13 }
 0xd5d   :  { %537 = vrot.lane.b32.xlu1 %v535_v14, %s1031_s20  ;;  %v715_v14 = vld [vmem:[%s1311_s1] sm:$0x3] }
 0xdcf   :  { %v538_v15 = vpop.permute.xlu1 %537 }
 0xdd0   :  { %933 = vmatmul.mubr.msk.bf16.vlgmr.msra.gmra.mrb[8].mxu1 %vm74_vm2, %v538_v15 }
 0xdd1   :  { %943 = vmatpush3.bf16.msra.mxu1 %v1057_v1  ;;  %944 = vmatprep.mubr.msk.bf16.mxu1 %vm1025_vm1, %v1024_v0  ;;  %v609_v1 = vsel %vm874_vm13, 1, %v1026_v10 }
 0xea3   :  { %v576_v20 = vpop.f32.mrb[8].mxu1 }
 0xea4   :  { %v582_v21 = vadd.f32 %v871_v18, %v576_v20  ;;  %v934_v22 = vpop.f32.mrb[9].mxu1 }
 0xea5   :  { %v579_v23 = vpop.f32.mrb[10].mxu1 }
 0xea6   :  { %1000 = vtanh.f32 %v582_v21  ;;  %v935_v24 = vpop.f32.mrb[11].mxu1  ;;  %v873_v27 = vmul.f32 -1.442695, %v582_v21 }
 0xea7   :  { %v790_v24 = vsel %vm883_vm3, 1, %v1026_v10 }
 0xea8   :  { %1002 = vpow2.f32 %v873_v27 }
 0xeb0   :  { %v1001_v25 = vpop.eup %1000 }
 0xeb1   :  { %592 = vrot.lane.b32.xlu0 %v1001_v25, %s1027_s15  ;;  %v160_v25 = vsel %vm153_vm4, %v1095_v29, 0.0 }
 0xeb2   :  { %v1003_v0 = vpop.eup %1002 }
 0xeb3   :  { %v586_v28 = vadd.f32 1.0, %v1003_v0 }
 0xeb5   :  { %611 = vperm.xlu0 %958, %v609_v1   ;;  %1004 = vrcp.f32 %v586_v28  ;;  %v343_v1 = vsel %vm340_vm8, %v1143_v19, 0.0 }
 0xebf   :  { %v1005_v30 = vpop.eup %1004 }
 0xec0   :  { %v590_v34 = vmul.f32 %v1005_v30, %v524_v33 }
 0xf23   :  { %v593_v31 = vpop.permute.xlu0 %592 }
 0xf24   :  { %v595_v32 = vmul.f32 %v1005_v30, %v593_v31 }
 0xf26   :  { %597 = vrot.lane.b32.xlu1 %v595_v32, %s1028_s16 }
 0xf34   :  { %v1211_v38 = vpop.permute.xlu0 %611 }
 0xf35   :  { %vm613_vm14 = vcmp.eq.s32.totalorder %v1211_v38, 1 }
 0xf98   :  { %v598_v35 = vpop.permute.xlu1 %597 }
 0xf99   :  { %v600_v36 = vadd.f32 %v598_v35, %v590_v34 }
 0xf9b   :  { %1006 = vtanh.f32 %v600_v36  ;;  %v615_v62 = vsel %vm613_vm14, %v600_v36, %v524_v33 }
 0xfa5   :  { %v1007_v37 = vpop.eup %1006 }
 0xfa6   :  { %603 = vrot.lane.b32.xlu1 %v1007_v37, %s1030_s0 }
0x1018   :  { %v604_v39 = vpop.permute.xlu1 %603 }
0x1019   :  { %v1213_v40 = vmul.f32 %v1005_v30, %v604_v39  ;;  %v252_v39 = vsel %vm249_vm6, %v1119_v54, 0.0 }
0x101b   :  { %v614_v41 = vsel %vm613_vm14, %v1213_v40, %v523_v13 }
0x101c   :  { %v626_v42 = vpack.c.bf16 %v614_v41, %v614_v41 }
0x101e   :  { %628 = vrot.lane.b32.xlu0 %v626_v42, %s1031_s20  ;;  %v616_v42 = vsel %vm613_vm14, %v1213_v40, 0.0 }
0x1090   :  { %v629_v43 = vpop.permute.xlu0 %628 }
0x1091   :  { %939 = vmatmul.mubr.msk.bf16.vlgmr.msra.gmra.mrb[12].mxu0 %vm74_vm2, %v629_v43 }
0x1164   :  { %v667_v47 = vpop.f32.mrb[12].mxu0 }
0x1165   :  { %v673_v48 = vadd.f32 %v876_v45, %v667_v47  ;;  %v940_v49 = vpop.f32.mrb[13].mxu0 }
0x1166   :  { %v670_v50 = vpop.f32.mrb[14].mxu0 }
0x1167   :  { %1008 = vtanh.f32 %v673_v48  ;;  %v941_v51 = vpop.f32.mrb[15].mxu0  ;;  %v878_v56 = vmul.f32 -1.442695, %v673_v48 }
0x1169   :  { %1010 = vpow2.f32 %v878_v56 }
0x1171   :  { %v1009_v53 = vpop.eup %1008 }
0x1172   :  { %683 = vrot.lane.b32.xlu1 %v1009_v53, %s1027_s15 }
0x1173   :  { %v1011_v57 = vpop.eup %1010 }
0x1174   :  { %v677_v58 = vadd.f32 1.0, %v1011_v57 }
0x1176   :  { %702 = vperm.xlu1 %957, %v700_v55   ;;  %1012 = vrcp.f32 %v677_v58 }
0x1180   :  { %v1013_v59 = vpop.eup %1012 }
0x1181   :  { %v681_v63 = vmul.f32 %v1013_v59, %v615_v62 }
0x11e4   :  { %v684_v60 = vpop.permute.xlu1 %683 }
0x11e5   :  { %v686_v61 = vmul.f32 %v1013_v59, %v684_v60 }
0x11e7   :  { %688 = vrot.lane.b32.xlu0 %v686_v61, %s1028_s16 }
0x11f5   :  { %v703_v5 = vpop.permute.xlu1 %702 }
0x11f6   :  { %vm704_vm1 = vcmp.eq.s32.totalorder %v703_v5, 1 }
0x1259   :  { %v689_v2 = vpop.permute.xlu0 %688 }
0x125a   :  { %v691_v3 = vadd.f32 %v689_v2, %v681_v63 }
0x125c   :  { %1014 = vtanh.f32 %v691_v3  ;;  %v706_v32 = vsel %vm704_vm1, %v691_v3, %v615_v62 }
0x1266   :  { %v1015_v4 = vpop.eup %1014 }
0x1267   :  { %694 = vrot.lane.b32.xlu0 %v1015_v4, %s1030_s0 }
0x12d9   :  { %v695_v6 = vpop.permute.xlu0 %694 }
0x12da   :  { %v697_v7 = vmul.f32 %v1013_v59, %v695_v6 }
0x12dc   :  { %v1232_v8 = vsel %vm704_vm1, %v697_v7, %v614_v41  ;;  %v707_v10 = vsel %vm704_vm1, %v697_v7, 0.0  ;;  %v434_v41 = vsel %vm431_vm10, %v1167_v46, 0.0 }
0x12dd   :  { %v716_v11 = vpack.c.bf16 %v1232_v8, %v1232_v8 }
0x12df   :  { %718 = vrot.lane.b32.xlu1 %v716_v11, %s1031_s20 }
0x1351   :  { %v719_v13 = vpop.permute.xlu1 %718 }
0x1352   :  { %945 = vmatmul.mubr.msk.bf16.vlgmr.msra.gmra.mrb[12].mxu1 %vm74_vm2, %v719_v13 }
0x1425   :  { %v757_v15 = vpop.f32.mrb[12].mxu1 }
0x1426   :  { %v763_v18 = vadd.f32 %v757_v15, %v715_v14  ;;  %v946_v20 = vpop.f32.mrb[13].mxu1 }
0x1427   :  { %v760_v21 = vpop.f32.mrb[14].mxu1 }
0x1428   :  { %1016 = vtanh.f32 %v763_v18  ;;  %v947_v22 = vpop.f32.mrb[15].mxu1  ;;  %v882_v26 = vmul.f32 -1.442695, %v763_v18 }
0x142a   :  { %1018 = vpow2.f32 %v882_v26 }
0x1432   :  { %v1017_v23 = vpop.eup %1016 }
0x1433   :  { %773 = vrot.lane.b32.xlu0 %v1017_v23, %s1027_s15 }
0x1434   :  { %v1019_v29 = vpop.eup %1018 }
0x1435   :  { %v767_v27 = vadd.f32 1.0, %v1019_v29 }
0x1437   :  { %792 = vperm.xlu0 %958, %v790_v24   ;;  %1020 = vrcp.f32 %v767_v27 }
0x143b   :  { %162 = vrot.lane.b32.xlu0 %v160_v25, %s1031_s20 }
0x143f   :  { %345 = vrot.lane.b32.xlu0 %v343_v1, %s1031_s20 }
0x1441   :  { %v1021_v0 = vpop.eup %1020 }
0x1442   :  { %v771_v33 = vmul.f32 %v1021_v0, %v706_v32 }
0x1443   :  { %527 = vrot.lane.b32.xlu0 %v525_v16, %s1031_s20 }
0x1447   :  { %709 = vrot.lane.b32.xlu0 %v707_v10, %s1031_s20 }
0x14a5   :  { %v774_v17 = vpop.permute.xlu0 %773 }
0x14a6   :  { %v776_v19 = vmul.f32 %v1021_v0, %v774_v17 }
0x14a8   :  { %778 = vrot.lane.b32.xlu1 %v776_v19, %s1028_s16  ;;  %s1032_s16 = smov 112  }
0x14b6   :  { %v793_v28 = vpop.permute.xlu0 %792 }
0x14b7   :  { %vm794_vm2 = vcmp.eq.s32.totalorder %v793_v28, 1 }
0x14ba   :  { %v163_v30 = vpop.permute.xlu0 %162 }
0x14bb   :  { %850 = vst.msk [vmem:[%s1313_s3 + $0xe] sm:$0x3] %vm55_vm0, %v163_v30 }
0x14be   :  { %v346_v9 = vpop.permute.xlu0 %345 }
0x14bf   :  { %860 = vst.msk [vmem:[%s1313_s3 + $0xa] sm:$0x3] %vm55_vm0, %v346_v9 }
0x14c2   :  { %v528_v12 = vpop.permute.xlu0 %527 }
0x14c3   :  { %870 = vst.msk [vmem:[%s1313_s3 + $0x6] sm:$0x3] %vm55_vm0, %v528_v12 }
0x14c6   :  { %v710_v31 = vpop.permute.xlu0 %709 }
0x14c7   :  { %880 = vst.msk [vmem:[%s1313_s3 + $0x2] sm:$0x3] %vm55_vm0, %v710_v31 }
0x151a   :  { %v779_v34 = vpop.permute.xlu1 %778 }
0x151b   :  { %v781_v35 = vadd.f32 %v779_v34, %v771_v33 }
0x151d   :  { %1022 = vtanh.f32 %v781_v35  ;;  %v796_v36 = vsel %vm794_vm2, %v781_v35, %v706_v32 }
0x1527   :  { %v1023_v37 = vpop.eup %1022 }
0x1528   :  { %784 = vrot.lane.b32.xlu1 %v1023_v37, %s1030_s0 }
0x152c   :  { %254 = vrot.lane.b32.xlu1 %v252_v39, %s1031_s20 }
0x1530   :  { %436 = vrot.lane.b32.xlu1 %v434_v41, %s1031_s20 }
0x1534   :  { %618 = vrot.lane.b32.xlu1 %v616_v42, %s1031_s20 }
0x159a   :  { %v785_v43 = vpop.permute.xlu1 %784 }
0x159b   :  { %v787_v45 = vmul.f32 %v1021_v0, %v785_v43 }
0x159d   :  { %v797_v47 = vsel %vm794_vm2, %v787_v45, 0.0  ;;  %v795_v52 = vsel %vm794_vm2, %v787_v45, %v1232_v8 }
0x159e   :  { %799 = vrot.lane.b32.xlu1 %v797_v47, %s1031_s20  ;;  %804 = vrot.lane.b32.xlu0 %v795_v52, %s1031_s20  ;;  %v255_v54 = vpop.permute.xlu1 %254 }
0x159f   :  { %855 = vst.msk [vmem:[%s1313_s3 + $0xc] sm:$0x3] %vm55_vm0, %v255_v54 }
0x15a2   :  { %809 = vrot.lane.b32.xlu1 %v796_v36, %s1032_s16  ;;  %v437_v44 = vpop.permute.xlu1 %436 }
0x15a3   :  { %865 = vst.msk [vmem:[%s1313_s3 + $0x8] sm:$0x3] %vm55_vm0, %v437_v44 }
0x15a6   :  { %v619_v46 = vpop.permute.xlu1 %618 }
0x15a7   :  { %875 = vst.msk [vmem:[%s1313_s3 + $0x4] sm:$0x3] %vm55_vm0, %v619_v46 }
0x1610   :  { %v805_v38 = vpop.permute.xlu0 %804  ;;  %v800_v40 = vpop.permute.xlu1 %799 }
0x1611   :  { %807 = vst.msk [vmem:[#allocation2] sm:$0x3] %vm55_vm0, %v805_v38  ;;  %802 = vst.msk [vmem:[%s1313_s3] sm:$0x3] %vm55_vm0, %v800_v40 }
0x1614   :  { %v810_v48 = vpop.permute.xlu1 %809 }
0x1615   :  { %812 = vst.msk [vmem:[#allocation3] sm:$0x3] %vm55_vm0, %v810_v48 }

// kernel: char_lstm_crf_forward.13
= control target key start
LH: loop header
LB: loop body
LE: loop exit
PB: predicated region body
PF: predicated region fallthrough
CT: control target
= control target key end

     0   :  { %vm94_vm0 = vcmask 261120   ;;  %vm216_vm1 = vcmask 162816   ;;  %s425_s1 = inlined_call_operand.vmem [shape: bf16[32,20], index: 1, kind: input, shape index: {}]   ;;  %s426_s0 = inlined_call_operand.vmem [shape: bf16[128,32], index: 0, kind: input, shape index: {}]   ;;  %s427_s2 = inlined_call_operand.vmem [shape: f32[1,20], index: 2, kind: input, shape index: {}]   ;;  %s428_s3 = inlined_call_operand.vmem [shape: f32[128,20], index: 3, kind: output, shape index: {}]  }
   0x1   :  { %v290_v0 = vld [vmem:[%s425_s1] sm:$0xff]   ;;  %v291_v1 = vld [vmem:[%s425_s1 + $0x8] sm:$0xff]   ;;  %v296_v6 = vld [vmem:[%s426_s0 + $0x10] sm:$0xff]  }
   0x2   :  { %266 = vmatprep.subr.bf16.mxu0 %v290_v0  ;;  %286 = vmatprep.subr.bf16.mxu1 %v290_v0  ;;  %v292_v2 = vld [vmem:[%s426_s0] sm:$0xff]   ;;  %v294_v4 = vld [vmem:[%s426_s0 + $0x8] sm:$0xff]   ;;  %v297_v7 = vld [vmem:[%s426_s0 + $0x30] sm:$0xff]  }
   0x3   :  { %267 = vmatpush3.bf16.msra.mxu0 %v290_v0  ;;  %288 = vmatpush3.bf16.msra.mxu1 %v290_v0  ;;  %v293_v3 = vld [vmem:[%s426_s0 + $0x20] sm:$0xff]   ;;  %v295_v5 = vld [vmem:[%s426_s0 + $0x28] sm:$0xff]   ;;  %v298_v8 = vld [vmem:[%s426_s0 + $0x18] sm:$0xff]  }
   0x4   :  { %268 = vmatprep.subr.bf16.mxu0 %v291_v1  ;;  %287 = vmatprep.subr.bf16.mxu1 %v291_v1  ;;  %v299_v9 = vld [vmem:[%s426_s0 + $0x38] sm:$0xff]   ;;  %v237_v10 = vld [vmem:[%s427_s2] ss:$0 sm:$0xff] }
   0x5   :  { %270 = vmatprep.mubr.msk.bf16.mxu0 %vm94_vm0, %v292_v2  ;;  %278 = vmatprep.mubr.msk.bf16.mxu1 %vm94_vm0, %v293_v3 }
   0x7   :  { %269 = vmatpush3.bf16.msra.mxu0 %v291_v1  ;;  %289 = vmatpush3.bf16.msra.mxu1 %v291_v1 }
   0xa   :  { %271 = vmatmul.mubr.msk.bf16.vlgmr.msra.gmra.mrb[0].mxu0 %vm94_vm0, %v294_v4  ;;  %279 = vmatmul.mubr.msk.bf16.vlgmr.msra.gmra.mrb[0].mxu1 %vm94_vm0, %v295_v5 }
   0xb   :  { %274 = vmatprep.mubr.msk.bf16.mxu0 %vm94_vm0, %v296_v6  ;;  %282 = vmatprep.mubr.msk.bf16.mxu1 %vm94_vm0, %v297_v7 }
  0x12   :  { %275 = vmatmul.mubr.msk.bf16.gmra.mrb[4].mxu0 %vm94_vm0, %v298_v8  ;;  %283 = vmatmul.mubr.msk.bf16.gmra.mrb[4].mxu1 %vm94_vm0, %v299_v9 }
  0xdd   :  { %v272_v11 = vpop.f32.mrb[0].mxu0  ;;  %v280_v12 = vpop.f32.mrb[0].mxu1 }
  0xde   :  { %v162_v13 = vadd.f32 %v272_v11, %v237_v10  ;;  %v194_v14 = vadd.f32 %v280_v12, %v237_v10  ;;  %v153_v15 = vpop.f32.mrb[1].mxu0  ;;  %v185_v16 = vpop.f32.mrb[1].mxu1 }
  0xdf   :  { %v154_v17 = vadd.f32 %v237_v10, %v153_v15  ;;  %v186_v18 = vadd.f32 %v237_v10, %v185_v16  ;;  %v273_v19 = vpop.f32.mrb[2].mxu0  ;;  %v281_v20 = vpop.f32.mrb[2].mxu1 }
  0xe0   :  { %219 = vst.msk [vmem:[%s428_s3 + $0x10] sm:$0xff] %vm216_vm1, %v162_v13  ;;  %227 = vst.msk [vmem:[%s428_s3 + $0x50] sm:$0xff] %vm216_vm1, %v194_v14  ;;  %v165_v21 = vadd.f32 %v273_v19, %v237_v10  ;;  %v197_v22 = vadd.f32 %v281_v20, %v237_v10  ;;  %v156_v23 = vpop.f32.mrb[3].mxu0  ;;  %v188_v24 = vpop.f32.mrb[3].mxu1 }
  0xe1   :  { %217 = vst.msk [vmem:[%s428_s3] sm:$0xff] %vm216_vm1, %v154_v17  ;;  %225 = vst.msk [vmem:[%s428_s3 + $0x40] sm:$0xff] %vm216_vm1, %v186_v18  ;;  %v157_v25 = vadd.f32 %v237_v10, %v156_v23  ;;  %v189_v26 = vadd.f32 %v237_v10, %v188_v24 }
  0xe2   :  { %220 = vst.msk [vmem:[%s428_s3 + $0x18] sm:$0xff] %vm216_vm1, %v165_v21  ;;  %228 = vst.msk [vmem:[%s428_s3 + $0x58] sm:$0xff] %vm216_vm1, %v197_v22 }
  0xe3   :  { %218 = vst.msk [vmem:[%s428_s3 + $0x8] sm:$0xff] %vm216_vm1, %v157_v25  ;;  %226 = vst.msk [vmem:[%s428_s3 + $0x48] sm:$0xff] %vm216_vm1, %v189_v26 }
  0xe5   :  { %v276_v27 = vpop.f32.mrb[4].mxu0  ;;  %v284_v28 = vpop.f32.mrb[4].mxu1 }
  0xe6   :  { %v178_v29 = vadd.f32 %v276_v27, %v237_v10  ;;  %v210_v30 = vadd.f32 %v284_v28, %v237_v10  ;;  %v169_v31 = vpop.f32.mrb[5].mxu0  ;;  %v201_v32 = vpop.f32.mrb[5].mxu1 }
  0xe7   :  { %v170_v33 = vadd.f32 %v237_v10, %v169_v31  ;;  %v202_v34 = vadd.f32 %v237_v10, %v201_v32  ;;  %v277_v35 = vpop.f32.mrb[6].mxu0  ;;  %v285_v36 = vpop.f32.mrb[6].mxu1 }
  0xe8   :  { %223 = vst.msk [vmem:[%s428_s3 + $0x30] sm:$0xff] %vm216_vm1, %v178_v29  ;;  %231 = vst.msk [vmem:[%s428_s3 + $0x70] sm:$0xff] %vm216_vm1, %v210_v30  ;;  %v181_v37 = vadd.f32 %v277_v35, %v237_v10  ;;  %v213_v38 = vadd.f32 %v285_v36, %v237_v10  ;;  %v172_v39 = vpop.f32.mrb[7].mxu0  ;;  %v204_v40 = vpop.f32.mrb[7].mxu1 }
  0xe9   :  { %221 = vst.msk [vmem:[%s428_s3 + $0x20] sm:$0xff] %vm216_vm1, %v170_v33  ;;  %229 = vst.msk [vmem:[%s428_s3 + $0x60] sm:$0xff] %vm216_vm1, %v202_v34  ;;  %v173_v41 = vadd.f32 %v237_v10, %v172_v39  ;;  %v205_v42 = vadd.f32 %v237_v10, %v204_v40 }
  0xea   :  { %224 = vst.msk [vmem:[%s428_s3 + $0x38] sm:$0xff] %vm216_vm1, %v181_v37  ;;  %232 = vst.msk [vmem:[%s428_s3 + $0x78] sm:$0xff] %vm216_vm1, %v213_v38 }
  0xeb   :  { %222 = vst.msk [vmem:[%s428_s3 + $0x28] sm:$0xff] %vm216_vm1, %v173_v41  ;;  %230 = vst.msk [vmem:[%s428_s3 + $0x68] sm:$0xff] %vm216_vm1, %v205_v42 }

</bundles_post_ra>
